<compile_context>
chip_gen: v5e
topology: v5e:2x2
jax: 0.10.0
libtpu: 0.0.40
codegen_flags: <defaults>
</compile_context>

<pallas_src>
import jax
import jax.numpy as jnp
from jax.experimental import pallas as pl
from jax.experimental.pallas import tpu as pltpu

_BN_EPS = 1e-5
_VMEM_LIMIT_BYTES = 48 * 1024 * 1024  # explicit scoped-VMEM budget (fits v5e/v6e/v7x)


def _bn_fold(gamma, beta, mean, var, eps=_BN_EPS):
    """Fold eval-mode BatchNorm into per-channel scale/shift, shaped (1, C)."""
    scale = gamma / jnp.sqrt(var + eps)
    shift = beta - mean * scale
    return scale.astype(jnp.float32).reshape(1, -1), shift.astype(jnp.float32).reshape(1, -1)


def _choose_tm(M):
    """Largest M-tile in {1024,512,256,128} that still yields >=2 grid steps."""
    for tm in (1024, 512, 256, 128):
        if M >= 2 * tm:
            return tm
    return 128


def _choose_th(Ho, Wo, D):
    """Ho-tile for the fused kernel: bound the in-kernel tap/accumulator working
    set (~2 MiB) and expose >=2 Ho tiles for megacore / pipelining when possible."""
    budget_rows = max(Wo, (2 * 1024 * 1024) // (9 * D * 2))
    th = max(1, min(Ho, budget_rows // Wo))
    while Ho % th:
        th -= 1
    if th == Ho and Ho % 2 == 0:
        th = Ho // 2
    return th


# ----------------------------------------------------------------------------
# Kernel A: 1x1 conv_reduce (flat matmul over N*H*W rows) + folded BN + ReLU.
# Scale is pre-folded into the weight, so epilogue is add-shift + ReLU.
# Output is bf16 (inter-kernel activation).
# ----------------------------------------------------------------------------
def _reduce_kernel(x_ref, w_ref, b_ref, o_ref):
    acc = jnp.dot(x_ref[...], w_ref[...], preferred_element_type=jnp.float32)
    o_ref[...] = jnp.maximum(acc + b_ref[...], 0.0).astype(o_ref.dtype)


def conv1x1_bn_relu(x2d, w, b):
    """x2d: (M, Cin) bf16, w: (Cin, D) bf16 scale-folded, b: (1, D) f32 -> (M, D) bf16."""
    M, Cin = x2d.shape
    D = w.shape[1]
    tm = _choose_tm(M)
    Mp = ((M + tm - 1) // tm) * tm
    if Mp != M:  # pad rows up to a tile multiple instead of a full-M (grid=1) block
        x2d = jnp.pad(x2d, ((0, Mp - M), (0, 0)))
    out = pl.pallas_call(
        _reduce_kernel,
        out_shape=jax.ShapeDtypeStruct((Mp, D), jnp.bfloat16),
        grid=(Mp // tm,),
        in_specs=[
            pl.BlockSpec((tm, Cin), lambda i: (i, 0)),
            pl.BlockSpec((Cin, D), lambda i: (0, 0)),
            pl.BlockSpec((1, D), lambda i: (0, 0)),
        ],
        out_specs=pl.BlockSpec((tm, D), lambda i: (i, 0)),
        compiler_params=pltpu.CompilerParams(
            dimension_semantics=("parallel",),
            vmem_limit_bytes=_VMEM_LIMIT_BYTES),
    )(x2d, w, b)
    return out[:M] if Mp != M else out


# ----------------------------------------------------------------------------
# Kernel B (fused): grouped 3x3 conv (stride s, pad 1) + BN + ReLU
#                   + 1x1 conv_expand + BN
#                   + residual (1x1 shortcut conv + BN, or identity)
#                   + final ReLU.
# Grid = (batch, Ho tiles).  The whole padded bf16 feature map for one image
# stays VMEM-resident while the Ho-tile index varies (constant block index ->
# no re-DMA); all weights/shifts are tiny and VMEM-resident.
# ----------------------------------------------------------------------------
def _make_fused_kernel(stride, th, Wo, D, has_shortcut):
    def kernel(*refs):
        if has_shortcut:
            y1p_ref, xs_ref, w2_ref, b2_ref, w3_ref, b3_ref, ws_ref, bs_ref, o_ref = refs
        else:
            y1p_ref, xs_ref, w2_ref, b2_ref, w3_ref, b3_ref, o_ref = refs
            ws_ref = bs_ref = None

        t = pl.program_id(1)
        rows = th * Wo

        # grouped 3x3 conv (block-diagonal dense weight) over this Ho tile
        acc2 = jnp.zeros((rows, D), jnp.float32)
        for ky in range(3):
            h0 = t * th * stride + ky
            for kx in range(3):
                if stride == 1:
                    tap = y1p_ref[:, pl.ds(h0, th), pl.ds(kx, Wo), :]
                else:
                    # TODO(synk): stride>1 uses sublane-strided loads; a wrapper
                    # space-to-depth re-layout would keep these loads contiguous.
                    tap = y1p_ref[:, pl.ds(h0, th, stride=stride),
                                  pl.ds(kx, Wo, stride=stride), :]
                acc2 = acc2 + jnp.dot(tap.reshape(rows, D), w2_ref[3 * ky + kx],
                                      preferred_element_type=jnp.float32)
        # TODO(synk): concatenate the 9 taps along K (one big-K matmul) for higher
        # MXU contraction utilization on v6e/v7x, and use per-group matmuls
        # (dropping the block-diagonal dense weight) once D/cardinality >= 128.
        y2 = jnp.maximum(acc2 + b2_ref[...], 0.0).astype(jnp.bfloat16)  # BN + ReLU

        # 1x1 expand + BN (scale pre-folded into w3)
        out = jnp.dot(y2, w3_ref[...], preferred_element_type=jnp.float32) + b3_ref[...]

        # residual branch, fused
        xs2d = xs_ref[...].reshape(rows, xs_ref.shape[-1])
        if has_shortcut:
            res = jnp.dot(xs2d, ws_ref[...], preferred_element_type=jnp.float32) + bs_ref[...]
        else:
            res = xs2d.astype(jnp.float32)

        out = jnp.maximum(out + res, 0.0)
        o_ref[...] = out.reshape(1, th, Wo, o_ref.shape[-1]).astype(o_ref.dtype)

    return kernel


def fused_conv3x3_expand_residual(y1p, xs, w2, b2, w3, b3, ws, bs, *, stride, Ho, Wo):
    """y1p: (N, H+2, W+2, D) bf16 padded features; xs: (N, Ho, Wo, Cin) bf16 residual input."""
    N, Hp, Wp, D = y1p.shape
    Cin = xs.shape[-1]
    Cout = w3.shape[-1]
    th = _choose_th(Ho, Wo, D)
    has_shortcut = ws is not None

    in_specs = [
        # whole padded image per n; block index is constant across Ho tiles -> stays in VMEM
        pl.BlockSpec((1, Hp, Wp, D), lambda n, t: (n, 0, 0, 0)),
        pl.BlockSpec((1, th, Wo, Cin), lambda n, t: (n, t, 0, 0)),
        pl.BlockSpec((9, D, D), lambda n, t: (0, 0, 0)),
        pl.BlockSpec((1, D), lambda n, t: (0, 0)),
        pl.BlockSpec((D, Cout), lambda n, t: (0, 0)),
        pl.BlockSpec((1, Cout), lambda n, t: (0, 0)),
    ]
    args = [y1p, xs, w2, b2, w3, b3]
    if has_shortcut:
        in_specs += [pl.BlockSpec((Cin, Cout), lambda n, t: (0, 0)),
                     pl.BlockSpec((1, Cout), lambda n, t: (0, 0))]
        args += [ws, bs]

    kernel = _make_fused_kernel(stride, th, Wo, D, has_shortcut)
    # TODO(synk): for Cout < 128 configs, pack two W positions per output row so the
    # final store is lane-dense (realistic ResNeXt widths are already >= 128).
    return pl.pallas_call(
        kernel,
        out_shape=jax.ShapeDtypeStruct((N, Ho, Wo, Cout), jnp.float32),
        grid=(N, Ho // th),
        in_specs=in_specs,
        out_specs=pl.BlockSpec((1, th, Wo, Cout), lambda n, t: (n, t, 0, 0)),
        compiler_params=pltpu.CompilerParams(
            dimension_semantics=("parallel", "parallel"),
            vmem_limit_bytes=_VMEM_LIMIT_BYTES),
    )(*args)


# ----------------------------------------------------------------------------
# Module: deterministic synthetic parameters + forward pass built from kernels.
# ----------------------------------------------------------------------------
class ResNeXtBottleneckPallas:
    expansion = 2

    def __init__(self, in_channels, out_channels, stride, cardinality, base_width,
                 widen_factor, key):
        width_ratio = out_channels / (widen_factor * 64.0)
        D = cardinality * int(base_width * width_ratio)
        assert D % cardinality == 0
        self.in_channels = in_channels
        self.out_channels = out_channels
        self.stride = stride
        self.cardinality = cardinality
        self.D = D
        self.has_shortcut = in_channels != out_channels

        ks = jax.random.split(key, 8)

        def convw(k, shape):
            return 0.05 * jax.random.normal(k, shape, jnp.float32)

        def bnp(k, c):
            k1, k2, k3, k4 = jax.random.split(k, 4)
            gamma = 0.5 + jax.random.uniform(k1, (c,), jnp.float32)
            beta = 0.1 * jax.random.normal(k2, (c,), jnp.float32)
            mean = 0.1 * jax.random.normal(k3, (c,), jnp.float32)
            var = 0.5 + jax.random.uniform(k4, (c,), jnp.float32)
            return gamma, beta, mean, var

        # Raw parameters in PyTorch layouts (OIHW conv weights) -- kept for the reference.
        self.w_reduce = convw(ks[0], (D, in_channels, 1, 1))
        self.bn_reduce = bnp(ks[1], D)
        self.w_conv = convw(ks[2], (D, D // cardinality, 3, 3))   # grouped 3x3
        self.bn = bnp(ks[3], D)
        self.w_expand = convw(ks[4], (out_channels, D, 1, 1))
        self.bn_expand = bnp(ks[5], out_channels)
        if self.has_shortcut:
            self.w_short = convw(ks[6], (out_channels, in_channels, 1, 1))
            self.bn_short = bnp(ks[7], out_channels)

        self._prepare_kernel_weights()

    def _prepare_kernel_weights(self):
        """One-time weight prep (not per forward): fold BN scale into the conv
        weights, matmul layouts, grouped->block-diagonal 3x3 taps, bf16 casts."""
        D, card = self.D, self.cardinality

        s1, b1 = _bn_fold(*self.bn_reduce)
        self.w1p = (jnp.transpose(self.w_reduce[:, :, 0, 0]) * s1).astype(jnp.bfloat16)  # (Cin, D)
        self.b1p = b1

        gs = D // card
        w_dense = jnp.zeros((D, D, 3, 3), jnp.float32)  # block-diagonal == grouped conv
        for g in range(card):
            sl = slice(g * gs, (g + 1) * gs)
            w_dense = w_dense.at[sl, sl].set(self.w_conv[sl])
        s2, b2 = _bn_fold(*self.bn)
        w_taps = jnp.transpose(w_dense, (2, 3, 1, 0)).reshape(9, D, D)  # (tap, Din, Dout)
        self.w2p = (w_taps * s2).astype(jnp.bfloat16)
        self.b2p = b2

        s3, b3 = _bn_fold(*self.bn_expand)
        self.w3p = (jnp.transpose(self.w_expand[:, :, 0, 0]) * s3).astype(jnp.bfloat16)  # (D, Cout)
        self.b3p = b3

        if self.has_shortcut:
            ss, bs = _bn_fold(*self.bn_short)
            self.wsp = (jnp.transpose(self.w_short[:, :, 0, 0]) * ss).astype(jnp.bfloat16)
            self.bsp = bs
        else:
            self.wsp = None
            self.bsp = None

    def __call__(self, x_nchw):
        N, Cin, H, W = x_nchw.shape
        s, D = self.stride, self.D
        Ho = (H + 2 - 3) // s + 1
        Wo = (W + 2 - 3) // s + 1
        if not self.has_shortcut:
            assert s == 1, "identity shortcut requires stride == 1 (same as the PyTorch module)"

        # NCHW -> NHWC, bf16 activations (matmuls accumulate in f32 inside the kernels).
        x = jnp.transpose(x_nchw, (0, 2, 3, 1)).astype(jnp.bfloat16)

        # Stage 1: 1x1 reduce + BN + ReLU (flat matmul over N*H*W rows, big M tiles, bf16 out).
        y1 = conv1x1_bn_relu(x.reshape(N * H * W, Cin), self.w1p, self.b1p)
        y1 = y1.reshape(N, H, W, D)
        # TODO(synk): fold this pad (and the reduce itself) into the fused kernel via a
        # zero-bordered VMEM scratch to remove the last HBM round trip of y1.
        y1p = jnp.pad(y1, ((0, 0), (1, 1), (1, 1), (0, 0)))

        # Residual input rows (stride-s subsample of x).
        # TODO(synk): fold the stride-s subsample into the fused kernel's index_map.
        xs = x if s == 1 else x[:, ::s, ::s, :]

        # Stage 2 (fused): grouped 3x3 + BN + ReLU + 1x1 expand + BN + residual + ReLU.
        out = fused_conv3x3_expand_residual(
            y1p, xs, self.w2p, self.b2p, self.w3p, self.b3p, self.wsp, self.bsp,
            stride=s, Ho=Ho, Wo=Wo)
        return jnp.transpose(out, (0, 3, 1, 2))  # NHWC -> NCHW


# ----------------------------------------------------------------------------
# Pure-JAX f32 reference (for correctness check only)
# ----------------------------------------------------------------------------
def ref_forward(m, x_nchw):
    x = jnp.transpose(x_nchw.astype(jnp.float32), (0, 2, 3, 1))

    def conv(x, w_oihw, stride, padding, groups=1):
        w = jnp.transpose(w_oihw, (2, 3, 1, 0))  # OIHW -> HWIO
        return jax.lax.conv_general_dilated(
            x, w, (stride, stride), padding,
            dimension_numbers=("NHWC", "HWIO", "NHWC"),
            feature_group_count=groups)

    def bn(x, p):
        gamma, beta, mean, var = p
        return (x - mean) / jnp.sqrt(var + _BN_EPS) * gamma + beta

    y = jax.nn.relu(bn(conv(x, m.w_reduce, 1, "VALID"), m.bn_reduce))
    y = jax.nn.relu(bn(conv(y, m.w_conv, m.stride, [(1, 1), (1, 1)], m.cardinality), m.bn))
    y = bn(conv(y, m.w_expand, 1, "VALID"), m.bn_expand)
    if m.has_shortcut:
        r = bn(conv(x, m.w_short, m.stride, "VALID"), m.bn_short)
    else:
        r = x
    out = jax.nn.relu(r + y)
    return jnp.transpose(out, (0, 3, 1, 2))


if __name__ == "__main__":
    key = jax.random.PRNGKey(0)
    k_param, k_x = jax.random.split(key)

    in_channels, out_channels = 32, 64
    stride, cardinality, base_width, widen_factor = 1, 4, 16, 1  # -> D = 64
    N, H, W = 2, 16, 16

    module = ResNeXtBottleneckPallas(in_channels, out_channels, stride,
                                     cardinality, base_width, widen_factor, k_param)
    x = jax.random.normal(k_x, (N, in_channels, H, W), jnp.float32)

    out = jax.jit(module.__call__)(x)
    out = jax.block_until_ready(out)

    ref = ref_forward(module, x)
    assert out.shape == ref.shape == (N, out_channels, H // stride, W // stride)
    scale = float(jnp.max(jnp.abs(ref))) + 1e-6
    err = float(jnp.max(jnp.abs(out - ref)))
    # bf16 activations/weights (f32 accumulation) -> allow ~bf16-level error.
    if err > 0.05 * scale + 1e-3:
        raise AssertionError(f"Pallas output mismatch vs reference: max abs err {err}, ref scale {scale}")

    print("KERNEL_OK")
</pallas_src>

<mosaic_0001>
module attributes {stable_mosaic.version = 11 : i64} {
  func.func @_reduce_kernel(%arg0: i32, %arg1: memref<256x32xbf16, #tpu.memory_space<vmem>>, %arg2: memref<32x64xbf16, #tpu.memory_space<vmem>>, %arg3: memref<1x64xf32, #tpu.memory_space<vmem>>, %arg4: memref<256x64xbf16, #tpu.memory_space<vmem>>) attributes {dimension_semantics = [#tpu.dimension_semantics<parallel>], iteration_bounds = array<i64: 2>, scalar_prefetch = 0 : i64, scratch_operands = 0 : i64, tpu.core_type = #tpu.core_type<tc>, window_params = [{transform_indices = @transform_0, window_bounds = array<i64: 256, 32>}, {pipeline_mode = #tpu.pipeline_mode<synchronous>, transform_indices = @transform_1, window_bounds = array<i64: 32, 64>}, {pipeline_mode = #tpu.pipeline_mode<synchronous>, transform_indices = @transform_2, window_bounds = array<i64: 1, 64>}, {transform_indices = @transform_3, window_bounds = array<i64: 256, 64>}]} {
    %c0 = arith.constant 0 : index
    %c0_0 = arith.constant 0 : index
    %0 = vector.load %arg1[%c0, %c0_0] : memref<256x32xbf16, #tpu.memory_space<vmem>>, vector<256x32xbf16>
    %c0_1 = arith.constant 0 : index
    %c0_2 = arith.constant 0 : index
    %1 = vector.load %arg2[%c0_1, %c0_2] : memref<32x64xbf16, #tpu.memory_space<vmem>>, vector<32x64xbf16>
    %cst = arith.constant dense<0.000000e+00> : vector<256x64xf32>
    %2 = tpu.matmul %0, %1, %cst {dimension_numbers = #tpu.dot_dimension_numbers<[1], [0], [0], [1], [0, 0, 1, 1], [], []>} : vector<256x32xbf16>, vector<32x64xbf16>, vector<256x64xf32> -> vector<256x64xf32>
    %c0_3 = arith.constant 0 : index
    %c0_4 = arith.constant 0 : index
    %3 = vector.load %arg3[%c0_3, %c0_4] : memref<1x64xf32, #tpu.memory_space<vmem>>, vector<1x64xf32>
    %4 = vector.broadcast %3 : vector<1x64xf32> to vector<256x64xf32>
    %5 = arith.addf %2, %4 : vector<256x64xf32>
    %cst_5 = arith.constant 0.000000e+00 : f32
    %6 = vector.broadcast %cst_5 : f32 to vector<256x64xf32>
    %7 = arith.maximumf %5, %6 : vector<256x64xf32>
    %8 = arith.truncf %7 : vector<256x64xf32> to vector<256x64xbf16>
    %c0_6 = arith.constant 0 : index
    %c0_7 = arith.constant 0 : index
    %9 = vector.load %arg4[%c0_6, %c0_7] : memref<256x64xbf16, #tpu.memory_space<vmem>>, vector<256x64xbf16>
    tpu.vector_store %arg4[%c0_6, %c0_7], %8 {strides = array<i32>} : memref<256x64xbf16, #tpu.memory_space<vmem>>, vector<256x64xbf16>,
    return
  }
  func.func @transform_0(%arg0: i32) -> (i32, i32) {
    %c0_i32 = arith.constant 0 : i32
    %c0_i32_0 = arith.constant 0 : i32
    return %arg0, %c0_i32 : i32, i32
  }
  func.func @transform_1(%arg0: i32) -> (i32, i32) {
    %c0_i32 = arith.constant 0 : i32
    %c0_i32_0 = arith.constant 0 : i32
    %c0_i32_1 = arith.constant 0 : i32
    return %c0_i32, %c0_i32_0 : i32, i32
  }
  func.func @transform_2(%arg0: i32) -> (i32, i32) {
    %c0_i32 = arith.constant 0 : i32
    %c0_i32_0 = arith.constant 0 : i32
    %c0_i32_1 = arith.constant 0 : i32
    return %c0_i32, %c0_i32_0 : i32, i32
  }
  func.func @transform_3(%arg0: i32) -> (i32, i32) {
    %c0_i32 = arith.constant 0 : i32
    %c0_i32_0 = arith.constant 0 : i32
    return %arg0, %c0_i32 : i32, i32
  }
}

module attributes {stable_mosaic.version = 11 : i64} {
  func.func @kernel(%arg0: i32, %arg1: i32, %arg2: memref<1x18x18x64xbf16, #tpu.memory_space<vmem>>, %arg3: memref<1x8x16x32xbf16, #tpu.memory_space<vmem>>, %arg4: memref<9x64x64xbf16, #tpu.memory_space<vmem>>, %arg5: memref<1x64xf32, #tpu.memory_space<vmem>>, %arg6: memref<64x64xbf16, #tpu.memory_space<vmem>>, %arg7: memref<1x64xf32, #tpu.memory_space<vmem>>, %arg8: memref<32x64xbf16, #tpu.memory_space<vmem>>, %arg9: memref<1x64xf32, #tpu.memory_space<vmem>>, %arg10: memref<1x8x16x64xf32, #tpu.memory_space<vmem>>) attributes {dimension_semantics = [#tpu.dimension_semantics<parallel>, #tpu.dimension_semantics<parallel>], iteration_bounds = array<i64: 2, 2>, scalar_prefetch = 0 : i64, scratch_operands = 0 : i64, tpu.core_type = #tpu.core_type<tc>, window_params = [{transform_indices = @transform_0, window_bounds = array<i64: 1, 18, 18, 64>}, {transform_indices = @transform_1, window_bounds = array<i64: 1, 8, 16, 32>}, {pipeline_mode = #tpu.pipeline_mode<synchronous>, transform_indices = @transform_2, window_bounds = array<i64: 9, 64, 64>}, {pipeline_mode = #tpu.pipeline_mode<synchronous>, transform_indices = @transform_3, window_bounds = array<i64: 1, 64>}, {pipeline_mode = #tpu.pipeline_mode<synchronous>, transform_indices = @transform_4, window_bounds = array<i64: 64, 64>}, {pipeline_mode = #tpu.pipeline_mode<synchronous>, transform_indices = @transform_5, window_bounds = array<i64: 1, 64>}, {pipeline_mode = #tpu.pipeline_mode<synchronous>, transform_indices = @transform_6, window_bounds = array<i64: 32, 64>}, {pipeline_mode = #tpu.pipeline_mode<synchronous>, transform_indices = @transform_7, window_bounds = array<i64: 1, 64>}, {transform_indices = @transform_8, window_bounds = array<i64: 1, 8, 16, 64>}]} {
    %cst = arith.constant 0.000000e+00 : f32
    %0 = vector.broadcast %cst : f32 to vector<128x64xf32>
    %c8_i32 = arith.constant 8 : i32
    %1 = arith.muli %arg1, %c8_i32 : i32
    %c1_i32 = arith.constant 1 : i32
    %2 = arith.muli %1, %c1_i32 : i32
    %c0_i32 = arith.constant 0 : i32
    %3 = arith.addi %2, %c0_i32 : i32
    %c0 = arith.constant 0 : index
    %4 = arith.index_cast %3 : i32 to index
    %c0_0 = arith.constant 0 : index
    %c0_1 = arith.constant 0 : index
    %5 = vector.load %arg2[%c0, %4, %c0_0, %c0_1] : memref<1x18x18x64xbf16, #tpu.memory_space<vmem>>, vector<1x8x16x64xbf16>
    %6 = vector.shape_cast %5 : vector<1x8x16x64xbf16> to vector<128x64xbf16>
    %c0_2 = arith.constant 0 : index
    %c0_3 = arith.constant 0 : index
    %c0_4 = arith.constant 0 : index
    %7 = vector.load %arg4[%c0_2, %c0_3, %c0_4] : memref<9x64x64xbf16, #tpu.memory_space<vmem>>, vector<1x64x64xbf16>
    %8 = vector.shape_cast %7 : vector<1x64x64xbf16> to vector<64x64xbf16>
    %cst_5 = arith.constant dense<0.000000e+00> : vector<128x64xf32>
    %9 = tpu.matmul %6, %8, %cst_5 {dimension_numbers = #tpu.dot_dimension_numbers<[1], [0], [0], [1], [0, 0, 1, 1], [], []>} : vector<128x64xbf16>, vector<64x64xbf16>, vector<128x64xf32> -> vector<128x64xf32>
    %10 = arith.addf %0, %9 : vector<128x64xf32>
    %c0_6 = arith.constant 0 : index
    %11 = arith.index_cast %3 : i32 to index
    %c1 = arith.constant 1 : index
    %c0_7 = arith.constant 0 : index
    %12 = vector.load %arg2[%c0_6, %11, %c1, %c0_7] : memref<1x18x18x64xbf16, #tpu.memory_space<vmem>>, vector<1x8x16x64xbf16>
    %13 = vector.shape_cast %12 : vector<1x8x16x64xbf16> to vector<128x64xbf16>
    %c1_8 = arith.constant 1 : index
    %c0_9 = arith.constant 0 : index
    %c0_10 = arith.constant 0 : index
    %14 = vector.load %arg4[%c1_8, %c0_9, %c0_10] : memref<9x64x64xbf16, #tpu.memory_space<vmem>>, vector<1x64x64xbf16>
    %15 = vector.shape_cast %14 : vector<1x64x64xbf16> to vector<64x64xbf16>
    %cst_11 = arith.constant dense<0.000000e+00> : vector<128x64xf32>
    %16 = tpu.matmul %13, %15, %cst_11 {dimension_numbers = #tpu.dot_dimension_numbers<[1], [0], [0], [1], [0, 0, 1, 1], [], []>} : vector<128x64xbf16>, vector<64x64xbf16>, vector<128x64xf32> -> vector<128x64xf32>
    %17 = arith.addf %10, %16 : vector<128x64xf32>
    %c0_12 = arith.constant 0 : index
    %18 = arith.index_cast %3 : i32 to index
    %c2 = arith.constant 2 : index
    %c0_13 = arith.constant 0 : index
    %19 = vector.load %arg2[%c0_12, %18, %c2, %c0_13] : memref<1x18x18x64xbf16, #tpu.memory_space<vmem>>, vector<1x8x16x64xbf16>
    %20 = vector.shape_cast %19 : vector<1x8x16x64xbf16> to vector<128x64xbf16>
    %c2_14 = arith.constant 2 : index
    %c0_15 = arith.constant 0 : index
    %c0_16 = arith.constant 0 : index
    %21 = vector.load %arg4[%c2_14, %c0_15, %c0_16] : memref<9x64x64xbf16, #tpu.memory_space<vmem>>, vector<1x64x64xbf16>
    %22 = vector.shape_cast %21 : vector<1x64x64xbf16> to vector<64x64xbf16>
    %cst_17 = arith.constant dense<0.000000e+00> : vector<128x64xf32>
    %23 = tpu.matmul %20, %22, %cst_17 {dimension_numbers = #tpu.dot_dimension_numbers<[1], [0], [0], [1], [0, 0, 1, 1], [], []>} : vector<128x64xbf16>, vector<64x64xbf16>, vector<128x64xf32> -> vector<128x64xf32>
    %24 = arith.addf %17, %23 : vector<128x64xf32>
    %c8_i32_18 = arith.constant 8 : i32
    %25 = arith.muli %arg1, %c8_i32_18 : i32
    %c1_i32_19 = arith.constant 1 : i32
    %26 = arith.muli %25, %c1_i32_19 : i32
    %c1_i32_20 = arith.constant 1 : i32
    %27 = arith.addi %26, %c1_i32_20 : i32
    %c0_21 = arith.constant 0 : index
    %28 = arith.index_cast %27 : i32 to index
    %c0_22 = arith.constant 0 : index
    %c0_23 = arith.constant 0 : index
    %29 = vector.load %arg2[%c0_21, %28, %c0_22, %c0_23] : memref<1x18x18x64xbf16, #tpu.memory_space<vmem>>, vector<1x8x16x64xbf16>
    %30 = vector.shape_cast %29 : vector<1x8x16x64xbf16> to vector<128x64xbf16>
    %c3 = arith.constant 3 : index
    %c0_24 = arith.constant 0 : index
    %c0_25 = arith.constant 0 : index
    %31 = vector.load %arg4[%c3, %c0_24, %c0_25] : memref<9x64x64xbf16, #tpu.memory_space<vmem>>, vector<1x64x64xbf16>
    %32 = vector.shape_cast %31 : vector<1x64x64xbf16> to vector<64x64xbf16>
    %cst_26 = arith.constant dense<0.000000e+00> : vector<128x64xf32>
    %33 = tpu.matmul %30, %32, %cst_26 {dimension_numbers = #tpu.dot_dimension_numbers<[1], [0], [0], [1], [0, 0, 1, 1], [], []>} : vector<128x64xbf16>, vector<64x64xbf16>, vector<128x64xf32> -> vector<128x64xf32>
    %34 = arith.addf %24, %33 : vector<128x64xf32>
    %c0_27 = arith.constant 0 : index
    %35 = arith.index_cast %27 : i32 to index
    %c1_28 = arith.constant 1 : index
    %c0_29 = arith.constant 0 : index
    %36 = vector.load %arg2[%c0_27, %35, %c1_28, %c0_29] : memref<1x18x18x64xbf16, #tpu.memory_space<vmem>>, vector<1x8x16x64xbf16>
    %37 = vector.shape_cast %36 : vector<1x8x16x64xbf16> to vector<128x64xbf16>
    %c4 = arith.constant 4 : index
    %c0_30 = arith.constant 0 : index
    %c0_31 = arith.constant 0 : index
    %38 = vector.load %arg4[%c4, %c0_30, %c0_31] : memref<9x64x64xbf16, #tpu.memory_space<vmem>>, vector<1x64x64xbf16>
    %39 = vector.shape_cast %38 : vector<1x64x64xbf16> to vector<64x64xbf16>
    %cst_32 = arith.constant dense<0.000000e+00> : vector<128x64xf32>
    %40 = tpu.matmul %37, %39, %cst_32 {dimension_numbers = #tpu.dot_dimension_numbers<[1], [0], [0], [1], [0, 0, 1, 1], [], []>} : vector<128x64xbf16>, vector<64x64xbf16>, vector<128x64xf32> -> vector<128x64xf32>
    %41 = arith.addf %34, %40 : vector<128x64xf32>
    %c0_33 = arith.constant 0 : index
    %42 = arith.index_cast %27 : i32 to index
    %c2_34 = arith.constant 2 : index
    %c0_35 = arith.constant 0 : index
    %43 = vector.load %arg2[%c0_33, %42, %c2_34, %c0_35] : memref<1x18x18x64xbf16, #tpu.memory_space<vmem>>, vector<1x8x16x64xbf16>
    %44 = vector.shape_cast %43 : vector<1x8x16x64xbf16> to vector<128x64xbf16>
    %c5 = arith.constant 5 : index
    %c0_36 = arith.constant 0 : index
    %c0_37 = arith.constant 0 : index
    %45 = vector.load %arg4[%c5, %c0_36, %c0_37] : memref<9x64x64xbf16, #tpu.memory_space<vmem>>, vector<1x64x64xbf16>
    %46 = vector.shape_cast %45 : vector<1x64x64xbf16> to vector<64x64xbf16>
    %cst_38 = arith.constant dense<0.000000e+00> : vector<128x64xf32>
    %47 = tpu.matmul %44, %46, %cst_38 {dimension_numbers = #tpu.dot_dimension_numbers<[1], [0], [0], [1], [0, 0, 1, 1], [], []>} : vector<128x64xbf16>, vector<64x64xbf16>, vector<128x64xf32> -> vector<128x64xf32>
    %48 = arith.addf %41, %47 : vector<128x64xf32>
    %c8_i32_39 = arith.constant 8 : i32
    %49 = arith.muli %arg1, %c8_i32_39 : i32
    %c1_i32_40 = arith.constant 1 : i32
    %50 = arith.muli %49, %c1_i32_40 : i32
    %c2_i32 = arith.constant 2 : i32
    %51 = arith.addi %50, %c2_i32 : i32
    %c0_41 = arith.constant 0 : index
    %52 = arith.index_cast %51 : i32 to index
    %c0_42 = arith.constant 0 : index
    %c0_43 = arith.constant 0 : index
    %53 = vector.load %arg2[%c0_41, %52, %c0_42, %c0_43] : memref<1x18x18x64xbf16, #tpu.memory_space<vmem>>, vector<1x8x16x64xbf16>
    %54 = vector.shape_cast %53 : vector<1x8x16x64xbf16> to vector<128x64xbf16>
    %c6 = arith.constant 6 : index
    %c0_44 = arith.constant 0 : index
    %c0_45 = arith.constant 0 : index
    %55 = vector.load %arg4[%c6, %c0_44, %c0_45] : memref<9x64x64xbf16, #tpu.memory_space<vmem>>, vector<1x64x64xbf16>
    %56 = vector.shape_cast %55 : vector<1x64x64xbf16> to vector<64x64xbf16>
    %cst_46 = arith.constant dense<0.000000e+00> : vector<128x64xf32>
    %57 = tpu.matmul %54, %56, %cst_46 {dimension_numbers = #tpu.dot_dimension_numbers<[1], [0], [0], [1], [0, 0, 1, 1], [], []>} : vector<128x64xbf16>, vector<64x64xbf16>, vector<128x64xf32> -> vector<128x64xf32>
    %58 = arith.addf %48, %57 : vector<128x64xf32>
    %c0_47 = arith.constant 0 : index
    %59 = arith.index_cast %51 : i32 to index
    %c1_48 = arith.constant 1 : index
    %c0_49 = arith.constant 0 : index
    %60 = vector.load %arg2[%c0_47, %59, %c1_48, %c0_49] : memref<1x18x18x64xbf16, #tpu.memory_space<vmem>>, vector<1x8x16x64xbf16>
    %61 = vector.shape_cast %60 : vector<1x8x16x64xbf16> to vector<128x64xbf16>
    %c7 = arith.constant 7 : index
    %c0_50 = arith.constant 0 : index
    %c0_51 = arith.constant 0 : index
    %62 = vector.load %arg4[%c7, %c0_50, %c0_51] : memref<9x64x64xbf16, #tpu.memory_space<vmem>>, vector<1x64x64xbf16>
    %63 = vector.shape_cast %62 : vector<1x64x64xbf16> to vector<64x64xbf16>
    %cst_52 = arith.constant dense<0.000000e+00> : vector<128x64xf32>
    %64 = tpu.matmul %61, %63, %cst_52 {dimension_numbers = #tpu.dot_dimension_numbers<[1], [0], [0], [1], [0, 0, 1, 1], [], []>} : vector<128x64xbf16>, vector<64x64xbf16>, vector<128x64xf32> -> vector<128x64xf32>
    %65 = arith.addf %58, %64 : vector<128x64xf32>
    %c0_53 = arith.constant 0 : index
    %66 = arith.index_cast %51 : i32 to index
    %c2_54 = arith.constant 2 : index
    %c0_55 = arith.constant 0 : index
    %67 = vector.load %arg2[%c0_53, %66, %c2_54, %c0_55] : memref<1x18x18x64xbf16, #tpu.memory_space<vmem>>, vector<1x8x16x64xbf16>
    %68 = vector.shape_cast %67 : vector<1x8x16x64xbf16> to vector<128x64xbf16>
    %c8 = arith.constant 8 : index
    %c0_56 = arith.constant 0 : index
    %c0_57 = arith.constant 0 : index
    %69 = vector.load %arg4[%c8, %c0_56, %c0_57] : memref<9x64x64xbf16, #tpu.memory_space<vmem>>, vector<1x64x64xbf16>
    %70 = vector.shape_cast %69 : vector<1x64x64xbf16> to vector<64x64xbf16>
    %cst_58 = arith.constant dense<0.000000e+00> : vector<128x64xf32>
    %71 = tpu.matmul %68, %70, %cst_58 {dimension_numbers = #tpu.dot_dimension_numbers<[1], [0], [0], [1], [0, 0, 1, 1], [], []>} : vector<128x64xbf16>, vector<64x64xbf16>, vector<128x64xf32> -> vector<128x64xf32>
    %72 = arith.addf %65, %71 : vector<128x64xf32>
    %c0_59 = arith.constant 0 : index
    %c0_60 = arith.constant 0 : index
    %73 = vector.load %arg5[%c0_59, %c0_60] : memref<1x64xf32, #tpu.memory_space<vmem>>, vector<1x64xf32>
    %74 = vector.broadcast %73 : vector<1x64xf32> to vector<128x64xf32>
    %75 = arith.addf %72, %74 : vector<128x64xf32>
    %cst_61 = arith.constant 0.000000e+00 : f32
    %76 = vector.broadcast %cst_61 : f32 to vector<128x64xf32>
    %77 = arith.maximumf %75, %76 : vector<128x64xf32>
    %78 = arith.truncf %77 : vector<128x64xf32> to vector<128x64xbf16>
    %c0_62 = arith.constant 0 : index
    %c0_63 = arith.constant 0 : index
    %79 = vector.load %arg6[%c0_62, %c0_63] : memref<64x64xbf16, #tpu.memory_space<vmem>>, vector<64x64xbf16>
    %cst_64 = arith.constant dense<0.000000e+00> : vector<128x64xf32>
    %80 = tpu.matmul %78, %79, %cst_64 {dimension_numbers = #tpu.dot_dimension_numbers<[1], [0], [0], [1], [0, 0, 1, 1], [], []>} : vector<128x64xbf16>, vector<64x64xbf16>, vector<128x64xf32> -> vector<128x64xf32>
    %c0_65 = arith.constant 0 : index
    %c0_66 = arith.constant 0 : index
    %81 = vector.load %arg7[%c0_65, %c0_66] : memref<1x64xf32, #tpu.memory_space<vmem>>, vector<1x64xf32>
    %82 = vector.broadcast %81 : vector<1x64xf32> to vector<128x64xf32>
    %83 = arith.addf %80, %82 : vector<128x64xf32>
    %c0_67 = arith.constant 0 : index
    %c0_68 = arith.constant 0 : index
    %c0_69 = arith.constant 0 : index
    %c0_70 = arith.constant 0 : index
    %84 = vector.load %arg3[%c0_67, %c0_68, %c0_69, %c0_70] : memref<1x8x16x32xbf16, #tpu.memory_space<vmem>>, vector<1x8x16x32xbf16>
    %85 = vector.shape_cast %84 : vector<1x8x16x32xbf16> to vector<128x32xbf16>
    %c0_71 = arith.constant 0 : index
    %c0_72 = arith.constant 0 : index
    %86 = vector.load %arg8[%c0_71, %c0_72] : memref<32x64xbf16, #tpu.memory_space<vmem>>, vector<32x64xbf16>
    %cst_73 = arith.constant dense<0.000000e+00> : vector<128x64xf32>
    %87 = tpu.matmul %85, %86, %cst_73 {dimension_numbers = #tpu.dot_dimension_numbers<[1], [0], [0], [1], [0, 0, 1, 1], [], []>} : vector<128x32xbf16>, vector<32x64xbf16>, vector<128x64xf32> -> vector<128x64xf32>
    %c0_74 = arith.constant 0 : index
    %c0_75 = arith.constant 0 : index
    %88 = vector.load %arg9[%c0_74, %c0_75] : memref<1x64xf32, #tpu.memory_space<vmem>>, vector<1x64xf32>
    %89 = vector.broadcast %88 : vector<1x64xf32> to vector<128x64xf32>
    %90 = arith.addf %87, %89 : vector<128x64xf32>
    %91 = arith.addf %83, %90 : vector<128x64xf32>
    %cst_76 = arith.constant 0.000000e+00 : f32
    %92 = vector.broadcast %cst_76 : f32 to vector<128x64xf32>
    %93 = arith.maximumf %91, %92 : vector<128x64xf32>
    %94 = vector.shape_cast %93 : vector<128x64xf32> to vector<1x8x16x64xf32>
    %c0_77 = arith.constant 0 : index
    %c0_78 = arith.constant 0 : index
    %c0_79 = arith.constant 0 : index
    %c0_80 = arith.constant 0 : index
    %95 = vector.load %arg10[%c0_77, %c0_78, %c0_79, %c0_80] : memref<1x8x16x64xf32, #tpu.memory_space<vmem>>, vector<1x8x16x64xf32>
    tpu.vector_store %arg10[%c0_77, %c0_78, %c0_79, %c0_80], %94 {strides = array<i32>} : memref<1x8x16x64xf32, #tpu.memory_space<vmem>>, vector<1x8x16x64xf32>,
    return
  }
  func.func @transform_0(%arg0: i32, %arg1: i32) -> (i32, i32, i32, i32) {
    %c0_i32 = arith.constant 0 : i32
    %c0_i32_0 = arith.constant 0 : i32
    %c0_i32_1 = arith.constant 0 : i32
    %c0_i32_2 = arith.constant 0 : i32
    return %arg0, %c0_i32, %c0_i32_0, %c0_i32_1 : i32, i32, i32, i32
  }
  func.func @transform_1(%arg0: i32, %arg1: i32) -> (i32, i32, i32, i32) {
    %c0_i32 = arith.constant 0 : i32
    %c0_i32_0 = arith.constant 0 : i32
    %c0_i32_1 = arith.constant 0 : i32
    return %arg0, %arg1, %c0_i32, %c0_i32_0 : i32, i32, i32, i32
  }
  func.func @transform_2(%arg0: i32, %arg1: i32) -> (i32, i32, i32) {
    %c0_i32 = arith.constant 0 : i32
    %c0_i32_0 = arith.constant 0 : i32
    %c0_i32_1 = arith.constant 0 : i32
    %c0_i32_2 = arith.constant 0 : i32
    return %c0_i32, %c0_i32_0, %c0_i32_1 : i32, i32, i32
  }
  func.func @transform_3(%arg0: i32, %arg1: i32) -> (i32, i32) {
    %c0_i32 = arith.constant 0 : i32
    %c0_i32_0 = arith.constant 0 : i32
    %c0_i32_1 = arith.constant 0 : i32
    return %c0_i32, %c0_i32_0 : i32, i32
  }
  func.func @transform_4(%arg0: i32, %arg1: i32) -> (i32, i32) {
    %c0_i32 = arith.constant 0 : i32
    %c0_i32_0 = arith.constant 0 : i32
    %c0_i32_1 = arith.constant 0 : i32
    return %c0_i32, %c0_i32_0 : i32, i32
  }
  func.func @transform_5(%arg0: i32, %arg1: i32) -> (i32, i32) {
    %c0_i32 = arith.constant 0 : i32
    %c0_i32_0 = arith.constant 0 : i32
    %c0_i32_1 = arith.constant 0 : i32
    return %c0_i32, %c0_i32_0 : i32, i32
  }
  func.func @transform_6(%arg0: i32, %arg1: i32) -> (i32, i32) {
    %c0_i32 = arith.constant 0 : i32
    %c0_i32_0 = arith.constant 0 : i32
    %c0_i32_1 = arith.constant 0 : i32
    return %c0_i32, %c0_i32_0 : i32, i32
  }
  func.func @transform_7(%arg0: i32, %arg1: i32) -> (i32, i32) {
    %c0_i32 = arith.constant 0 : i32
    %c0_i32_0 = arith.constant 0 : i32
    %c0_i32_1 = arith.constant 0 : i32
    return %c0_i32, %c0_i32_0 : i32, i32
  }
  func.func @transform_8(%arg0: i32, %arg1: i32) -> (i32, i32, i32, i32) {
    %c0_i32 = arith.constant 0 : i32
    %c0_i32_0 = arith.constant 0 : i32
    %c0_i32_1 = arith.constant 0 : i32
    return %arg0, %arg1, %c0_i32, %c0_i32_0 : i32, i32, i32, i32
  }
}

</mosaic_0001>

<bundles_post_ra>
// kernel: a_call__.2
= control target key start
LH: loop header
LB: loop body
LE: loop exit
PB: predicated region body
PF: predicated region fallthrough
CT: control target
= control target key end

     0   :  { %s758_s12 = smov 0   ;;  %s925_s0 = inlined_call_operand.vmem [shape: bf16[512,32], index: 0, kind: input, shape index: {}]   ;;  %s926_s1 = inlined_call_operand.vmem [shape: bf16[32,64], index: 1, kind: input, shape index: {}]   ;;  %s927_s2 = inlined_call_operand.vmem [shape: f32[1,64], index: 2, kind: input, shape index: {}]   ;;  %s928_s3 = inlined_call_operand.vmem [shape: bf16[512,64], index: 3, kind: output, shape index: {}]  }
   0x1 LB: > { %s598_s13 = sadd.s32 4294967295, %s736_s12   ;;  %p602_p0 = scmp.ge.s32.totalorder %s736_s12, 1  ;;  %s736_s12 = sphi %s758_s12, %s13_s12  }
   0x2   : > { %p138_p1 = scmp.lt.s32.totalorder %s736_s12, 3 }
   0x4   : > { %p139_p2 = pnand %p602_p0, %p138_p1 }
   0x5   : > { %s603_s16 = sshll.u32 (!%p139_p2), %s598_s13, 5 }
   0x6   : > { %142 = sbr.rel (%p139_p2) target bundleno = 216 (0xd8), region = 32  ;;  %p163_p3 = scmp.lt.s32.totalorder (!%p139_p2), %s603_s16, 63 }
   0xb   : > { %v714_v0 = vld [vmem:[%s926_s1 + $0x8] sm:$0xff]  ;;  %v713_v1 = vld [vmem:[%s926_s1] sm:$0xff]  ;;  %s930_s16 = smov (!%p163_p3, %s603_s16), 63  ;;  %vm307_vm0 = vcmask 261120   ;;  %vm509_vm1 = vcmask 519168  }
   0xc   : > { %362 = vmatpush.bf16.msra.mxu0 %v714_v0  ;;  %715 = vmatpush.bf16.msra.mxu1 %v714_v0  ;;  %s604_s19 = sshll.u32 %s930_s16, 2  ;;  %v817_v18 = vld [vmem:[%s927_s2] ss:$0 sm:$0xff] }
   0xd   : > { %716 = vmatpush.bf16.msra.mxu2 %v714_v0  ;;  %717 = vmatpush.bf16.msra.mxu3 %v714_v0  ;;  %s780_s22 = scalar_lea.vmem %s925_s0, %s604_s19  ;;  %s826_s27 = scalar_lea.vmem %s928_s3, %s604_s19 }
   0xe   : > { %v697_v2 = vld [vmem:[%s780_s22] sm:$0xff]  ;;  %v698_v6 = vld [vmem:[%s780_s22 + $0x8] sm:$0xff]  ;;  %v699_v10 = vld [vmem:[%s780_s22 + $0x10] sm:$0xff] }
   0xf   : > { %v701_v3 = vld [vmem:[%s780_s22 + $0x20] sm:$0xff]  ;;  %v702_v7 = vld [vmem:[%s780_s22 + $0x28] sm:$0xff]  ;;  %v703_v11 = vld [vmem:[%s780_s22 + $0x30] sm:$0xff] }
  0x10   : > { %363 = vmatpush.bf16.msra.mxu0 %v713_v1  ;;  %718 = vmatpush.bf16.msra.mxu1 %v713_v1  ;;  %v705_v4 = vld [vmem:[%s780_s22 + $0x40] sm:$0xff]  ;;  %v706_v8 = vld [vmem:[%s780_s22 + $0x48] sm:$0xff]  ;;  %v707_v12 = vld [vmem:[%s780_s22 + $0x50] sm:$0xff] }
  0x11   : > { %719 = vmatpush.bf16.msra.mxu2 %v713_v1  ;;  %720 = vmatpush.bf16.msra.mxu3 %v713_v1  ;;  %v709_v5 = vld [vmem:[%s780_s22 + $0x60] sm:$0xff]  ;;  %v710_v9 = vld [vmem:[%s780_s22 + $0x68] sm:$0xff]  ;;  %v711_v13 = vld [vmem:[%s780_s22 + $0x70] sm:$0xff] }
  0x12   : > { %v700_v14 = vld [vmem:[%s780_s22 + $0x18] sm:$0xff] }
  0x13   : > { %679 = vmatmul.msk.bf16.vlgmr.msra.gmra.mxu0 %vm307_vm0, %v697_v2  ;;  %683 = vmatmul.msk.bf16.vlgmr.msra.gmra.mxu1 %vm307_vm0, %v701_v3  ;;  %v704_v15 = vld [vmem:[%s780_s22 + $0x38] sm:$0xff] }
  0x14   : > { %687 = vmatmul.msk.bf16.vlgmr.msra.gmra.mxu2 %vm307_vm0, %v705_v4  ;;  %691 = vmatmul.msk.bf16.vlgmr.msra.gmra.mxu3 %vm307_vm0, %v709_v5  ;;  %v708_v16 = vld [vmem:[%s780_s22 + $0x58] sm:$0xff] }
  0x15   : > { %v712_v17 = vld [vmem:[%s780_s22 + $0x78] sm:$0xff] }
  0x23   : > { %680 = vmatmul.msk.bf16.gmra.mxu0 %vm307_vm0, %v698_v6  ;;  %684 = vmatmul.msk.bf16.gmra.mxu1 %vm307_vm0, %v702_v7 }
  0x24   : > { %688 = vmatmul.msk.bf16.gmra.mxu2 %vm307_vm0, %v706_v8  ;;  %692 = vmatmul.msk.bf16.gmra.mxu3 %vm307_vm0, %v710_v9 }
  0x33   : > { %681 = vmatmul.msk.bf16.gmra.mxu0 %vm307_vm0, %v699_v10  ;;  %685 = vmatmul.msk.bf16.gmra.mxu1 %vm307_vm0, %v703_v11 }
  0x34   : > { %689 = vmatmul.msk.bf16.gmra.mxu2 %vm307_vm0, %v707_v12  ;;  %693 = vmatmul.msk.bf16.gmra.mxu3 %vm307_vm0, %v711_v13 }
  0x43   : > { %682 = vmatmul.msk.bf16.gmra.mxu0 %vm307_vm0, %v700_v14  ;;  %686 = vmatmul.msk.bf16.gmra.mxu1 %vm307_vm0, %v704_v15 }
  0x44   : > { %690 = vmatmul.msk.bf16.gmra.mxu2 %vm307_vm0, %v708_v16  ;;  %694 = vmatmul.msk.bf16.gmra.mxu3 %vm307_vm0, %v712_v17 }
  0x90   : > { %v365_v19 = vpop.f32.mrf.mxu0  ;;  %v385_v20 = vpop.f32.mrf.mxu1 }
  0x91   : > { %v366_v21 = vadd.f32 %v817_v18, %v365_v19  ;;  %v386_v22 = vadd.f32 %v817_v18, %v385_v20 }
  0x93   : > { %v445_v23 = vmax.f32 %v366_v21, 0.0  ;;  %v453_v24 = vmax.f32 %v386_v22, 0.0 }
  0x95   : > { %v477_v25 = vpack.c.bf16 %v445_v23, %v445_v23  ;;  %v485_v26 = vpack.c.bf16 %v453_v24, %v453_v24 }
  0x97   : > { %510 = vst.msk [vmem:[%s826_s27] sm:$0xf] %vm509_vm1, %v477_v25  ;;  %v405_v27 = vpop.f32.mrf.mxu2  ;;  %v425_v28 = vpop.f32.mrf.mxu3 }
  0x98   : > { %518 = vst.msk [vmem:[%s826_s27 + $0x20] sm:$0xf] %vm509_vm1, %v485_v26  ;;  %v406_v29 = vadd.f32 %v817_v18, %v405_v27  ;;  %v426_v30 = vadd.f32 %v817_v18, %v425_v28  ;;  %v367_v31 = vpop.f32.mrf.mxu0  ;;  %v387_v32 = vpop.f32.mrf.mxu1 }
  0x99   : > { %v368_v33 = vadd.f32 %v817_v18, %v367_v31  ;;  %v388_v34 = vadd.f32 %v817_v18, %v387_v32 }
  0x9a   : > { %v461_v35 = vmax.f32 %v406_v29, 0.0  ;;  %v469_v36 = vmax.f32 %v426_v30, 0.0 }
  0x9b   : > { %v446_v37 = vmax.f32 %v368_v33, 0.0  ;;  %v454_v38 = vmax.f32 %v388_v34, 0.0 }
  0x9c   : > { %v493_v39 = vpack.c.bf16 %v461_v35, %v461_v35  ;;  %v501_v40 = vpack.c.bf16 %v469_v36, %v469_v36 }
  0x9d   : > { %v478_v41 = vpack.c.bf16 %v446_v37, %v446_v37  ;;  %v486_v42 = vpack.c.bf16 %v454_v38, %v454_v38 }
  0x9e   : > { %526 = vst.msk [vmem:[%s826_s27 + $0x40] sm:$0xf] %vm509_vm1, %v493_v39 }
  0x9f   : > { %534 = vst.msk [vmem:[%s826_s27 + $0x60] sm:$0xf] %vm509_vm1, %v501_v40  ;;  %v407_v43 = vpop.f32.mrf.mxu2  ;;  %v427_v44 = vpop.f32.mrf.mxu3 }
  0xa0   : > { %511 = vst.msk [vmem:[%s826_s27 + $0x4] sm:$0xf] %vm509_vm1, %v478_v41  ;;  %v408_v45 = vadd.f32 %v817_v18, %v407_v43  ;;  %v428_v46 = vadd.f32 %v817_v18, %v427_v44  ;;  %v370_v47 = vpop.f32.mrf.mxu0  ;;  %v390_v48 = vpop.f32.mrf.mxu1 }
  0xa1   : > { %519 = vst.msk [vmem:[%s826_s27 + $0x24] sm:$0xf] %vm509_vm1, %v486_v42  ;;  %v371_v49 = vadd.f32 %v817_v18, %v370_v47  ;;  %v391_v50 = vadd.f32 %v817_v18, %v390_v48 }
  0xa2   : > { %v462_v51 = vmax.f32 %v408_v45, 0.0  ;;  %v470_v52 = vmax.f32 %v428_v46, 0.0 }
  0xa3   : > { %v447_v53 = vmax.f32 %v371_v49, 0.0  ;;  %v455_v54 = vmax.f32 %v391_v50, 0.0 }
  0xa4   : > { %v494_v55 = vpack.c.bf16 %v462_v51, %v462_v51  ;;  %v502_v56 = vpack.c.bf16 %v470_v52, %v470_v52 }
  0xa5   : > { %v479_v57 = vpack.c.bf16 %v447_v53, %v447_v53  ;;  %v487_v58 = vpack.c.bf16 %v455_v54, %v455_v54 }
  0xa6   : > { %527 = vst.msk [vmem:[%s826_s27 + $0x44] sm:$0xf] %vm509_vm1, %v494_v55 }
  0xa7   : > { %535 = vst.msk [vmem:[%s826_s27 + $0x64] sm:$0xf] %vm509_vm1, %v502_v56  ;;  %v410_v59 = vpop.f32.mrf.mxu2  ;;  %v430_v60 = vpop.f32.mrf.mxu3 }
  0xa8   : > { %512 = vst.msk [vmem:[%s826_s27 + $0x8] sm:$0xf] %vm509_vm1, %v479_v57  ;;  %v411_v61 = vadd.f32 %v817_v18, %v410_v59  ;;  %v431_v62 = vadd.f32 %v817_v18, %v430_v60  ;;  %v372_v63 = vpop.f32.mrf.mxu0  ;;  %v392_v0 = vpop.f32.mrf.mxu1 }
  0xa9   : > { %520 = vst.msk [vmem:[%s826_s27 + $0x28] sm:$0xf] %vm509_vm1, %v487_v58  ;;  %v373_v1 = vadd.f32 %v817_v18, %v372_v63  ;;  %v393_v2 = vadd.f32 %v817_v18, %v392_v0 }
  0xaa   : > { %v463_v3 = vmax.f32 %v411_v61, 0.0  ;;  %v471_v4 = vmax.f32 %v431_v62, 0.0 }
  0xab   : > { %v448_v5 = vmax.f32 %v373_v1, 0.0  ;;  %v456_v6 = vmax.f32 %v393_v2, 0.0 }
  0xac   : > { %v495_v7 = vpack.c.bf16 %v463_v3, %v463_v3  ;;  %v503_v8 = vpack.c.bf16 %v471_v4, %v471_v4 }
  0xad   : > { %v480_v9 = vpack.c.bf16 %v448_v5, %v448_v5  ;;  %v488_v10 = vpack.c.bf16 %v456_v6, %v456_v6 }
  0xae   : > { %528 = vst.msk [vmem:[%s826_s27 + $0x48] sm:$0xf] %vm509_vm1, %v495_v7 }
  0xaf   : > { %536 = vst.msk [vmem:[%s826_s27 + $0x68] sm:$0xf] %vm509_vm1, %v503_v8  ;;  %v412_v11 = vpop.f32.mrf.mxu2  ;;  %v432_v12 = vpop.f32.mrf.mxu3 }
  0xb0   : > { %513 = vst.msk [vmem:[%s826_s27 + $0xc] sm:$0xf] %vm509_vm1, %v480_v9  ;;  %v413_v13 = vadd.f32 %v817_v18, %v412_v11  ;;  %v433_v14 = vadd.f32 %v817_v18, %v432_v12  ;;  %v375_v15 = vpop.f32.mrf.mxu0  ;;  %v395_v16 = vpop.f32.mrf.mxu1 }
  0xb1   : > { %521 = vst.msk [vmem:[%s826_s27 + $0x2c] sm:$0xf] %vm509_vm1, %v488_v10  ;;  %v376_v17 = vadd.f32 %v817_v18, %v375_v15  ;;  %v396_v19 = vadd.f32 %v817_v18, %v395_v16 }
  0xb2   : > { %v464_v20 = vmax.f32 %v413_v13, 0.0  ;;  %v472_v21 = vmax.f32 %v433_v14, 0.0 }
  0xb3   : > { %v449_v22 = vmax.f32 %v376_v17, 0.0  ;;  %v457_v23 = vmax.f32 %v396_v19, 0.0 }
  0xb4   : > { %v496_v24 = vpack.c.bf16 %v464_v20, %v464_v20  ;;  %v504_v25 = vpack.c.bf16 %v472_v21, %v472_v21 }
  0xb5   : > { %v481_v26 = vpack.c.bf16 %v449_v22, %v449_v22  ;;  %v489_v27 = vpack.c.bf16 %v457_v23, %v457_v23 }
  0xb6   : > { %529 = vst.msk [vmem:[%s826_s27 + $0x4c] sm:$0xf] %vm509_vm1, %v496_v24 }
  0xb7   : > { %537 = vst.msk [vmem:[%s826_s27 + $0x6c] sm:$0xf] %vm509_vm1, %v504_v25  ;;  %v415_v28 = vpop.f32.mrf.mxu2  ;;  %v435_v29 = vpop.f32.mrf.mxu3 }
  0xb8   : > { %514 = vst.msk [vmem:[%s826_s27 + $0x10] sm:$0xf] %vm509_vm1, %v481_v26  ;;  %v416_v30 = vadd.f32 %v817_v18, %v415_v28  ;;  %v436_v31 = vadd.f32 %v817_v18, %v435_v29  ;;  %v377_v32 = vpop.f32.mrf.mxu0  ;;  %v397_v33 = vpop.f32.mrf.mxu1 }
  0xb9   : > { %522 = vst.msk [vmem:[%s826_s27 + $0x30] sm:$0xf] %vm509_vm1, %v489_v27  ;;  %v378_v34 = vadd.f32 %v817_v18, %v377_v32  ;;  %v398_v35 = vadd.f32 %v817_v18, %v397_v33 }
  0xba   : > { %v465_v36 = vmax.f32 %v416_v30, 0.0  ;;  %v473_v37 = vmax.f32 %v436_v31, 0.0 }
  0xbb   : > { %v450_v38 = vmax.f32 %v378_v34, 0.0  ;;  %v458_v39 = vmax.f32 %v398_v35, 0.0 }
  0xbc   : > { %v497_v40 = vpack.c.bf16 %v465_v36, %v465_v36  ;;  %v505_v41 = vpack.c.bf16 %v473_v37, %v473_v37 }
  0xbd   : > { %v482_v42 = vpack.c.bf16 %v450_v38, %v450_v38  ;;  %v490_v43 = vpack.c.bf16 %v458_v39, %v458_v39 }
  0xbe   : > { %530 = vst.msk [vmem:[%s826_s27 + $0x50] sm:$0xf] %vm509_vm1, %v497_v40 }
  0xbf   : > { %538 = vst.msk [vmem:[%s826_s27 + $0x70] sm:$0xf] %vm509_vm1, %v505_v41  ;;  %v417_v44 = vpop.f32.mrf.mxu2  ;;  %v437_v45 = vpop.f32.mrf.mxu3 }
  0xc0   : > { %515 = vst.msk [vmem:[%s826_s27 + $0x14] sm:$0xf] %vm509_vm1, %v482_v42  ;;  %v418_v46 = vadd.f32 %v817_v18, %v417_v44  ;;  %v438_v47 = vadd.f32 %v817_v18, %v437_v45  ;;  %v380_v48 = vpop.f32.mrf.mxu0  ;;  %v400_v49 = vpop.f32.mrf.mxu1 }
  0xc1   : > { %523 = vst.msk [vmem:[%s826_s27 + $0x34] sm:$0xf] %vm509_vm1, %v490_v43  ;;  %v381_v50 = vadd.f32 %v817_v18, %v380_v48  ;;  %v401_v51 = vadd.f32 %v817_v18, %v400_v49 }
  0xc2   : > { %v466_v52 = vmax.f32 %v418_v46, 0.0  ;;  %v474_v53 = vmax.f32 %v438_v47, 0.0 }
  0xc3   : > { %v451_v54 = vmax.f32 %v381_v50, 0.0  ;;  %v459_v55 = vmax.f32 %v401_v51, 0.0 }
  0xc4   : > { %v498_v56 = vpack.c.bf16 %v466_v52, %v466_v52  ;;  %v506_v57 = vpack.c.bf16 %v474_v53, %v474_v53 }
  0xc5   : > { %v483_v58 = vpack.c.bf16 %v451_v54, %v451_v54  ;;  %v491_v59 = vpack.c.bf16 %v459_v55, %v459_v55 }
  0xc6   : > { %531 = vst.msk [vmem:[%s826_s27 + $0x54] sm:$0xf] %vm509_vm1, %v498_v56 }
  0xc7   : > { %539 = vst.msk [vmem:[%s826_s27 + $0x74] sm:$0xf] %vm509_vm1, %v506_v57  ;;  %v420_v60 = vpop.f32.mrf.mxu2  ;;  %v440_v61 = vpop.f32.mrf.mxu3 }
  0xc8   : > { %516 = vst.msk [vmem:[%s826_s27 + $0x18] sm:$0xf] %vm509_vm1, %v483_v58  ;;  %v421_v62 = vadd.f32 %v817_v18, %v420_v60  ;;  %v441_v63 = vadd.f32 %v817_v18, %v440_v61  ;;  %v382_v0 = vpop.f32.mrf.mxu0  ;;  %v402_v1 = vpop.f32.mrf.mxu1 }
  0xc9   : > { %524 = vst.msk [vmem:[%s826_s27 + $0x38] sm:$0xf] %vm509_vm1, %v491_v59  ;;  %v383_v2 = vadd.f32 %v817_v18, %v382_v0  ;;  %v403_v3 = vadd.f32 %v817_v18, %v402_v1 }
  0xca   : > { %v467_v4 = vmax.f32 %v421_v62, 0.0  ;;  %v475_v5 = vmax.f32 %v441_v63, 0.0 }
  0xcb   : > { %v452_v6 = vmax.f32 %v383_v2, 0.0  ;;  %v460_v7 = vmax.f32 %v403_v3, 0.0 }
  0xcc   : > { %v499_v8 = vpack.c.bf16 %v467_v4, %v467_v4  ;;  %v507_v9 = vpack.c.bf16 %v475_v5, %v475_v5 }
  0xcd   : > { %v484_v10 = vpack.c.bf16 %v452_v6, %v452_v6  ;;  %v492_v11 = vpack.c.bf16 %v460_v7, %v460_v7 }
  0xce   : > { %532 = vst.msk [vmem:[%s826_s27 + $0x58] sm:$0xf] %vm509_vm1, %v499_v8 }
  0xcf   : > { %540 = vst.msk [vmem:[%s826_s27 + $0x78] sm:$0xf] %vm509_vm1, %v507_v9  ;;  %v422_v12 = vpop.f32.mrf.mxu2  ;;  %v442_v13 = vpop.f32.mrf.mxu3 }
  0xd0   : > { %517 = vst.msk [vmem:[%s826_s27 + $0x1c] sm:$0xf] %vm509_vm1, %v484_v10  ;;  %v423_v14 = vadd.f32 %v817_v18, %v422_v12  ;;  %v443_v15 = vadd.f32 %v817_v18, %v442_v13 }
  0xd1   : > { %525 = vst.msk [vmem:[%s826_s27 + $0x3c] sm:$0xf] %vm509_vm1, %v492_v11 }
  0xd2   : > { %v468_v16 = vmax.f32 %v423_v14, 0.0  ;;  %v476_v17 = vmax.f32 %v443_v15, 0.0 }
  0xd4   : > { %v500_v19 = vpack.c.bf16 %v468_v16, %v468_v16  ;;  %v508_v20 = vpack.c.bf16 %v476_v17, %v476_v17 }
  0xd6   : > { %533 = vst.msk [vmem:[%s826_s27 + $0x5c] sm:$0xf] %vm509_vm1, %v500_v19 }
  0xd7   : > { %541 = vst.msk [vmem:[%s826_s27 + $0x7c] sm:$0xf] %vm509_vm1, %v508_v20 }
  0xd8 PF: > { %s13_s12 = sadd.s32 1, %s736_s12  }
  0xd9   : > { %p10_p4 = scmp.ge.s32.totalorder %s13_s12, 4  }
  0xdb   :  { %12 = sbr.rel (!%p10_p4) target bundleno = 1 (0x1), region = 62 }

// kernel: a_call__.3
= control target key start
LH: loop header
LB: loop body
LE: loop exit
PB: predicated region body
PF: predicated region fallthrough
CT: control target
= control target key end

     0   :  { %13 = vsyncpa [#allocation3], 0  ;;  %s5003_s0 = inlined_call_operand.vmem [shape: bf16[2,18,18,64], index: 0, kind: input, shape index: {}]   ;;  %s5004_s1 = inlined_call_operand.vmem [shape: bf16[2,16,16,32], index: 1, kind: input, shape index: {}]   ;;  %s5005_s2 = inlined_call_operand.vmem [shape: bf16[9,64,64], index: 2, kind: input, shape index: {}]   ;;  %s5006_s3 = inlined_call_operand.vmem [shape: f32[1,64], index: 3, kind: input, shape index: {}]   ;;  %s5007_s4 = inlined_call_operand.vmem [shape: bf16[64,64], index: 4, kind: input, shape index: {}]   ;;  %s5008_s5 = inlined_call_operand.vmem [shape: f32[1,64], index: 5, kind: input, shape index: {}]   ;;  %s5009_s6 = inlined_call_operand.vmem [shape: bf16[32,64], index: 6, kind: input, shape index: {}]   ;;  %s5010_s7 = inlined_call_operand.vmem [shape: f32[1,64], index: 7, kind: input, shape index: {}]   ;;  %s5011_s8 = inlined_call_operand.hbm [shape: f32[2,16,16,64], index: 8, kind: output, shape index: {}]  }
   0x1   :  { %15 = vsyncpa [#allocation3 + $0x1], 0  ;;  %s4021_s27 = smov 0   ;;  %s4023_s28 = smov 0  }
   0x2   :  { %s4025_s29 = smov 0   ;;  %s4027_s30 = smov 0  }
   0x3   :  { %s4029_s9 = smov 0   ;;  %s4031_s10 = smov 0  }
   0x4   :  { %s4033_s11 = smov 0   ;;  %s4035_s12 = smov 0  }
   0x5 LB: > { %5016 = sst [smem:[#allocation5_spill]] %s3964_s10  ;;  %s3120_s13 = sadd.s32 4294967295, %s3972_s12   ;;  %s3972_s12 = sphi %s4035_s12, %s21_s12   ;;  %s3968_s11 = sphi %s4033_s11, %s5030_s11   ;;  %s3964_s10 = sphi %s4031_s10, %s5029_s10   ;;  %s3960_s9 = sphi %s4029_s9, %s5028_s9   ;;  %s3956_s30 = sphi %s4027_s30, %s5027_s30   ;;  %s3952_s29 = sphi %s4025_s29, %s5033_s29   ;;  %s3948_s28 = sphi %s4023_s28, %s5032_s28   ;;  %s3944_s27 = sphi %s4021_s27, %s5031_s27  }
   0x6   : > { %5017 = sst [smem:[#allocation6_spill]] %s3968_s11  ;;  %s3121_s14 = sadd.s32 4294967294, %s3972_s12  }
   0x7   : > { %s30_s15 = sadd.s32 1, %s3964_s10  ;;  %s33_s16 = sadd.s32 1, %s3968_s11 }
   0x8   : > { %p31_p0 = scmp.ge.s32.totalorder %s30_s15, 2  ;;  %p232_p1 = scmp.ne.s32.totalorder %s3952_s29, %s3948_s28 }
   0x9   : > { %p233_p2 = scmp.eq.s32.totalorder %s3120_s13, 3  ;;  %p238_p5 = scmp.ne.s32.totalorder %s3948_s28, %s3944_s27 }
   0xa   : > { %s5035_s15 = smov (%p31_p0, %s30_s15), 0  ;;  %s5037_s16 = smov (!%p31_p0, %s33_s16), %s3968_s11 }
   0xb   : > { %5018 = sst [smem:[#allocation7_spill]] %s5035_s15  ;;  %s218_s17 = ssub.s32 %s3964_s10, %s5035_s15 }
   0xc   : > { %p4072_p3 = por %p233_p2, %p232_p1  ;;  %p35_p4 = scmp.ge.s32.totalorder %s5037_s16, 2 }
   0xd   : > { %p239_p6 = scmp.eq.s32.totalorder %s3121_s14, 3  ;;  %p3124_p7 = scmp.ge.s32.totalorder %s3972_s12, 1 }
   0xe   : > { %s5039_s16 = smov (%p35_p4, %s5037_s16), 0  ;;  %p297_p9 = scmp.lt.s32.totalorder %s3972_s12, 5 }
   0xf   : > { %5020 = sst [smem:[#allocation8_spill]] %s5039_s16  ;;  %p4081_p8 = por %p239_p6, %p238_p5 }
  0x10   : > { %s217_s20 = ssub.s32 %s3968_s11, %s5039_s16  ;;  %s222_s21 = sadd.s32 1, %s3952_s29 }
  0x11   : > { %s219_s22 = sor.u32 %s218_s17, %s217_s20  ;;  %p298_p10 = pnand %p3124_p7, %p297_p9 }
  0x12   : > { %p220_p11 = scmp.eq.s32.totalorder %s219_s22, 0  ;;  %p341_p12 = scmp.lt.s32.totalorder (!%p298_p10), %s3960_s9, 1 }
  0x13   : > { %301 = sbr.rel (%p298_p10) target bundleno = 681 (0x2a9), region = 52  ;;  %s3127_s16 = sshll.u32 (!%p298_p10), %s3956_s30, 3 }
  0x14   : > { %s4090_s23 = scalar_select %p220_p11, %s3952_s29, %s222_s21  }
  0x15   : > { %s3713_s26 = smul.u32 (!%p298_p10), 96, %s3956_s30  ;;  %p4763_p13 = scmp.lt.s32.totalorder (!%p298_p10), %s3127_s16, 15 }
  0x18   : > { %v4095_v0 = vld [vmem:[%s5005_s2 + $0x58] sm:$0xff]  ;;  %v4110_v3 = vld [vmem:[%s5005_s2 + $0x50] sm:$0xff]  ;;  %s4116_s24 = scalar_select %p341_p12, %s3960_s9, 1  ;;  %vm882_vm0 = vcmask 1042432   ;;  %vm883_vm1 = vcmask 1046532   ;;  %v4130_v6 = vld [vmem:[%s5005_s2 + $0x48] sm:$0xff] }
  0x19   : > { %v3729_v1 = vld [vmem:[%s5005_s2 + $0x38] sm:$0xff]  ;;  %1026 = vmatpush.bf16.msra.mxu2 %v4095_v0  ;;  %v3728_v4 = vld [vmem:[%s5005_s2 + $0x30] sm:$0xff]  ;;  %v3727_v7 = vld [vmem:[%s5005_s2 + $0x28] sm:$0xff]  ;;  %vm395_vm3 = vsmask.f32 3328  ;;  %vm647_vm5 = vcmask 523264  }
  0x1a   : > { %v4103_v2 = vld [vmem:[%s5005_s2 + $0x18] sm:$0xff]  ;;  %676 = vmatpush.bf16.msra.mxu0 %v3729_v1  ;;  %3789 = vmatpush.bf16.msra.mxu3 %v3729_v1  ;;  %v4122_v5 = vld [vmem:[%s5005_s2 + $0x10] sm:$0xff]  ;;  %s3801_s13 = smul.u32 216, %s4116_s24  ;;  %v4142_v8 = vld [vmem:[%s5005_s2 + $0x8] sm:$0xff]  ;;  %vm396_vm4 = vsmask.f32 7440 }
  0x1b   : > { %813 = vmatpush.bf16.msra.mxu1 %v4103_v2  ;;  %vm4146_vm2 = vmor %vm882_vm0, %vm883_vm1  ;;  %v4153_v10 = vld [vmem:[%s5005_s2 + $0x40] sm:$0xff]  ;;  %v3749_v35 = vld [vmem:[%s5005_s2 + $0x98] sm:$0xff]  ;;  %s5041_s16 = smov (!%p4763_p13, %s3127_s16), 15  ;;  %s3129_s15 = sshll.u32 %s4116_s24, 5  ;;  %vm2872_vm7 = vcmask 261120  }
  0x1c   : > { %s345_s25 = scalar_lea.vmem %s5003_s0, %s3801_s13  ;;  %v3726_v14 = vld [vmem:[%s5005_s2 + $0x20] sm:$0xff]  ;;  %vm4189_vm6 = vmor %vm395_vm3, %vm396_vm4  ;;  %s3128_s11 = sshll.u32 %s5041_s16, 1 }
  0x1d   : > { %1027 = vmatpush.bf16.msra.mxu2 %v4110_v3  ;;  %s4144_s10 = scalar_lea.vmem %s345_s25, %s3713_s26  ;;  %v4170_v27 = vld [vmem:[%s5005_s2] sm:$0xff]  ;;  %s353_s26 = sadd.s32 %s3129_s15, %s3128_s11 }
  0x1e   : > { %677 = vmatpush.bf16.msra.mxu0 %v3728_v4  ;;  %3790 = vmatpush.bf16.msra.mxu3 %v3728_v4  ;;  %v364_v11 = vld [vmem:[%s4144_s10 + $0x4] sm:$0xf]  ;;  %v387_v12 = vld [vmem:[%s4144_s10 + $0x8] sm:$0x1]  ;;  %v858_v13 = vld [vmem:[%s4144_s10] sm:$0xe] }
  0x1f   : > { %814 = vmatpush.bf16.msra.mxu1 %v4122_v5  ;;  %v3222_v15 = vrot.slane %v858_v13, 9  ;;  %v887_v16 = vrot.slane %v364_v11, 5  ;;  %v890_v17 = vrot.slane %v387_v12, 5  ;;  %v363_v18 = vld [vmem:[%s4144_s10] sm:$0xf]  ;;  %v408_v19 = vshll.u32 %v364_v11, 16 }
  0x20   : > { %v399_v20 = vshrl.u32 %v363_v18, 16  ;;  %v402_v21 = vshll.u32 %v363_v18, 16  ;;  %v412_v22 = vshrl.u32 %v364_v11, 16  ;;  %v418_v23 = vshll.u32 %v387_v12, 16  ;;  %v375_v24 = vld [vmem:[%s4144_s10 + $0x48] sm:$0xf] }
  0x21   : > { %1028 = vmatpush.bf16.msra.mxu2 %v4130_v6  ;;  %v888_v25 = vsel %vm4146_vm2, %v3222_v15, %v887_v16  ;;  %v889_v26 = vrot.slane %v887_v16, 4  ;;  %v410_v28 = vrot.slane %v408_v19, 5  ;;  %v4173_v29 = vld [vmem:[%s4144_s10 + $0x4c] sm:$0xf]  ;;  %v4176_v34 = vld [vmem:[%s4144_s10 + $0x50] sm:$0x1] }
  0x22   : > { %678 = vmatpush.bf16.msra.mxu0 %v3727_v7  ;;  %3791 = vmatpush.bf16.msra.mxu3 %v3727_v7  ;;  %v950_v30 = vunpack.c.l.b16 %v888_v25  ;;  %v401_v31 = vrot.slane %v399_v20, 4  ;;  %v404_v32 = vrot.slane %v402_v21, 5  ;;  %v414_v33 = vrot.slane %v412_v22, 4  ;;  %v3714_v44 = vld [vmem:[%s4144_s10] sm:$0xff]  ;;  %v859_v50 = vld [vmem:[%s4144_s10 + $0xc] sm:$0xe] }
  0x23   : > { %815 = vmatpush.bf16.msra.mxu1 %v4142_v8  ;;  %v891_v36 = vsel %vm4146_vm2, %v889_v26, %v890_v17  ;;  %v420_v37 = vrot.slane %v418_v23, 5  ;;  %v543_v38 = vshrl.u32 %v375_v24, 16  ;;  %v546_v39 = vshll.u32 %v375_v24, 16  ;;  %v366_v55 = vld [vmem:[%s4144_s10 + $0x10] sm:$0xf]  ;;  %s338_s11 = sand.u32 1, %s3948_s28  }
  0x24   : > { %v951_v40 = vunpack.c.l.b16 %v891_v36  ;;  %v405_v41 = vor.u32 %v404_v32, %v401_v31  ;;  %v415_v42 = vor.u32 %v414_v33, %v410_v28  ;;  %v552_v43 = vshll.u32 %v4173_v29, 16  ;;  %v388_v58 = vld [vmem:[%s4144_s10 + $0x14] sm:$0x1]  ;;  %v365_v59 = vld [vmem:[%s4144_s10 + $0xc] sm:$0xf]  ;;  %s3125_s15 = sshll.u32 %s338_s11, 7 }
  0x25   : > { %1029 = vmatpush.bf16.msra.mxu2 %v4153_v10  ;;  %v545_v46 = vrot.slane %v543_v38, 4  ;;  %v548_v47 = vrot.slane %v546_v39, 5  ;;  %v556_v48 = vshrl.u32 %v4173_v29, 16  ;;  %v562_v49 = vshll.u32 %v4176_v34, 16  ;;  %v377_v22 = vld [vmem:[%s4144_s10 + $0x54] sm:$0xf] }
  0x26   : > { %679 = vmatpush.bf16.msra.mxu0 %v3726_v14  ;;  %3792 = vmatpush.bf16.msra.mxu3 %v3726_v14  ;;  %v966_v51 = vpack.c.b16 %v951_v40, %v950_v30  ;;  %v406_v52 = vrot.slane %v405_v41, 4  ;;  %v416_v53 = vrot.slane %v415_v42, 4  ;;  %v554_v54 = vrot.slane %v552_v43, 5  ;;  %v4218_v32 = vld [vmem:[%s4144_s10 + $0x58] sm:$0xf]  ;;  %s3709_s24 = sshll.u32 %s3960_s9, 5 }
  0x27   : > { %816 = vmatpush.bf16.msra.mxu1 %v4170_v27  ;;  %v549_v56 = vor.u32 %v548_v47, %v545_v46  ;;  %v558_v57 = vrot.slane %v556_v48, 4  ;;  %v564_v62 = vrot.slane %v562_v49, 5  ;;  %v3223_v63 = vrot.slane %v859_v50, 9  ;;  %v368_v47 = vld [vmem:[%s4144_s10 + $0x1c] sm:$0xf]  ;;  %s2995_s25 = scalar_lea.sflag [#allocation3], %s338_s11 }
  0x28   : > { %3254 = vmatmul.msk.bf16.vlgmr.msra.gmra.mxu2 %vm647_vm5, %v966_v51  ;;  %v411_v60 = vsel %vm4189_vm6, %v406_v52, %v410_v28  ;;  %v421_v61 = vsel %vm4189_vm6, %v416_v53, %v420_v37  ;;  %v894_v11 = vrot.slane %v366_v55, 5  ;;  %v897_v12 = vrot.slane %v388_v58, 5  ;;  %v4222_v37 = vld [vmem:[%s4144_s10 + $0x5c] sm:$0x1]  ;;  %v3748_v51 = vld [vmem:[%s5005_s2 + $0x90] sm:$0xff] }
  0x29   : > { %v599_v1 = vunpack.c.l.b16 %v411_v60  ;;  %v550_v4 = vrot.slane %v549_v56, 4  ;;  %v559_v7 = vor.u32 %v558_v57, %v554_v54  ;;  %v423_v13 = vshrl.u32 %v365_v59, 16 }
  0x2a   : > { %3793 = vmatpush.bf16.msrb.mxu3 %v4103_v2  ;;  %1570 = vmatpush.bf16.msrb.mxu0 %v3749_v35  ;;  %v600_v2 = vunpack.c.l.b16 %v421_v61  ;;  %v426_v17 = vshll.u32 %v365_v59, 16  ;;  %v895_v19 = vsel %vm4146_vm2, %v3223_v63, %v894_v11  ;;  %v896_v20 = vrot.slane %v894_v11, 4  ;;  %v3715_v59 = vld [vmem:[%s4144_s10 + $0xc] sm:$0xff]  ;;  %v367_v61 = vld [vmem:[%s4144_s10 + $0x18] sm:$0xf] }
  0x2b   : > { %3214 = vmatmul.msk.bf16.vlgmr.msra.gmra.mxu1 %vm647_vm5, %v3714_v44  ;;  %v555_v15 = vsel %vm4189_vm6, %v550_v4, %v554_v54  ;;  %v560_v16 = vrot.slane %v559_v7, 4  ;;  %v425_v21 = vrot.slane %v423_v13, 4  ;;  %v952_v23 = vunpack.c.l.b16 %v895_v19  ;;  %v389_v7 = vld [vmem:[%s4144_s10 + $0x20] sm:$0x1] }
  0x2c   : > { %v615_v14 = vpack.c.b16 %v600_v2, %v599_v1  ;;  %v611_v18 = vunpack.c.l.b16 %v555_v15  ;;  %v428_v24 = vrot.slane %v426_v17, 5  ;;  %v432_v25 = vshll.u32 %v366_v55, 16 }
  0x2d   : > { %v898_v28 = vsel %vm4146_vm2, %v896_v20, %v897_v12  ;;  %v436_v30 = vshrl.u32 %v366_v55, 16  ;;  %v442_v31 = vshll.u32 %v388_v58, 16  ;;  %v567_v38 = vshrl.u32 %v377_v22, 16  ;;  %v860_v55 = vld [vmem:[%s4144_s10 + $0x18] sm:$0xe] }
  0x2e   : > { %3794 = vmatpush.bf16.msrb.mxu3 %v4122_v5  ;;  %3158 = vmatmul.msk.bf16.vlgmr.msra.gmra.mxu0 %vm647_vm5, %v615_v14  ;;  %v565_v5 = vsel %vm4189_vm6, %v560_v16, %v564_v62  ;;  %v953_v33 = vunpack.c.l.b16 %v898_v28  ;;  %v429_v35 = vor.u32 %v428_v24, %v425_v21  ;;  %v434_v36 = vrot.slane %v432_v25, 5 }
  0x2f   : > { %v612_v26 = vunpack.c.l.b16 %v565_v5  ;;  %v438_v40 = vrot.slane %v436_v30, 4  ;;  %v570_v41 = vshll.u32 %v377_v22, 16  ;;  %v444_v43 = vrot.slane %v442_v31, 5  ;;  %1571 = vmatpush.bf16.msrb.mxu0 %v3748_v51  ;;  %v3716_v51 = vld [vmem:[%s4144_s10 + $0x18] sm:$0xff] }
  0x30   : > { %v430_v42 = vrot.slane %v429_v35, 4  ;;  %v569_v44 = vrot.slane %v567_v38, 4  ;;  %v576_v46 = vshll.u32 %v4218_v32, 16  ;;  %v580_v49 = vshrl.u32 %v4218_v32, 16  ;;  %v369_v38 = vld [vmem:[%s4144_s10 + $0x24] sm:$0xf] }
  0x31   : > { %v621_v39 = vpack.c.b16 %v612_v26, %v611_v18  ;;  %v572_v48 = vrot.slane %v570_v41, 5  ;;  %v586_v50 = vshll.u32 %v4222_v37, 16  ;;  %v967_v52 = vpack.c.b16 %v953_v33, %v952_v23 }
  0x32   : > { %3795 = vmatpush.bf16.msrb.mxu3 %v4142_v8  ;;  %v439_v8 = vor.u32 %v438_v40, %v434_v36  ;;  %v435_v53 = vsel %vm4189_vm6, %v430_v42, %v434_v36  ;;  %v578_v54 = vrot.slane %v576_v46, 5  ;;  %v582_v58 = vrot.slane %v580_v49, 4 }
  0x33   : > { %3164 = vmatmul.msk.bf16.vlgmr.msra.gmra.mxu3 %vm647_vm5, %v621_v39  ;;  %v573_v57 = vor.u32 %v572_v48, %v569_v44  ;;  %v901_v60 = vrot.slane %v368_v47, 5  ;;  %v601_v62 = vunpack.c.l.b16 %v435_v53  ;;  %v588_v4 = vrot.slane %v586_v50, 5  ;;  %v370_v39 = vld [vmem:[%s4144_s10 + $0x28] sm:$0xf] }
  0x34   : > { %v440_v56 = vrot.slane %v439_v8, 4  ;;  %v583_v2 = vor.u32 %v582_v58, %v578_v54  ;;  %v447_v12 = vshrl.u32 %v367_v61, 16  ;;  %v450_v13 = vshll.u32 %v367_v61, 16  ;;  %v3747_v48 = vld [vmem:[%s5005_s2 + $0x88] sm:$0xff] }
  0x35   : > { %v574_v1 = vrot.slane %v573_v57, 4  ;;  %v456_v16 = vshll.u32 %v368_v47, 16  ;;  %v904_v18 = vrot.slane %v389_v7, 5  ;;  %v460_v23 = vshrl.u32 %v368_v47, 16  ;;  %1572 = vmatpush.bf16.msrb.mxu0 %v3747_v48 }
  0x36   : > { %3796 = vmatpush.bf16.msrb.mxu3 %v4170_v27  ;;  %v445_v63 = vsel %vm4189_vm6, %v440_v56, %v444_v43  ;;  %v3224_v27 = vrot.slane %v860_v55, 9  ;;  %v584_v15 = vrot.slane %v583_v2, 4  ;;  %v449_v19 = vrot.slane %v447_v12, 4  ;;  %v861_v55 = vld [vmem:[%s4144_s10 + $0x24] sm:$0xe] }
  0x37   : > { %v602_v11 = vunpack.c.l.b16 %v445_v63  ;;  %v579_v14 = vsel %vm4189_vm6, %v574_v1, %v578_v54  ;;  %v452_v20 = vrot.slane %v450_v13, 5  ;;  %v458_v5 = vrot.slane %v456_v16, 5  ;;  %v390_v54 = vld [vmem:[%s4144_s10 + $0x2c] sm:$0x1] }
  0x38   : > { %3255 = vmatmul.msk.bf16.gmra.mxu2 %vm647_vm5, %v967_v52  ;;  %v589_v21 = vsel %vm4189_vm6, %v584_v15, %v588_v4  ;;  %v613_v22 = vunpack.c.l.b16 %v579_v14  ;;  %v466_v26 = vshll.u32 %v389_v7, 16  ;;  %v462_v28 = vrot.slane %v460_v23, 4  ;;  %v371_v14 = vld [vmem:[%s4144_s10 + $0x30] sm:$0xf] }
  0x39   : > { %v616_v17 = vpack.c.b16 %v602_v11, %v601_v62  ;;  %v614_v24 = vunpack.c.l.b16 %v589_v21  ;;  %v453_v25 = vor.u32 %v452_v20, %v449_v19  ;;  %v902_v30 = vsel %vm4146_vm2, %v3224_v27, %v901_v60  ;;  %v864_v11 = vld [vmem:[%s4144_s10 + $0x48] sm:$0xe] }
  0x3a   : > { %3797 = vmatpush.bf16.msra.mxu3 %v4095_v0  ;;  %v903_v0 = vrot.slane %v901_v60, 4  ;;  %v463_v35 = vor.u32 %v462_v28, %v458_v5  ;;  %v468_v36 = vrot.slane %v466_v26, 5  ;;  %v954_v40 = vunpack.c.l.b16 %v902_v30 }
  0x3b   : > { %3215 = vmatmul.msk.bf16.gmra.mxu1 %vm647_vm5, %v3715_v59  ;;  %v622_v31 = vpack.c.b16 %v614_v24, %v613_v22  ;;  %v454_v33 = vrot.slane %v453_v25, 4  ;;  %v471_v43 = vshrl.u32 %v369_v38, 16  ;;  %v474_v44 = vshll.u32 %v369_v38, 16 }
  0x3c   : > { %v464_v42 = vrot.slane %v463_v35, 4  ;;  %v480_v47 = vshll.u32 %v370_v39, 16  ;;  %v484_v8 = vshrl.u32 %v370_v39, 16  ;;  %v929_v49 = vrot.slane %v4173_v29, 5  ;;  %v3717_v35 = vld [vmem:[%s4144_s10 + $0x24] sm:$0xff] }
  0x3d   : > { %v908_v52 = vrot.slane %v370_v39, 5  ;;  %v473_v56 = vrot.slane %v471_v43, 4  ;;  %v476_v57 = vrot.slane %v474_v44, 5  ;;  %v3225_v60 = vrot.slane %v861_v55, 9  ;;  %v862_v43 = vld [vmem:[%s4144_s10 + $0x30] sm:$0xe] }
  0x3e   : > { %3798 = vmatpush.bf16.msra.mxu3 %v4110_v3  ;;  %3159 = vmatmul.msk.bf16.gmra.mxu0 %vm647_vm5, %v616_v17  ;;  %v905_v3 = vsel %vm4146_vm2, %v903_v0, %v904_v18  ;;  %v469_v46 = vsel %vm4189_vm6, %v464_v42, %v468_v36  ;;  %v482_v58 = vrot.slane %v480_v47, 5  ;;  %v486_v59 = vrot.slane %v484_v8, 4  ;;  %v372_v0 = vld [vmem:[%s4144_s10 + $0x34] sm:$0xf]  ;;  %v3720_v17 = vld [vmem:[%s4144_s10 + $0x48] sm:$0xff] }
  0x3f   : > { %v955_v41 = vunpack.c.l.b16 %v905_v3  ;;  %v604_v53 = vunpack.c.l.b16 %v469_v46  ;;  %v910_v29 = vrot.slane %v908_v52, 4  ;;  %v911_v61 = vrot.slane %v390_v54, 5  ;;  %v391_v46 = vld [vmem:[%s4144_s10 + $0x38] sm:$0x1] }
  0x40   : > { %v931_v62 = vrot.slane %v929_v49, 4  ;;  %v932_v63 = vrot.slane %v4176_v34, 5  ;;  %v477_v2 = vor.u32 %v476_v57, %v473_v56  ;;  %v487_v4 = vor.u32 %v486_v59, %v482_v58 }
  0x41   : > { %v968_v50 = vpack.c.b16 %v955_v41, %v954_v40  ;;  %v490_v7 = vshll.u32 %v390_v54, 16  ;;  %v3228_v27 = vrot.slane %v864_v11, 9  ;;  %v909_v12 = vsel %vm4146_vm2, %v3225_v60, %v908_v52 }
  0x42   : > { %3799 = vmatpush.bf16.msra.mxu3 %v4130_v6  ;;  %v459_v6 = vsel %vm4189_vm6, %v454_v33, %v458_v5  ;;  %v912_v13 = vsel %vm4146_vm2, %v910_v29, %v911_v61  ;;  %v478_v15 = vrot.slane %v477_v2, 4  ;;  %v933_v16 = vsel %vm4146_vm2, %v931_v62, %v932_v63  ;;  %v3721_v62 = vld [vmem:[%s4144_s10 + $0x54] sm:$0xff]  ;;  %v374_v63 = vld [vmem:[%s4144_s10 + $0x40] sm:$0xf] }
  0x43   : > { %3165 = vmatmul.msk.bf16.gmra.mxu3 %vm647_vm5, %v622_v31  ;;  %v930_v34 = vsel %vm4146_vm2, %v3228_v27, %v929_v49  ;;  %v488_v18 = vrot.slane %v487_v4, 4  ;;  %v492_v19 = vrot.slane %v490_v7, 5  ;;  %v963_v21 = vunpack.c.l.b16 %v933_v16  ;;  %v3745_v31 = vld [vmem:[%s5005_s2 + $0x78] sm:$0xff]  ;;  %v3746_v16 = vld [vmem:[%s5005_s2 + $0x80] sm:$0xff] }
  0x44   : > { %v962_v20 = vunpack.c.l.b16 %v930_v34  ;;  %v956_v22 = vunpack.c.l.b16 %v909_v12  ;;  %v957_v5 = vunpack.c.l.b16 %v912_v13  ;;  %v495_v23 = vshrl.u32 %v371_v14, 16  ;;  %v3743_v34 = vld [vmem:[%s5005_s2 + $0x68] sm:$0xff]  ;;  %1573 = vmatpush.bf16.msrb.mxu0 %v3746_v16 }
  0x45   : > { %v498_v24 = vshll.u32 %v371_v14, 16  ;;  %v504_v25 = vshll.u32 %v372_v0, 16  ;;  %v508_v26 = vshrl.u32 %v372_v0, 16  ;;  %v483_v30 = vsel %vm4189_vm6, %v478_v15, %v482_v58 }
  0x46   : > { %3800 = vmatpush.bf16.msra.mxu3 %v4153_v10  ;;  %v603_v10 = vunpack.c.l.b16 %v459_v6  ;;  %v4286_v28 = vpack.c.b16 %v963_v21, %v962_v20  ;;  %v493_v3 = vsel %vm4189_vm6, %v488_v18, %v492_v19  ;;  %v969_v33 = vpack.c.b16 %v957_v5, %v956_v22  ;;  %v3744_v6 = vld [vmem:[%s5005_s2 + $0x70] sm:$0xff]  ;;  %v3753_v18 = vld [vmem:[%s5005_s2 + $0xb8] sm:$0xff]  ;;  %v392_v5 = vld [vmem:[%s4144_s10 + $0x44] sm:$0x1] }
  0x47   : > { %v497_v36 = vrot.slane %v495_v23, 4  ;;  %v500_v38 = vrot.slane %v498_v24, 5  ;;  %v506_v39 = vrot.slane %v504_v25, 5  ;;  %v510_v40 = vrot.slane %v508_v26, 4  ;;  %v3718_v22 = vld [vmem:[%s4144_s10 + $0x30] sm:$0xff]  ;;  %1804 = vmatpush.bf16.msrb.mxu1 %v3753_v18 }
  0x48   : > { %3256 = vmatmul.msk.bf16.gmra.mxu2 %vm647_vm5, %v968_v50  ;;  %v617_v1 = vpack.c.b16 %v604_v53, %v603_v10  ;;  %v605_v41 = vunpack.c.l.b16 %v483_v30  ;;  %v606_v42 = vunpack.c.l.b16 %v493_v3  ;;  %v915_v44 = vrot.slane %v372_v0, 5  ;;  %v865_v53 = vld [vmem:[%s4144_s10 + $0x54] sm:$0xe]  ;;  %v863_v23 = vld [vmem:[%s4144_s10 + $0x3c] sm:$0xe] }
  0x49   : > { %v3226_v47 = vrot.slane %v862_v43, 9  ;;  %v501_v8 = vor.u32 %v500_v38, %v497_v36  ;;  %v511_v48 = vor.u32 %v510_v40, %v506_v39  ;;  %v514_v49 = vshll.u32 %v391_v46, 16 }
  0x4a   : > { %v618_v50 = vpack.c.b16 %v606_v42, %v605_v41  ;;  %v918_v52 = vrot.slane %v391_v46, 5  ;;  %v936_v10 = vrot.slane %v4218_v32, 5  ;;  %v3229_v54 = vrot.slane %v865_v53, 9  ;;  %v3344_v46 = vld [vmem:[%s4144_s10 + $0xc] sm:$0xf] }
  0x4b   : > { %3216 = vmatmul.msk.bf16.gmra.mxu1 %vm647_vm5, %v3716_v51  ;;  %v917_v51 = vrot.slane %v915_v44, 4  ;;  %v939_v56 = vrot.slane %v4222_v37, 5  ;;  %v916_v57 = vsel %vm4146_vm2, %v3226_v47, %v915_v44  ;;  %v502_v58 = vrot.slane %v501_v8, 4  ;;  %v373_v37 = vld [vmem:[%s4144_s10 + $0x3c] sm:$0xf]  ;;  %v3763_v44 = vld [vmem:[%s5005_s2 + $0xc8] sm:$0xff] }
  0x4c   : > { %v938_v55 = vrot.slane %v936_v10, 4  ;;  %v512_v59 = vrot.slane %v511_v48, 4  ;;  %v516_v60 = vrot.slane %v514_v49, 5  ;;  %v937_v61 = vsel %vm4146_vm2, %v3229_v54, %v936_v10 }
  0x4d   : > { %v919_v29 = vsel %vm4146_vm2, %v917_v51, %v918_v52  ;;  %v958_v4 = vunpack.c.l.b16 %v916_v57  ;;  %v507_v11 = vsel %vm4189_vm6, %v502_v58, %v506_v39  ;;  %v519_v13 = vshrl.u32 %v373_v37, 16  ;;  %v3769_v58 = vld [vmem:[%s5005_s2 + $0xf8] sm:$0xff] }
  0x4e   : > { %3160 = vmatmul.msk.bf16.gmra.mxu0 %vm647_vm5, %v617_v1  ;;  %v940_v32 = vsel %vm4146_vm2, %v938_v55, %v939_v56  ;;  %v964_v1 = vunpack.c.l.b16 %v937_v61  ;;  %v959_v7 = vunpack.c.l.b16 %v919_v29  ;;  %v517_v27 = vsel %vm4189_vm6, %v512_v59, %v516_v60  ;;  %v3751_v59 = vld [vmem:[%s5005_s2 + $0xa8] sm:$0xff]  ;;  %v3762_v60 = vld [vmem:[%s5005_s2 + $0xc0] sm:$0xff] }
  0x4f   : > { %v965_v2 = vunpack.c.l.b16 %v940_v32  ;;  %v522_v14 = vshll.u32 %v373_v37, 16  ;;  %v528_v15 = vshll.u32 %v374_v63, 16  ;;  %v532_v0 = vshrl.u32 %v374_v63, 16  ;;  %v3773_v32 = vld [vmem:[%s5005_s2 + $0x118] sm:$0xff] }
  0x50   : > { %v970_v19 = vpack.c.b16 %v959_v7, %v958_v4  ;;  %v607_v20 = vunpack.c.l.b16 %v507_v11  ;;  %v608_v21 = vunpack.c.l.b16 %v517_v27  ;;  %v922_v24 = vrot.slane %v374_v63, 5  ;;  %v3719_v37 = vld [vmem:[%s4144_s10 + $0x3c] sm:$0xff]  ;;  %2582 = vmatpush.bf16.msra.mxu0 %v3773_v32  ;;  %v3400_v27 = vld [vmem:[%s4144_s10 + $0xc] sm:$0xe] }
  0x51   : > { %v4323_v12 = vpack.c.b16 %v965_v2, %v964_v1  ;;  %v521_v25 = vrot.slane %v519_v13, 4  ;;  %v524_v26 = vrot.slane %v522_v14, 5  ;;  %v530_v30 = vrot.slane %v528_v15, 5  ;;  %v3346_v1 = vld [vmem:[%s4144_s10 + $0x14] sm:$0x1]  ;;  %v3750_v7 = vld [vmem:[%s5005_s2 + $0xa0] sm:$0xff] }
  0x52   : > { %v534_v3 = vrot.slane %v532_v0, 4  ;;  %v619_v36 = vpack.c.b16 %v608_v21, %v607_v20  ;;  %v3227_v38 = vrot.slane %v863_v23, 9  ;;  %v925_v39 = vrot.slane %v392_v5, 5  ;;  %v3348_v23 = vld [vmem:[%s4144_s10 + $0x1c] sm:$0xf] }
  0x53   : > { %3220 = vmatmul.msk.bf16.vlgmr.msrb.gmra.mxu3 %vm647_vm5, %v3720_v17  ;;  %v3765_v17 = vld [vmem:[%s5005_s2 + $0xd8] sm:$0xff]  ;;  %v924_v40 = vrot.slane %v922_v24, 4  ;;  %v525_v41 = vor.u32 %v524_v26, %v521_v25  ;;  %v538_v43 = vshll.u32 %v392_v5, 16  ;;  %v1294_v51 = vshrl.u32 %v3344_v46, 16 }
  0x54   : > { %1208 = vmatpush.bf16.msrb.mxu3 %v3745_v31  ;;  %1986 = vmatpush.bf16.msrb.mxu2 %v3765_v17  ;;  %v3742_v31 = vld [vmem:[%s5005_s2 + $0x60] sm:$0xff]  ;;  %v535_v42 = vor.u32 %v534_v3, %v530_v30  ;;  %v1297_v52 = vshll.u32 %v3344_v46, 16  ;;  %v1313_v15 = vshll.u32 %v3346_v1, 16  ;;  %v1668_v17 = vrot.slane %v3346_v1, 5  ;;  %v3347_v5 = vld [vmem:[%s4144_s10 + $0x18] sm:$0xf] }
  0x55   : > { %v926_v47 = vsel %vm4146_vm2, %v924_v40, %v925_v39  ;;  %v526_v8 = vrot.slane %v525_v41, 4  ;;  %v540_v49 = vrot.slane %v538_v43, 5  ;;  %v1296_v29 = vrot.slane %v1294_v51, 4  ;;  %v3754_v39 = vld [vmem:[%s4144_s10 + $0x18] sm:$0xff]  ;;  %v3349_v43 = vld [vmem:[%s4144_s10 + $0x20] sm:$0x1] }
  0x56   : > { %v536_v48 = vrot.slane %v535_v42, 4  ;;  %v961_v53 = vunpack.c.l.b16 %v926_v47  ;;  %v1299_v61 = vrot.slane %v1297_v52, 5  ;;  %v1315_v20 = vrot.slane %v1313_v15, 5  ;;  %v3401_v47 = vld [vmem:[%s4144_s10 + $0x18] sm:$0xe]  ;;  %v3768_v1 = vld [vmem:[%s5005_s2 + $0xf0] sm:$0xff] }
  0x57   : > { %v531_v54 = vsel %vm4189_vm6, %v526_v8, %v530_v30  ;;  %v1318_v30 = vshrl.u32 %v3347_v5, 16  ;;  %v1321_v3 = vshll.u32 %v3347_v5, 16  ;;  %v1672_v46 = vrot.slane %v3348_v23, 5 }
  0x58   : > { %3257 = vmatmul.msk.bf16.gmra.mxu2 %vm647_vm5, %v969_v33  ;;  %1209 = vmatpush.bf16.msrb.mxu3 %v3744_v6  ;;  %v3764_v33 = vld [vmem:[%s5005_s2 + $0xd0] sm:$0xff]  ;;  %v923_v6 = vsel %vm4146_vm2, %v3227_v38, %v922_v24  ;;  %v541_v55 = vsel %vm4189_vm6, %v536_v48, %v540_v49  ;;  %v1300_v13 = vor.u32 %v1299_v61, %v1296_v29  ;;  %v1337_v48 = vshll.u32 %v3349_v43, 16 }
  0x59   : > { %1987 = vmatpush.bf16.msrb.mxu2 %v3764_v33  ;;  %v960_v10 = vunpack.c.l.b16 %v923_v6  ;;  %v610_v63 = vunpack.c.l.b16 %v541_v55  ;;  %v1327_v33 = vshll.u32 %v3348_v23, 16  ;;  %v1320_v41 = vrot.slane %v1318_v30, 4 }
  0x5a   : > { %v1301_v18 = vrot.slane %v1300_v13, 4  ;;  %v1323_v42 = vrot.slane %v1321_v3, 5  ;;  %v1674_v51 = vrot.slane %v1672_v46, 4  ;;  %v1675_v52 = vrot.slane %v3349_v43, 5 }
  0x5b   : > { %3217 = vmatmul.msk.bf16.gmra.mxu1 %vm647_vm5, %v3717_v35  ;;  %v3752_v35 = vld [vmem:[%s5005_s2 + $0xb0] sm:$0xff]  ;;  %v1339_v55 = vrot.slane %v1337_v48, 5 }
  0x5c   : > { %1210 = vmatpush.bf16.msrb.mxu3 %v3743_v34  ;;  %1805 = vmatpush.bf16.msrb.mxu1 %v3752_v35  ;;  %v3408_v34 = vrot.slane %v3400_v27, 9  ;;  %v1331_v35 = vshrl.u32 %v3348_v23, 16  ;;  %v3755_v27 = vld [vmem:[%s4144_s10 + $0x24] sm:$0xff] }
  0x5d   : > { %1988 = vmatpush.bf16.msrb.mxu2 %v3763_v44  ;;  %v1329_v44 = vrot.slane %v1327_v33, 5  ;;  %v3735_v33 = vld [vmem:[%s4144_s10 + $0x18] sm:$0xff] }
  0x5e   : > { %3161 = vmatmul.msk.bf16.gmra.mxu0 %vm647_vm5, %v618_v50  ;;  %v3345_v50 = vld [vmem:[%s4144_s10 + $0x10] sm:$0xf]  ;;  %v1333_v6 = vrot.slane %v1331_v35, 4  ;;  %v3354_v35 = vld [vmem:[%s4144_s10 + $0x34] sm:$0xf] }
  0x5f   : > { %v1303_v56 = vshll.u32 %v3345_v50, 16  ;;  %v1307_v57 = vshrl.u32 %v3345_v50, 16  ;;  %v1665_v11 = vrot.slane %v3345_v50, 5  ;;  %v3409_v50 = vrot.slane %v3401_v47, 9  ;;  %v3756_v47 = vld [vmem:[%s4144_s10 + $0x30] sm:$0xff] }
  0x60   : > { %1211 = vmatpush.bf16.msrb.mxu3 %v3742_v31  ;;  %1806 = vmatpush.bf16.msrb.mxu1 %v3751_v59  ;;  %v1334_v49 = vor.u32 %v1333_v6, %v1329_v44  ;;  %v3351_v59 = vld [vmem:[%s4144_s10 + $0x28] sm:$0xf]  ;;  %v1375_v43 = vshll.u32 %v3354_v35, 16 }
  0x61   : > { %v1305_v2 = vrot.slane %v1303_v56, 5  ;;  %v1309_v4 = vrot.slane %v1307_v57, 4  ;;  %1989 = vmatpush.bf16.msrb.mxu2 %v3762_v60  ;;  %v1667_v16 = vrot.slane %v1665_v11, 4  ;;  %v1666_v21 = vsel %vm4146_vm2, %v3408_v34, %v1665_v11  ;;  %v3772_v34 = vld [vmem:[%s5005_s2 + $0x110] sm:$0xff] }
  0x62   : > { %v1728_v25 = vunpack.c.l.b16 %v1666_v21  ;;  %v1673_v56 = vsel %vm4146_vm2, %v3409_v50, %v1672_v46  ;;  %v1676_v57 = vsel %vm4146_vm2, %v1674_v51, %v1675_v52  ;;  %2583 = vmatpush.bf16.msra.mxu0 %v3772_v34  ;;  %v3355_v50 = vld [vmem:[%s4144_s10 + $0x38] sm:$0x1]  ;;  %v1377_v51 = vrot.slane %v1375_v43, 5 }
  0x63   : > { %3221 = vmatmul.msk.bf16.gmra.mxu3 %vm647_vm5, %v3721_v62  ;;  %v609_v62 = vunpack.c.l.b16 %v531_v54  ;;  %v1310_v0 = vor.u32 %v1309_v4, %v1305_v2  ;;  %v1306_v24 = vsel %vm4189_vm6, %v1301_v18, %v1305_v2  ;;  %v1335_v54 = vrot.slane %v1334_v49, 4 }
  0x64   : > { %1807 = vmatpush.bf16.msrb.mxu1 %v3750_v7  ;;  %v1730_v61 = vunpack.c.l.b16 %v1673_v56  ;;  %v1731_v32 = vunpack.c.l.b16 %v1676_v57  ;;  %v1385_v56 = vshll.u32 %v3355_v50, 16 }
  0x65   : > { %v620_v14 = vpack.c.b16 %v610_v63, %v609_v62  ;;  %v1340_v62 = vsel %vm4189_vm6, %v1335_v54, %v1339_v55  ;;  %v1351_v63 = vshll.u32 %v3351_v59, 16 }
  0x66   : > { %v1497_v11 = vunpack.c.l.b16 %v1340_v62  ;;  %v1745_v13 = vpack.c.b16 %v1731_v32, %v1730_v61  ;;  %v1387_v62 = vrot.slane %v1385_v56, 5 }
  0x67   : > { %v1353_v15 = vrot.slane %v1351_v63, 5  ;;  %v3356_v63 = vld [vmem:[%s4144_s10 + $0x3c] sm:$0xf] }
  0x68   : > { %3258 = vmatmul.msk.bf16.gmra.mxu2 %vm647_vm5, %v970_v19  ;;  %v1311_v19 = vrot.slane %v1310_v0, 4 }
  0x6a   : > { %v1316_v31 = vsel %vm4189_vm6, %v1311_v19, %v1315_v20 }
  0x6b   : > { %3218 = vmatmul.msk.bf16.gmra.mxu1 %vm647_vm5, %v3718_v22  ;;  %v1669_v22 = vsel %vm4146_vm2, %v1667_v16, %v1668_v17  ;;  %v1495_v38 = vunpack.c.l.b16 %v1316_v31  ;;  %v1679_v16 = vrot.slane %v3351_v59, 5  ;;  %v3402_v17 = vld [vmem:[%s4144_s10 + $0x24] sm:$0xe]  ;;  %v3353_v31 = vld [vmem:[%s4144_s10 + $0x30] sm:$0xf] }
  0x6c   : > { %v1729_v26 = vunpack.c.l.b16 %v1669_v22  ;;  %v3410_v22 = vrot.slane %v3402_v17, 9 }
  0x6d   : > { %v1681_v5 = vrot.slane %v1679_v16, 4 }
  0x6e   : > { %3162 = vmatmul.msk.bf16.gmra.mxu0 %vm647_vm5, %v619_v36  ;;  %v1494_v36 = vunpack.c.l.b16 %v1306_v24  ;;  %v1744_v40 = vpack.c.b16 %v1729_v26, %v1728_v25  ;;  %v1680_v30 = vsel %vm4146_vm2, %v3410_v22, %v1679_v16 }
  0x70   : > { %v1510_v8 = vpack.c.b16 %v1495_v38, %v1494_v36  ;;  %v1732_v38 = vunpack.c.l.b16 %v1680_v30 }
  0x73   : > { %3260 = vmatmul.msk.bf16.vlgmr.msra.gmra.mxu3 %vm647_vm5, %v4286_v28  ;;  %v971_v28 = vpack.c.b16 %v961_v53, %v960_v10  ;;  %v3350_v53 = vld [vmem:[%s4144_s10 + $0x24] sm:$0xf] }
  0x74   : > { %2348 = vmatpush.bf16.msra.mxu3 %v3769_v58  ;;  %v3734_v58 = vld [vmem:[%s4144_s10 + $0xc] sm:$0xff]  ;;  %v1342_v60 = vshrl.u32 %v3350_v53, 16  ;;  %v1345_v29 = vshll.u32 %v3350_v53, 16 }
  0x75   : > { %v3403_v53 = vld [vmem:[%s4144_s10 + $0x30] sm:$0xe] }
  0x76   : > { %v1344_v2 = vrot.slane %v1342_v60, 4  ;;  %v1347_v4 = vrot.slane %v1345_v29, 5  ;;  %v1689_v60 = vrot.slane %v3355_v50, 5 }
  0x78   : > { %3259 = vmatmul.msk.bf16.gmra.mxu2 %vm647_vm5, %v971_v28  ;;  %2349 = vmatpush.bf16.msra.mxu3 %v3768_v1  ;;  %v1348_v18 = vor.u32 %v1347_v4, %v1344_v2 }
  0x7a   : > { %v1349_v24 = vrot.slane %v1348_v18, 4 }
  0x7b   : > { %3219 = vmatmul.msk.bf16.gmra.mxu1 %vm647_vm5, %v3719_v37  ;;  %v1355_v37 = vshrl.u32 %v3351_v59, 16 }
  0x7c   : > { %v1354_v36 = vsel %vm4189_vm6, %v1349_v24, %v1353_v15 }
  0x7d   : > { %v1357_v0 = vrot.slane %v1355_v37, 4  ;;  %v1498_v6 = vunpack.c.l.b16 %v1354_v36 }
  0x7e   : > { %3163 = vmatmul.msk.bf16.gmra.mxu0 %vm647_vm5, %v620_v14  ;;  %v3352_v14 = vld [vmem:[%s4144_s10 + $0x2c] sm:$0x1] }
  0x7f   : > { %v1361_v20 = vshll.u32 %v3352_v14, 16  ;;  %v1358_v21 = vor.u32 %v1357_v0, %v1353_v15  ;;  %v1682_v23 = vrot.slane %v3352_v14, 5  ;;  %v1393_v14 = vshll.u32 %v3356_v63, 16 }
  0x81   : > { %v1359_v25 = vrot.slane %v1358_v21, 4  ;;  %v1363_v26 = vrot.slane %v1361_v20, 5  ;;  %v1683_v3 = vsel %vm4146_vm2, %v1681_v5, %v1682_v23  ;;  %v3767_v20 = vld [vmem:[%s5005_s2 + $0xe8] sm:$0xff]  ;;  %v1395_v23 = vrot.slane %v1393_v14, 5 }
  0x82   : > { %2350 = vmatpush.bf16.msra.mxu3 %v3767_v20 }
  0x83   : > { %3261 = vmatmul.msk.bf16.gmra.mxu3 %vm647_vm5, %v4323_v12  ;;  %v1324_v12 = vor.u32 %v1323_v42, %v1320_v41  ;;  %v1369_v41 = vshll.u32 %v3353_v31, 16  ;;  %v1364_v42 = vsel %vm4189_vm6, %v1359_v25, %v1363_v26  ;;  %v3757_v26 = vld [vmem:[%s4144_s10 + $0x3c] sm:$0xff] }
  0x84   : > { %v1499_v46 = vunpack.c.l.b16 %v1364_v42 }
  0x85   : > { %v1325_v10 = vrot.slane %v1324_v12, 4  ;;  %v1371_v48 = vrot.slane %v1369_v41, 5  ;;  %v3404_v41 = vld [vmem:[%s4144_s10 + $0x3c] sm:$0xe] }
  0x86   : > { %v1512_v54 = vpack.c.b16 %v1499_v46, %v1498_v6  ;;  %v3412_v46 = vrot.slane %v3404_v41, 9  ;;  %v3362_v41 = vld [vmem:[%s4144_s10 + $0x54] sm:$0xf] }
  0x87   : > { %v1330_v28 = vsel %vm4189_vm6, %v1325_v10, %v1329_v44  ;;  %v1379_v44 = vshrl.u32 %v3354_v35, 16  ;;  %v1686_v10 = vrot.slane %v3354_v35, 5  ;;  %v3358_v35 = vld [vmem:[%s4144_s10 + $0x44] sm:$0x1] }
  0x88   : > { %3522 = vmatmul.msk.bf16.vlgmr.msrb.gmra.mxu2 %vm647_vm5, %v3754_v39  ;;  %v1496_v7 = vunpack.c.l.b16 %v1330_v28  ;;  %v1733_v39 = vunpack.c.l.b16 %v1683_v3 }
  0x89   : > { %v1381_v52 = vrot.slane %v1379_v44, 4  ;;  %v1688_v59 = vrot.slane %v1686_v10, 4  ;;  %v1409_v44 = vshll.u32 %v3358_v35, 16 }
  0x8a   : > { %v1511_v19 = vpack.c.b16 %v1497_v11, %v1496_v7  ;;  %v3736_v11 = vld [vmem:[%s4144_s10 + $0x24] sm:$0xff] }
  0x8b   : > { %3440 = vmatmul.msk.bf16.vlgmr.msrb.gmra.mxu1 %vm647_vm5, %v1744_v40  ;;  %v1366_v40 = vshrl.u32 %v3353_v31, 16  ;;  %v1382_v57 = vor.u32 %v1381_v52, %v1377_v51  ;;  %v1690_v7 = vsel %vm4146_vm2, %v1688_v59, %v1689_v60  ;;  %v3360_v59 = vld [vmem:[%s4144_s10 + $0x4c] sm:$0xf] }
  0x8c   : > { %v1735_v0 = vunpack.c.l.b16 %v1690_v7 }
  0x8d   : > { %v1368_v12 = vrot.slane %v1366_v40, 4  ;;  %v1383_v2 = vrot.slane %v1382_v57, 4  ;;  %v3771_v40 = vld [vmem:[%s5005_s2 + $0x108] sm:$0xff] }
  0x8e   : > { %3392 = vmatmul.msk.bf16.vlgmr.msrb.gmra.mxu0 %vm647_vm5, %v1510_v8  ;;  %v1746_v8 = vpack.c.b16 %v1733_v39, %v1732_v38  ;;  %v3359_v57 = vld [vmem:[%s4144_s10 + $0x48] sm:$0xf] }
  0x8f   : > { %v1372_v55 = vor.u32 %v1371_v48, %v1368_v12  ;;  %v1388_v16 = vsel %vm4189_vm6, %v1383_v2, %v1387_v62  ;;  %2584 = vmatpush.bf16.msra.mxu0 %v3771_v40 }
  0x90   : > { %v1501_v25 = vunpack.c.l.b16 %v1388_v16 }
  0x91   : > { %v1373_v28 = vrot.slane %v1372_v55, 4 }
  0x93   : > { %3336 = vmatmul.msk.bf16.vlgmr.msrb.gmra.mxu3 %vm647_vm5, %v3734_v58  ;;  %v3411_v58 = vrot.slane %v3403_v53, 9  ;;  %v1378_v34 = vsel %vm4189_vm6, %v1373_v28, %v1377_v51  ;;  %v1411_v51 = vrot.slane %v1409_v44, 5  ;;  %v1417_v28 = vshll.u32 %v3359_v57, 16 }
  0x94   : > { %v1500_v24 = vunpack.c.l.b16 %v1378_v34 }
  0x95   : > { %v1687_v4 = vsel %vm4146_vm2, %v3411_v58, %v1686_v10  ;;  %v3737_v58 = vld [vmem:[%s4144_s10 + $0x30] sm:$0xff] }
  0x96   : > { %v1734_v15 = vunpack.c.l.b16 %v1687_v4  ;;  %v1513_v43 = vpack.c.b16 %v1501_v25, %v1500_v24 }
  0x98   : > { %3523 = vmatmul.msk.bf16.gmra.mxu2 %vm647_vm5, %v3755_v27  ;;  %v3357_v27 = vld [vmem:[%s4144_s10 + $0x40] sm:$0xf]  ;;  %v1747_v30 = vpack.c.b16 %v1735_v0, %v1734_v15  ;;  %v1419_v0 = vrot.slane %v1417_v28, 5  ;;  %v3759_v28 = vld [vmem:[%s4144_s10 + $0x54] sm:$0xff] }
  0x99   : > { %v1399_v17 = vshll.u32 %v3357_v27, 16  ;;  %v1403_v18 = vshrl.u32 %v3357_v27, 16  ;;  %v1693_v39 = vrot.slane %v3357_v27, 5 }
  0x9b   : > { %3441 = vmatmul.msk.bf16.gmra.mxu1 %vm647_vm5, %v1745_v13  ;;  %v1390_v13 = vshrl.u32 %v3356_v63, 16  ;;  %v1401_v36 = vrot.slane %v1399_v17, 5  ;;  %v1405_v38 = vrot.slane %v1403_v18, 4  ;;  %v1694_v55 = vsel %vm4146_vm2, %v3412_v46, %v1693_v39  ;;  %v3361_v18 = vld [vmem:[%s4144_s10 + $0x50] sm:$0x1] }
  0x9c   : > { %v1423_v63 = vshll.u32 %v3360_v59, 16  ;;  %v1433_v24 = vshll.u32 %v3361_v18, 16 }
  0x9d   : > { %v1392_v5 = vrot.slane %v1390_v13, 4  ;;  %v1406_v6 = vor.u32 %v1405_v38, %v1401_v36  ;;  %v3758_v13 = vld [vmem:[%s4144_s10 + $0x48] sm:$0xff] }
  0x9e   : > { %3393 = vmatmul.msk.bf16.gmra.mxu0 %vm647_vm5, %v1511_v19  ;;  %v1435_v40 = vrot.slane %v1433_v24, 5 }
  0x9f   : > { %v1396_v42 = vor.u32 %v1395_v23, %v1392_v5 }
  0xa1   : > { %v1397_v50 = vrot.slane %v1396_v42, 4 }
  0xa3   : > { %3337 = vmatmul.msk.bf16.gmra.mxu3 %vm647_vm5, %v3735_v33  ;;  %v1402_v60 = vsel %vm4189_vm6, %v1397_v50, %v1401_v36 }
  0xa8   : > { %v818_v49 = vpop.f32.mrf.mxu1  ;;  %3524 = vmatmul.msk.bf16.gmra.mxu2 %vm647_vm5, %v3756_v47  ;;  %v1695_v47 = vrot.slane %v1693_v39, 4 }
  0xab   : > { %3442 = vmatmul.msk.bf16.gmra.mxu1 %vm647_vm5, %v1746_v8  ;;  %v681_v29 = vpop.f32.mrf.mxu0  ;;  %v1031_v32 = vpop.f32.mrf.mxu2  ;;  %v1696_v8 = vrot.slane %v3358_v35, 5 }
  0xac   : > { %v819_v61 = vadd.f32 %v818_v49, %v681_v29  ;;  %v1736_v29 = vunpack.c.l.b16 %v1694_v55 }
  0xad   : > { %v1697_v56 = vsel %vm4146_vm2, %v1695_v47, %v1696_v8  ;;  %v3738_v8 = vld [vmem:[%s4144_s10 + $0x3c] sm:$0xff] }
  0xae   : > { %v4449_v37 = vadd.f32 %v1031_v32, %v819_v61  ;;  %3394 = vmatmul.msk.bf16.gmra.mxu0 %vm647_vm5, %v1512_v54  ;;  %v1407_v54 = vrot.slane %v1406_v6, 4  ;;  %v1737_v61 = vunpack.c.l.b16 %v1697_v56  ;;  %v1414_v32 = vshrl.u32 %v3359_v57, 16 }
  0xb0   : > { %v820_v1 = vpop.f32.mrf.mxu1  ;;  %v1412_v62 = vsel %vm4189_vm6, %v1407_v54, %v1411_v51  ;;  %v1748_v14 = vpack.c.b16 %v1737_v61, %v1736_v29  ;;  %v1416_v15 = vrot.slane %v1414_v32, 4 }
  0xb1   : > { %v1503_v27 = vunpack.c.l.b16 %v1412_v62 }
  0xb2   : > { %v1420_v23 = vor.u32 %v1419_v0, %v1416_v15 }
  0xb3   : > { %3338 = vmatmul.msk.bf16.gmra.mxu3 %vm647_vm5, %v3736_v11  ;;  %v683_v19 = vpop.f32.mrf.mxu0  ;;  %v1033_v22 = vpop.f32.mrf.mxu2  ;;  %v1502_v11 = vunpack.c.l.b16 %v1402_v60 }
  0xb4   : > { %v821_v21 = vadd.f32 %v820_v1, %v683_v19  ;;  %v1427_v1 = vshrl.u32 %v3360_v59, 16  ;;  %v1425_v19 = vrot.slane %v1423_v63, 5  ;;  %v1421_v39 = vrot.slane %v1420_v23, 4 }
  0xb5   : > { %v1514_v5 = vpack.c.b16 %v1503_v27, %v1502_v11 }
  0xb6   : > { %v4467_v3 = vpop.f32.mrf.mxu3  ;;  %v4469_v31 = vadd.f32 %v1033_v22, %v821_v21  ;;  %v1429_v20 = vrot.slane %v1427_v1, 4  ;;  %v1700_v21 = vrot.slane %v3360_v59, 5  ;;  %v3405_v22 = vld [vmem:[%s4144_s10 + $0x48] sm:$0xe] }
  0xb8   : > { %v823_v33 = vpop.f32.mrf.mxu1  ;;  %3525 = vmatmul.msk.bf16.gmra.mxu2 %vm647_vm5, %v3757_v26  ;;  %v1430_v25 = vor.u32 %v1429_v20, %v1425_v19  ;;  %v3413_v26 = vrot.slane %v3405_v22, 9 }
  0xba   : > { %v1431_v6 = vrot.slane %v1430_v25, 4  ;;  %v1701_v46 = vsel %vm4146_vm2, %v3413_v26, %v1700_v21 }
  0xbb   : > { %3443 = vmatmul.msk.bf16.gmra.mxu1 %vm647_vm5, %v1747_v30  ;;  %v686_v12 = vpop.f32.mrf.mxu0  ;;  %v1036_v49 = vpop.f32.mrf.mxu2  ;;  %v1702_v30 = vrot.slane %v1700_v21, 4  ;;  %v1738_v50 = vunpack.c.l.b16 %v1701_v46 }
  0xbc   : > { %v824_v48 = vadd.f32 %v823_v33, %v686_v12  ;;  %v1703_v33 = vrot.slane %v3361_v18, 5  ;;  %v3363_v12 = vld [vmem:[%s4144_s10 + $0x58] sm:$0xf]  ;;  %v1436_v54 = vsel %vm4189_vm6, %v1431_v6, %v1435_v40  ;;  %v3739_v40 = vld [vmem:[%s4144_s10 + $0x48] sm:$0xff] }
  0xbd   : > { %v1447_v55 = vshll.u32 %v3363_v12, 16  ;;  %v1451_v56 = vshrl.u32 %v3363_v12, 16  ;;  %v1505_v32 = vunpack.c.l.b16 %v1436_v54  ;;  %v1707_v11 = vrot.slane %v3363_v12, 5 }
  0xbe   : > { %v4478_v52 = vpop.f32.mrf.mxu3  ;;  %v4480_v10 = vadd.f32 %v1036_v49, %v824_v48  ;;  %3395 = vmatmul.msk.bf16.gmra.mxu0 %vm647_vm5, %v1513_v43  ;;  %v1704_v47 = vsel %vm4146_vm2, %v1702_v30, %v1703_v33  ;;  %v1438_v48 = vshrl.u32 %v3362_v41, 16  ;;  %v1441_v49 = vshll.u32 %v3362_v41, 16  ;;  %v3366_v41 = vld [vmem:[%s4144_s10 + $0x64] sm:$0xf] }
  0xbf   : > { %v1739_v51 = vunpack.c.l.b16 %v1704_v47  ;;  %v1709_v20 = vrot.slane %v1707_v11, 4 }
  0xc0   : > { %v825_v53 = vpop.f32.mrf.mxu1  ;;  %v1440_v60 = vrot.slane %v1438_v48, 4  ;;  %v1443_v29 = vrot.slane %v1441_v49, 5  ;;  %v1471_v49 = vshll.u32 %v3366_v41, 16 }
  0xc1   : > { %v1749_v62 = vpack.c.b16 %v1739_v51, %v1738_v50  ;;  %v1475_v50 = vshrl.u32 %v3366_v41, 16 }
  0xc2   : > { %v1444_v15 = vor.u32 %v1443_v29, %v1440_v60 }
  0xc3   : > { %3339 = vmatmul.msk.bf16.gmra.mxu3 %vm647_vm5, %v3737_v58  ;;  %v688_v2 = vpop.f32.mrf.mxu0  ;;  %v1038_v7 = vpop.f32.mrf.mxu2  ;;  %v3766_v58 = vld [vmem:[%s5005_s2 + $0xe0] sm:$0xff] }
  0xc4   : > { %v826_v4 = vadd.f32 %v825_v53, %v688_v2  ;;  %v1426_v53 = vsel %vm4189_vm6, %v1421_v39, %v1425_v19  ;;  %2351 = vmatpush.bf16.msra.mxu3 %v3766_v58  ;;  %v3364_v2 = vld [vmem:[%s4144_s10 + $0x5c] sm:$0x1]  ;;  %v1445_v23 = vrot.slane %v1444_v15, 4 }
  0xc5   : > { %v1504_v61 = vunpack.c.l.b16 %v1426_v53 }
  0xc6   : > { %v4496_v34 = vpop.f32.mrf.mxu3  ;;  %v4498_v16 = vadd.f32 %v1038_v7, %v826_v4  ;;  %v1449_v4 = vrot.slane %v1447_v55, 5  ;;  %v1453_v7 = vrot.slane %v1451_v56, 4  ;;  %v3760_v55 = vld [vmem:[%s4144_s10 + $0x60] sm:$0xff] }
  0xc7   : > { %v1515_v0 = vpack.c.b16 %v1505_v32, %v1504_v61  ;;  %v3367_v61 = vld [vmem:[%s4144_s10 + $0x68] sm:$0x1]  ;;  %v1473_v32 = vrot.slane %v1471_v49, 5 }
  0xc8   : > { %v828_v17 = vpop.f32.mrf.mxu1  ;;  %3526 = vmatmul.msk.bf16.gmra.mxu2 %vm647_vm5, %v3758_v13  ;;  %v3770_v13 = vld [vmem:[%s5005_s2 + $0x100] sm:$0xff]  ;;  %v1454_v18 = vor.u32 %v1453_v7, %v1449_v4  ;;  %v1450_v6 = vsel %vm4189_vm6, %v1445_v23, %v1449_v4 }
  0xc9   : > { %2585 = vmatpush.bf16.msra.mxu0 %v3770_v13  ;;  %v1506_v53 = vunpack.c.l.b16 %v1450_v6  ;;  %v3530_v6 = vld [vmem:[%s4144_s10 + $0x18] sm:$0xf] }
  0xca   : > { %v1455_v33 = vrot.slane %v1454_v18, 4 }
  0xcb   : > { %3444 = vmatmul.msk.bf16.gmra.mxu1 %vm647_vm5, %v1748_v14  ;;  %v691_v35 = vpop.f32.mrf.mxu0  ;;  %v1041_v38 = vpop.f32.mrf.mxu2  ;;  %v3406_v14 = vld [vmem:[%s4144_s10 + $0x54] sm:$0xe] }
  0xcc   : > { %v829_v36 = vadd.f32 %v828_v17, %v691_v35  ;;  %v1457_v17 = vshll.u32 %v3364_v2, 16  ;;  %v3414_v19 = vrot.slane %v3406_v14, 9 }
  0xce   : > { %v4505_v42 = vpop.f32.mrf.mxu3  ;;  %v4507_v43 = vadd.f32 %v1041_v38, %v829_v36  ;;  %3396 = vmatmul.msk.bf16.gmra.mxu0 %vm647_vm5, %v1514_v5  ;;  %v1459_v24 = vrot.slane %v1457_v17, 5  ;;  %v1708_v35 = vsel %vm4146_vm2, %v3414_v19, %v1707_v11  ;;  %v3365_v38 = vld [vmem:[%s4144_s10 + $0x60] sm:$0xf]  ;;  %v1481_v11 = vshll.u32 %v3367_v61, 16 }
  0xcf   : > { %v1740_v46 = vunpack.c.l.b16 %v1708_v35  ;;  %v1465_v12 = vshll.u32 %v3365_v38, 16 }
  0xd0   : > { %v4510_v44 = vpop.f32.mrf.mxu1  ;;  %v1460_v48 = vsel %vm4189_vm6, %v1455_v33, %v1459_v24 }
  0xd1   : > { %v1507_v54 = vunpack.c.l.b16 %v1460_v48  ;;  %v1467_v60 = vrot.slane %v1465_v12, 5  ;;  %v3761_v12 = vld [vmem:[%s4144_s10 + $0x6c] sm:$0xff] }
  0xd3   : > { %3340 = vmatmul.msk.bf16.gmra.mxu3 %vm647_vm5, %v3738_v8  ;;  %v4523_v57 = vpop.f32.mrf.mxu0  ;;  %v4528_v59 = vpop.f32.mrf.mxu2  ;;  %v1462_v8 = vshrl.u32 %v3365_v38, 16  ;;  %v1516_v4 = vpack.c.b16 %v1507_v54, %v1506_v53  ;;  %v2075_v53 = vshll.u32 %v3530_v6, 16 }
  0xd5   : > { %v1464_v58 = vrot.slane %v1462_v8, 4 }
  0xd6   : > { %v848_v63 = vpop.f32.mrf.mxu3 }
  0xd7   : > { %v4533_v27 = vadd.f32 %v848_v63, %v4467_v3  ;;  %v1710_v3 = vrot.slane %v3364_v2, 5  ;;  %v3407_v2 = vld [vmem:[%s4144_s10 + $0x60] sm:$0xe]  ;;  %v1468_v7 = vor.u32 %v1467_v60, %v1464_v58 }
  0xd8   : > { %v833_v1 = vpop.f32.mrf.mxu1  ;;  %3527 = vmatmul.msk.bf16.gmra.mxu2 %vm647_vm5, %v3759_v28  ;;  %v1477_v28 = vrot.slane %v1475_v50, 4  ;;  %v3415_v14 = vrot.slane %v3407_v2, 9  ;;  %v2072_v50 = vshrl.u32 %v3530_v6, 16 }
  0xd9   : > { %v1711_v36 = vsel %vm4146_vm2, %v1709_v20, %v1710_v3  ;;  %v1469_v20 = vrot.slane %v1468_v7, 4  ;;  %v3586_v7 = vld [vmem:[%s4144_s10 + $0x18] sm:$0xe] }
  0xda   : > { %v1741_v47 = vunpack.c.l.b16 %v1711_v36  ;;  %v1478_v13 = vor.u32 %v1477_v28, %v1473_v32  ;;  %v2074_v60 = vrot.slane %v2072_v50, 4 }
  0xdb   : > { %3445 = vmatmul.msk.bf16.gmra.mxu1 %vm647_vm5, %v1749_v62  ;;  %v696_v21 = vpop.f32.mrf.mxu0  ;;  %v1046_v5 = vpop.f32.mrf.mxu2  ;;  %v1714_v62 = vrot.slane %v3366_v41, 5  ;;  %v1474_v38 = vsel %vm4189_vm6, %v1469_v20, %v1473_v32 }
  0xdc   : > { %v834_v22 = vadd.f32 %v833_v1, %v696_v21  ;;  %v1750_v56 = vpack.c.b16 %v1741_v47, %v1740_v46  ;;  %v3531_v46 = vld [vmem:[%s4144_s10 + $0x1c] sm:$0xf] }
  0xdd   : > { %v1716_v15 = vrot.slane %v1714_v62, 4  ;;  %v2081_v54 = vshll.u32 %v3531_v46, 16  ;;  %v2443_v2 = vrot.slane %v3531_v46, 5 }
  0xde   : > { %v850_v25 = vpop.f32.mrf.mxu3  ;;  %v4541_v26 = vadd.f32 %v1046_v5, %v834_v22  ;;  %3397 = vmatmul.msk.bf16.gmra.mxu0 %vm647_vm5, %v1515_v0  ;;  %v1717_v0 = vrot.slane %v3367_v61, 5  ;;  %v1479_v22 = vrot.slane %v1478_v13, 4  ;;  %v1715_v5 = vsel %vm4146_vm2, %v3415_v14, %v1714_v62 }
  0xdf   : > { %v4552_v39 = vadd.f32 %v850_v25, %v4478_v52  ;;  %v3740_v25 = vld [vmem:[%s4144_s10 + $0x54] sm:$0xff]  ;;  %v1742_v35 = vunpack.c.l.b16 %v1715_v5  ;;  %v2083_v61 = vrot.slane %v2081_v54, 5  ;;  %v2445_v20 = vrot.slane %v2443_v2, 4 }
  0xe0   : > { %v4544_v30 = vpop.f32.mrf.mxu1  ;;  %v1718_v23 = vsel %vm4146_vm2, %v1716_v15, %v1717_v0 }
  0xe1   : > { %v1743_v36 = vunpack.c.l.b16 %v1718_v23 }
  0xe3   : > { %3341 = vmatmul.msk.bf16.gmra.mxu3 %vm647_vm5, %v3739_v40  ;;  %v4561_v52 = vpop.f32.mrf.mxu0  ;;  %v4563_v51 = vpop.f32.mrf.mxu2  ;;  %v1751_v48 = vpack.c.b16 %v1743_v36, %v1742_v35  ;;  %v3533_v36 = vld [vmem:[%s4144_s10 + $0x24] sm:$0xf] }
  0xe4   : > { %v2099_v50 = vshll.u32 %v3533_v36, 16 }
  0xe6   : > { %v853_v29 = vpop.f32.mrf.mxu3 }
  0xe7   : > { %v4568_v63 = vadd.f32 %v853_v29, %v4496_v34  ;;  %v1483_v34 = vrot.slane %v1481_v11, 5  ;;  %v2077_v29 = vrot.slane %v2075_v53, 5 }
  0xe8   : > { %v838_v1 = vpop.f32.mrf.mxu1  ;;  %3528 = vmatmul.msk.bf16.gmra.mxu2 %vm647_vm5, %v3760_v55  ;;  %v2085_v55 = vshrl.u32 %v3531_v46, 16 }
  0xe9   : > { %v1484_v40 = vsel %vm4189_vm6, %v1479_v22, %v1483_v34  ;;  %v2078_v14 = vor.u32 %v2077_v29, %v2074_v60 }
  0xea   : > { %v1509_v8 = vunpack.c.l.b16 %v1484_v40  ;;  %v2087_v32 = vrot.slane %v2085_v55, 4 }
  0xeb   : > { %3446 = vmatmul.msk.bf16.gmra.mxu1 %vm647_vm5, %v1750_v56  ;;  %v701_v17 = vpop.f32.mrf.mxu0  ;;  %v1051_v19 = vpop.f32.mrf.mxu2  ;;  %v2079_v5 = vrot.slane %v2078_v14, 4 }
  0xec   : > { %v839_v18 = vadd.f32 %v838_v1, %v701_v17  ;;  %v3532_v1 = vld [vmem:[%s4144_s10 + $0x20] sm:$0x1]  ;;  %v2088_v15 = vor.u32 %v2087_v32, %v2083_v61  ;;  %v2101_v32 = vrot.slane %v2099_v50, 5 }
  0xed   : > { %v2091_v0 = vshll.u32 %v3532_v1, 16  ;;  %v2446_v34 = vrot.slane %v3532_v1, 5  ;;  %v3587_v1 = vld [vmem:[%s4144_s10 + $0x24] sm:$0xe] }
  0xee   : > { %v855_v3 = vpop.f32.mrf.mxu3  ;;  %v4573_v21 = vadd.f32 %v1051_v19, %v839_v18  ;;  %3398 = vmatmul.msk.bf16.gmra.mxu0 %vm647_vm5, %v1516_v4  ;;  %v3741_v18 = vld [vmem:[%s4144_s10 + $0x60] sm:$0xff]  ;;  %v3594_v19 = vrot.slane %v3586_v7, 9  ;;  %v2089_v23 = vrot.slane %v2088_v15, 4 }
  0xef   : > { %v4581_v24 = vadd.f32 %v855_v3, %v4505_v42  ;;  %v1508_v42 = vunpack.c.l.b16 %v1474_v38  ;;  %v2093_v3 = vrot.slane %v2091_v0, 5  ;;  %v2447_v35 = vsel %vm4146_vm2, %v2445_v20, %v2446_v34  ;;  %v3534_v38 = vld [vmem:[%s4144_s10 + $0x28] sm:$0xf]  ;;  %v3536_v20 = vld [vmem:[%s4144_s10 + $0x30] sm:$0xf] }
  0xf0   : > { %v4584_v33 = vpop.f32.mrf.mxu1  ;;  %v2507_v46 = vunpack.c.l.b16 %v2447_v35  ;;  %v2105_v53 = vshll.u32 %v3534_v38, 16  ;;  %v2109_v54 = vshrl.u32 %v3534_v38, 16  ;;  %v2450_v29 = vrot.slane %v3534_v38, 5  ;;  %v3537_v34 = vld [vmem:[%s4144_s10 + $0x34] sm:$0xf] }
  0xf1   : > { %v1517_v58 = vpack.c.b16 %v1509_v8, %v1508_v42  ;;  %v2084_v8 = vsel %vm4189_vm6, %v2079_v5, %v2083_v61  ;;  %v2129_v38 = vshll.u32 %v3537_v34, 16 }
  0xf2   : > { %v2272_v55 = vunpack.c.l.b16 %v2084_v8  ;;  %v2452_v14 = vrot.slane %v2450_v29, 4 }
  0xf3   : > { %3342 = vmatmul.msk.bf16.gmra.mxu3 %vm647_vm5, %v3740_v25  ;;  %v4591_v41 = vpop.f32.mrf.mxu0  ;;  %v4595_v47 = vpop.f32.mrf.mxu2  ;;  %v2444_v25 = vsel %vm4146_vm2, %v3594_v19, %v2443_v2  ;;  %v3535_v2 = vld [vmem:[%s4144_s10 + $0x2c] sm:$0x1] }
  0xf4   : > { %v2506_v6 = vunpack.c.l.b16 %v2444_v25  ;;  %v2453_v15 = vrot.slane %v3535_v2, 5  ;;  %v2115_v19 = vshll.u32 %v3535_v2, 16  ;;  %v3588_v2 = vld [vmem:[%s4144_s10 + $0x30] sm:$0xe] }
  0xf6   : > { %v1061_v49 = vpop.f32.mrf.mxu3  ;;  %v2117_v35 = vrot.slane %v2115_v19, 5 }
  0xf7   : > { %v4599_v56 = vadd.f32 %v1061_v49, %v4533_v27  ;;  %v2096_v49 = vshrl.u32 %v3533_v36, 16  ;;  %v2123_v36 = vshll.u32 %v3536_v20, 16 }
  0xf8   : > { %3529 = vmatmul.msk.bf16.gmra.mxu2 %vm647_vm5, %v3761_v12  ;;  %v843_v62 = vpop.f32.mrf.mxu1  ;;  %v2094_v12 = vsel %vm4189_vm6, %v2089_v23, %v2093_v3  ;;  %v2454_v23 = vsel %vm4146_vm2, %v2452_v14, %v2453_v15 }
  0xf9   : > { %v2098_v61 = vrot.slane %v2096_v49, 4  ;;  %v2509_v8 = vunpack.c.l.b16 %v2454_v23 }
  0xfb   : > { %3447 = vmatmul.msk.bf16.gmra.mxu1 %vm647_vm5, %v1751_v48  ;;  %v706_v28 = vpop.f32.mrf.mxu0  ;;  %v1056_v11 = vpop.f32.mrf.mxu2  ;;  %v3777_v48 = vld [vmem:[%s5007_s4 + $0x18] sm:$0xff]  ;;  %v2102_v0 = vor.u32 %v2101_v32, %v2098_v61  ;;  %v2457_v61 = vrot.slane %v3537_v34, 5 }
  0xfc   : > { %v844_v4 = vadd.f32 %v843_v62, %v706_v28  ;;  %2751 = vmatpush.bf16.msra.mxu1 %v3777_v48  ;;  %v2107_v28 = vrot.slane %v2105_v53, 5  ;;  %v2111_v62 = vrot.slane %v2109_v54, 4  ;;  %v2125_v54 = vrot.slane %v2123_v36, 5 }
  0xfd   : > { %v2103_v25 = vrot.slane %v2102_v0, 4 }
  0xfe   : > { %v1063_v13 = vpop.f32.mrf.mxu3  ;;  %v4605_v27 = vadd.f32 %v1056_v11, %v844_v4  ;;  %3399 = vmatmul.msk.bf16.gmra.mxu0 %vm647_vm5, %v1517_v58  ;;  %v2522_v58 = vpack.c.b16 %v2507_v46, %v2506_v6 }
  0xff   : > { %v4609_v17 = vadd.f32 %v1063_v13, %v4552_v39  ;;  %v3787_v39 = vld [vmem:[%s5009_s6 + $0x8] sm:$0xff]  ;;  %v3595_v13 = vrot.slane %v3587_v1, 9  ;;  %v2108_v48 = vsel %vm4189_vm6, %v2103_v25, %v2107_v28 }
 0x100   : > { %2903 = vmatpush.bf16.msra.mxu2 %v3787_v39  ;;  %v2120_v39 = vshrl.u32 %v3536_v20, 16 }
 0x101   : > { %v2451_v5 = vsel %vm4146_vm2, %v3595_v13, %v2450_v29  ;;  %v3538_v29 = vld [vmem:[%s4144_s10 + $0x38] sm:$0x1]  ;;  %v2459_v13 = vrot.slane %v2457_v61, 4 }
 0x102   : > { %v2508_v46 = vunpack.c.l.b16 %v2451_v5  ;;  %v2122_v50 = vrot.slane %v2120_v39, 4  ;;  %v2460_v14 = vrot.slane %v3538_v29, 5 }
 0x103   : > { %3343 = vmatmul.msk.bf16.gmra.mxu3 %vm647_vm5, %v3741_v18  ;;  %v4613_v22 = vpop.f32.mrf.mxu0  ;;  %v2112_v18 = vor.u32 %v2111_v62, %v2107_v28  ;;  %v2274_v62 = vunpack.c.l.b16 %v2108_v48  ;;  %v3776_v48 = vld [vmem:[%s5007_s4 + $0x10] sm:$0xff] }
 0x104   : > { %v2461_v23 = vsel %vm4146_vm2, %v2459_v13, %v2460_v14  ;;  %2752 = vmatpush.bf16.msra.mxu1 %v3776_v48 }
 0x105   : > { %v2511_v36 = vunpack.c.l.b16 %v2461_v23 }
 0x106   : > { %v1066_v40 = vpop.f32.mrf.mxu3 }
 0x107   : > { %v4625_v42 = vadd.f32 %v1066_v40, %v4568_v63  ;;  %v2273_v63 = vunpack.c.l.b16 %v2094_v12  ;;  %v2133_v40 = vshrl.u32 %v3537_v34, 16 }
 0x109   : > { %v2288_v7 = vpack.c.b16 %v2273_v63, %v2272_v55  ;;  %v2131_v55 = vrot.slane %v2129_v38, 5  ;;  %v2135_v63 = vrot.slane %v2133_v40, 4 }
 0x10b   : > { %v1575_v60 = vpop.f32.mrf.mxu0 }
 0x10e   : > { %v1068_v4 = vpop.f32.mrf.mxu3  ;;  %3626 = vmatmul.msk.bf16.vlgmr.msra.gmra.mxu0 %vm647_vm5, %v2522_v58  ;;  %v2523_v58 = vpack.c.b16 %v2509_v8, %v2508_v46 }
 0x10f   : > { %v4638_v11 = vadd.f32 %v1068_v4, %v4581_v24  ;;  %v2113_v24 = vrot.slane %v2112_v18, 4  ;;  %v2136_v4 = vor.u32 %v2135_v63, %v2131_v55 }
 0x111   : > { %v2118_v49 = vsel %vm4189_vm6, %v2113_v24, %v2117_v35  ;;  %v2137_v20 = vrot.slane %v2136_v4, 4  ;;  %v3539_v24 = vld [vmem:[%s4144_s10 + $0x3c] sm:$0xf]  ;;  %v3540_v35 = vld [vmem:[%s4144_s10 + $0x40] sm:$0xf] }
 0x112   : > { %v2275_v1 = vunpack.c.l.b16 %v2118_v49  ;;  %v2144_v40 = vshrl.u32 %v3539_v24, 16  ;;  %v2153_v46 = vshll.u32 %v3540_v35, 16  ;;  %v2157_v8 = vshrl.u32 %v3540_v35, 16 }
 0x113   : > { %3578 = vmatmul.msk.bf16.vlgmr.msra.gmra.mxu3 %vm647_vm5, %v2288_v7  ;;  %v1577_v3 = vpop.f32.mrf.mxu0  ;;  %v2139_v7 = vshll.u32 %v3538_v29, 16 }
 0x114   : > { %v2289_v0 = vpack.c.b16 %v2275_v1, %v2274_v62  ;;  %v2146_v63 = vrot.slane %v2144_v40, 4  ;;  %v2155_v29 = vrot.slane %v2153_v46, 5  ;;  %v3541_v1 = vld [vmem:[%s4144_s10 + $0x44] sm:$0x1] }
 0x115   : > { %v2141_v34 = vrot.slane %v2139_v7, 5 }
 0x116   : > { %v1213_v6 = vpop.f32.mrf.mxu3 }
 0x117   : > { %v1253_v12 = vadd.f32 %v1213_v6, %v4449_v37  ;;  %v2126_v37 = vor.u32 %v2125_v54, %v2122_v50  ;;  %v2147_v6 = vshll.u32 %v3539_v24, 16 }
 0x119   : > { %v4652_v53 = vadd.f32 %v1575_v60, %v1253_v12  ;;  %v3596_v60 = vrot.slane %v3588_v2, 9  ;;  %v2127_v19 = vrot.slane %v2126_v37, 4  ;;  %v2464_v2 = vrot.slane %v3540_v35, 5  ;;  %v3589_v37 = vld [vmem:[%s4144_s10 + $0x3c] sm:$0xe] }
 0x11a   : > { %v3597_v13 = vrot.slane %v3589_v37, 9  ;;  %v3542_v35 = vld [vmem:[%s4144_s10 + $0x48] sm:$0xf] }
 0x11b   : > { %v1580_v32 = vpop.f32.mrf.mxu0  ;;  %v2458_v5 = vsel %vm4146_vm2, %v3596_v60, %v2457_v61  ;;  %v2159_v61 = vrot.slane %v2157_v8, 4  ;;  %v2466_v14 = vrot.slane %v2464_v2, 4  ;;  %v2168_v40 = vshrl.u32 %v3542_v35, 16 }
 0x11c   : > { %v2510_v39 = vunpack.c.l.b16 %v2458_v5  ;;  %v2465_v23 = vsel %vm4146_vm2, %v3597_v13, %v2464_v2  ;;  %v3590_v2 = vld [vmem:[%s4144_s10 + $0x48] sm:$0xe] }
 0x11e   : > { %v1215_v28 = vpop.f32.mrf.mxu3  ;;  %3627 = vmatmul.msk.bf16.gmra.mxu0 %vm647_vm5, %v2523_v58  ;;  %v2149_v58 = vrot.slane %v2147_v6, 5  ;;  %v2171_v6 = vshll.u32 %v3542_v35, 16 }
 0x11f   : > { %v1254_v15 = vadd.f32 %v1215_v28, %v4469_v31  ;;  %v2132_v31 = vsel %vm4189_vm6, %v2127_v19, %v2131_v55  ;;  %v2524_v55 = vpack.c.b16 %v2511_v36, %v2510_v39  ;;  %v2163_v28 = vshll.u32 %v3541_v1, 16 }
 0x120   : > { %v2276_v50 = vunpack.c.l.b16 %v2132_v31  ;;  %v2150_v7 = vor.u32 %v2149_v58, %v2146_v63  ;;  %v3543_v31 = vld [vmem:[%s4144_s10 + $0x4c] sm:$0xf]  ;;  %v2170_v58 = vrot.slane %v2168_v40, 4 }
 0x121   : > { %v4658_v18 = vadd.f32 %v1577_v3, %v1254_v15  ;;  %v2142_v3 = vsel %vm4189_vm6, %v2137_v20, %v2141_v34  ;;  %v2467_v15 = vrot.slane %v3541_v1, 5  ;;  %v2165_v5 = vrot.slane %v2163_v28, 5 }
 0x122   : > { %v2277_v54 = vunpack.c.l.b16 %v2142_v3  ;;  %v2151_v19 = vrot.slane %v2150_v7, 4  ;;  %v2512_v3 = vunpack.c.l.b16 %v2465_v23  ;;  %v2177_v46 = vshll.u32 %v3543_v31, 16  ;;  %v3786_v23 = vld [vmem:[%s5009_s6] sm:$0xff] }
 0x123   : > { %3579 = vmatmul.msk.bf16.gmra.mxu3 %vm647_vm5, %v2289_v0  ;;  %v1582_v25 = vpop.f32.mrf.mxu0  ;;  %v2468_v24 = vsel %vm4146_vm2, %v2466_v14, %v2467_v15  ;;  %v2181_v8 = vshrl.u32 %v3543_v31, 16  ;;  %v2471_v63 = vrot.slane %v3543_v31, 5  ;;  %v3545_v15 = vld [vmem:[%s4144_s10 + $0x54] sm:$0xf]  ;;  %2904 = vmatpush.bf16.msra.mxu2 %v3786_v23  ;;  %v3548_v23 = vld [vmem:[%s4144_s10 + $0x60] sm:$0xf] }
 0x124   : > { %v2513_v39 = vunpack.c.l.b16 %v2468_v24  ;;  %v2156_v36 = vsel %vm4189_vm6, %v2151_v19, %v2155_v29  ;;  %v3546_v19 = vld [vmem:[%s4144_s10 + $0x58] sm:$0xf] }
 0x125   : > { %v2183_v1 = vrot.slane %v2181_v8, 4 }
 0x126   : > { %v1218_v38 = vpop.f32.mrf.mxu3 }
 0x127   : > { %v1255_v12 = vadd.f32 %v1218_v38, %v4480_v10  ;;  %v2290_v10 = vpack.c.b16 %v2277_v54, %v2276_v50  ;;  %v2278_v50 = vunpack.c.l.b16 %v2156_v36 }
 0x129   : > { %v4675_v49 = vadd.f32 %v1580_v32, %v1255_v12  ;;  %v2160_v32 = vor.u32 %v2159_v61, %v2155_v29  ;;  %v831_v12 = vadd.f32 %v4510_v44, %v4523_v57  ;;  %v2173_v29 = vrot.slane %v2171_v6, 5  ;;  %v3775_v6 = vld [vmem:[%s5007_s4 + $0x8] sm:$0xff] }
 0x12a   : > { %v2179_v61 = vrot.slane %v2177_v46, 5  ;;  %v3598_v57 = vrot.slane %v3590_v2, 9  ;;  %v836_v46 = vadd.f32 %v4544_v30, %v4561_v52  ;;  %2753 = vmatpush.bf16.msra.mxu1 %v3775_v6  ;;  %v3591_v30 = vld [vmem:[%s4144_s10 + $0x54] sm:$0xe] }
 0x12b   : > { %v1585_v62 = vpop.f32.mrf.mxu0  ;;  %v2161_v34 = vrot.slane %v2160_v32, 4  ;;  %v1076_v37 = vadd.f32 %v4528_v59, %v831_v12  ;;  %v2174_v28 = vor.u32 %v2173_v29, %v2170_v58  ;;  %v3547_v29 = vld [vmem:[%s4144_s10 + $0x5c] sm:$0x1] }
 0x12c   : > { %v2472_v59 = vsel %vm4146_vm2, %v3598_v57, %v2471_v63  ;;  %v1078_v52 = vadd.f32 %v4563_v51, %v836_v46 }
 0x12d   : > { %v2166_v38 = vsel %vm4189_vm6, %v2161_v34, %v2165_v5  ;;  %v2175_v24 = vrot.slane %v2174_v28, 4  ;;  %v2514_v36 = vunpack.c.l.b16 %v2472_v59 }
 0x12e   : > { %v1220_v4 = vpop.f32.mrf.mxu3  ;;  %3628 = vmatmul.msk.bf16.gmra.mxu0 %vm647_vm5, %v2524_v55  ;;  %v2279_v54 = vunpack.c.l.b16 %v2166_v38 }
 0x12f   : > { %v1256_v60 = vadd.f32 %v1220_v4, %v4498_v16  ;;  %v3544_v4 = vld [vmem:[%s4144_s10 + $0x50] sm:$0x1]  ;;  %v2180_v8 = vsel %vm4189_vm6, %v2175_v24, %v2179_v61  ;;  %v3549_v24 = vld [vmem:[%s4144_s10 + $0x64] sm:$0xf] }
 0x130   : > { %v2291_v7 = vpack.c.b16 %v2279_v54, %v2278_v50  ;;  %v2474_v32 = vrot.slane %v3544_v4, 5  ;;  %v2187_v13 = vshll.u32 %v3544_v4, 16 }
 0x131   : > { %v4681_v0 = vadd.f32 %v1582_v25, %v1256_v60  ;;  %v2184_v60 = vor.u32 %v2183_v1, %v2179_v61  ;;  %v2478_v1 = vrot.slane %v3546_v19, 5 }
 0x132   : > { %v2189_v31 = vrot.slane %v2187_v13, 5 }
 0x133   : > { %3580 = vmatmul.msk.bf16.gmra.mxu3 %vm647_vm5, %v2290_v10  ;;  %v1587_v20 = vpop.f32.mrf.mxu0  ;;  %v2185_v35 = vrot.slane %v2184_v60, 4  ;;  %v2480_v57 = vrot.slane %v2478_v1, 4 }
 0x135   : > { %v2190_v12 = vsel %vm4189_vm6, %v2185_v35, %v2189_v31 }
 0x136   : > { %v1223_v16 = vpop.f32.mrf.mxu3  ;;  %v2281_v4 = vunpack.c.l.b16 %v2190_v12 }
 0x137   : > { %v1257_v25 = vadd.f32 %v1223_v16, %v4507_v43  ;;  %v2525_v43 = vpack.c.b16 %v2513_v39, %v2512_v3  ;;  %v2195_v16 = vshll.u32 %v3545_v15, 16  ;;  %v2201_v3 = vshll.u32 %v3546_v19, 16 }
 0x138   : > { %v2205_v39 = vshrl.u32 %v3546_v19, 16 }
 0x139   : > { %v4697_v48 = vadd.f32 %v1585_v62, %v1257_v25  ;;  %v2473_v62 = vrot.slane %v2471_v63, 4  ;;  %v2203_v63 = vrot.slane %v2201_v3, 5  ;;  %v2216_v3 = vshrl.u32 %v3548_v23, 16 }
 0x13b   : > { %v1590_v55 = vpop.f32.mrf.mxu0  ;;  %v2475_v5 = vsel %vm4146_vm2, %v2473_v62, %v2474_v32  ;;  %v2481_v62 = vrot.slane %v3547_v29, 5 }
 0x13c   : > { %v2515_v38 = vunpack.c.l.b16 %v2475_v5 }
 0x13d   : > { %v2482_v59 = vsel %vm4146_vm2, %v2480_v57, %v2481_v62 }
 0x13e   : > { %v1225_v10 = vpop.f32.mrf.mxu3  ;;  %3629 = vmatmul.msk.bf16.gmra.mxu0 %vm647_vm5, %v2525_v43  ;;  %v2197_v43 = vrot.slane %v2195_v16, 5  ;;  %v2526_v58 = vpack.c.b16 %v2515_v38, %v2514_v36  ;;  %v2229_v36 = vshrl.u32 %v3549_v24, 16 }
 0x13f   : > { %v1258_v44 = vadd.f32 %v1225_v10, %v1076_v37  ;;  %v2280_v37 = vunpack.c.l.b16 %v2180_v8 }
 0x141   : > { %v4703_v14 = vadd.f32 %v1587_v20, %v1258_v44  ;;  %v2192_v20 = vshrl.u32 %v3545_v15, 16  ;;  %v2292_v28 = vpack.c.b16 %v2281_v4, %v2280_v37  ;;  %v3592_v37 = vld [vmem:[%s4144_s10 + $0x60] sm:$0xe] }
 0x143   : > { %3581 = vmatmul.msk.bf16.gmra.mxu3 %vm647_vm5, %v2291_v7  ;;  %v1592_v34 = vpop.f32.mrf.mxu0  ;;  %v2194_v50 = vrot.slane %v2192_v20, 4  ;;  %v2211_v7 = vshll.u32 %v3547_v29, 16  ;;  %v2517_v20 = vunpack.c.l.b16 %v2482_v59  ;;  %v3550_v29 = vld [vmem:[%s4144_s10 + $0x68] sm:$0x1] }
 0x145   : > { %v2198_v61 = vor.u32 %v2197_v43, %v2194_v50  ;;  %v2213_v19 = vrot.slane %v2211_v7, 5  ;;  %v2218_v50 = vrot.slane %v2216_v3, 4  ;;  %v2488_v7 = vrot.slane %v3550_v29, 5 }
 0x146   : > { %v1228_v25 = vpop.f32.mrf.mxu3 }
 0x147   : > { %v1259_v40 = vadd.f32 %v1228_v25, %v4541_v26  ;;  %v2207_v26 = vrot.slane %v2205_v39, 4  ;;  %v2199_v13 = vrot.slane %v2198_v61, 4  ;;  %v2219_v39 = vshll.u32 %v3548_v23, 16 }
 0x148   : > { %v2225_v25 = vshll.u32 %v3549_v24, 16  ;;  %v3600_v61 = vrot.slane %v3592_v37, 9  ;;  %v3553_v37 = vld [vmem:[%s4144_s10 + $0x74] sm:$0x1] }
 0x149   : > { %v4725_v54 = vadd.f32 %v1590_v55, %v1259_v40  ;;  %v2208_v10 = vor.u32 %v2207_v26, %v2203_v63  ;;  %v3599_v55 = vrot.slane %v3591_v30, 9  ;;  %v2204_v35 = vsel %vm4189_vm6, %v2199_v13, %v2203_v63 }
 0x14a   : > { %v841_v40 = vadd.f32 %v4584_v33, %v4591_v41  ;;  %v2282_v46 = vunpack.c.l.b16 %v2204_v35  ;;  %v2221_v43 = vrot.slane %v2219_v39, 5  ;;  %v2227_v63 = vrot.slane %v2225_v25, 5 }
 0x14b   : > { %v1595_v2 = vpop.f32.mrf.mxu0  ;;  %v2209_v15 = vrot.slane %v2208_v10, 4  ;;  %v2479_v51 = vsel %vm4146_vm2, %v3599_v55, %v2478_v1  ;;  %v2231_v26 = vrot.slane %v2229_v36, 4  ;;  %v2485_v1 = vrot.slane %v3549_v24, 5 }
 0x14c   : > { %v2516_v31 = vunpack.c.l.b16 %v2479_v51  ;;  %v1080_v4 = vadd.f32 %v4595_v47, %v841_v40  ;;  %v2222_v33 = vor.u32 %v2221_v43, %v2218_v50  ;;  %v845_v51 = vpop.f32.mrf.mxu1 }
 0x14d   : > { %v2232_v41 = vor.u32 %v2231_v26, %v2227_v63  ;;  %v2487_v10 = vrot.slane %v2485_v1, 4 }
 0x14e   : > { %v1230_v44 = vpop.f32.mrf.mxu3  ;;  %3630 = vmatmul.msk.bf16.gmra.mxu0 %vm647_vm5, %v2526_v58  ;;  %v2527_v12 = vpack.c.b16 %v2517_v20, %v2516_v31  ;;  %v2223_v57 = vrot.slane %v2222_v33, 4  ;;  %v3774_v31 = vld [vmem:[%s5007_s4] sm:$0xff] }
 0x14f   : > { %v1260_v32 = vadd.f32 %v1230_v44, %v1078_v52  ;;  %v1058_v44 = vpop.f32.mrf.mxu2  ;;  %v2233_v62 = vrot.slane %v2232_v41, 4  ;;  %v2489_v13 = vsel %vm4146_vm2, %v2487_v10, %v2488_v7  ;;  %2754 = vmatpush.bf16.msra.mxu1 %v3774_v31  ;;  %v2495_v41 = vrot.slane %v3553_v37, 5 }
 0x150   : > { %v2519_v23 = vunpack.c.l.b16 %v2489_v13  ;;  %v2228_v35 = vsel %vm4189_vm6, %v2223_v57, %v2227_v63 }
 0x151   : > { %v4731_v60 = vadd.f32 %v1592_v34, %v1260_v32  ;;  %v2214_v34 = vsel %vm4189_vm6, %v2209_v15, %v2213_v19  ;;  %v3551_v15 = vld [vmem:[%s4144_s10 + $0x6c] sm:$0xf]  ;;  %v3552_v19 = vld [vmem:[%s4144_s10 + $0x70] sm:$0xf] }
 0x152   : > { %v2283_v8 = vunpack.c.l.b16 %v2214_v34  ;;  %v2243_v3 = vshll.u32 %v3551_v15, 16  ;;  %v2249_v39 = vshll.u32 %v3552_v19, 16  ;;  %v2253_v25 = vshrl.u32 %v3552_v19, 16 }
 0x153   : > { %3582 = vmatmul.msk.bf16.gmra.mxu3 %vm647_vm5, %v2292_v28  ;;  %v1597_v5 = vpop.f32.mrf.mxu0  ;;  %v2486_v28 = vsel %vm4146_vm2, %v3600_v61, %v2485_v1  ;;  %v2259_v61 = vshll.u32 %v3553_v37, 16 }
 0x154   : > { %v2293_v30 = vpack.c.b16 %v2283_v8, %v2282_v46  ;;  %v2245_v43 = vrot.slane %v2243_v3, 5  ;;  %v2251_v63 = vrot.slane %v2249_v39, 5  ;;  %v2255_v26 = vrot.slane %v2253_v25, 4 }
 0x155   : > { %v2261_v13 = vrot.slane %v2259_v61, 5 }
 0x156   : > { %v1233_v16 = vpop.f32.mrf.mxu3 }
 0x157   : > { %v1261_v38 = vadd.f32 %v1233_v16, %v4573_v21  ;;  %v4775_v20 = vpop.f32.mrf.mxu2  ;;  %v2240_v16 = vshrl.u32 %v3551_v15, 16 }
 0x159   : > { %v4747_v6 = vadd.f32 %v1595_v2, %v1261_v38  ;;  %v2235_v2 = vshll.u32 %v3550_v29, 16  ;;  %v2284_v38 = vunpack.c.l.b16 %v2228_v35  ;;  %v2242_v50 = vrot.slane %v2240_v16, 4  ;;  %v3593_v29 = vld [vmem:[%s4144_s10 + $0x6c] sm:$0xe]  ;;  %s3130_s10 = sshll.u32 %s353_s26, 2  ;;  %s4893_s26 = scalar_lea.vmem [#allocation2], %s3125_s15 }
 0x15a   : > { %s4796_s20 = scalar_lea.vmem %s5004_s1, %s3130_s10  ;;  %s3788_s10 = sshll.u32 %s3956_s30, 4 }
 0x15b   : > { %v1600_v58 = vpop.f32.mrf.mxu0  ;;  %v2237_v32 = vrot.slane %v2235_v2, 5  ;;  %v2246_v2 = vor.u32 %v2245_v43, %v2242_v50  ;;  %v3779_v50 = vld [vmem:[%s4796_s20 + $0x8] sm:$0xff]  ;;  %s3007_s17 = sadd.s32 %s3788_s10, %s3709_s24  ;;  %s3010_s9 = sshll.u32 %s4893_s26, 4  ;;  %s3011_s9 = int_to_ptr.vmem [resolvable:$true] %s3010_s9 }
 0x15c   : > { %s3898_s24 = scalar_lea.hbm %s5011_s8, 512 }
 0x15d   : > { %v2238_v34 = vsel %vm4189_vm6, %v2233_v62, %v2237_v32  ;;  %v2247_v32 = vrot.slane %v2246_v2, 4 }
 0x15e   : > { %v1235_v21 = vpop.f32.mrf.mxu3  ;;  %3631 = vmatmul.msk.bf16.gmra.mxu0 %vm647_vm5, %v2527_v12  ;;  %v2285_v40 = vunpack.c.l.b16 %v2238_v34  ;;  %v2492_v12 = vrot.slane %v3552_v19, 5 }
 0x15f   : > { %v1262_v52 = vadd.f32 %v1235_v21, %v1080_v4  ;;  %v1809_v4 = vpop.f32.mrf.mxu1  ;;  %v1993_v7 = vpop.f32.mrf.mxu2 }
 0x160   : > { %v2494_v33 = vrot.slane %v2492_v12, 4  ;;  %v1849_v37 = vadd.f32 %v1809_v4, %v4652_v53 }
 0x161   : > { %v4753_v55 = vadd.f32 %v1597_v5, %v1262_v52  ;;  %v2518_v5 = vunpack.c.l.b16 %v2486_v28  ;;  %v2256_v52 = vor.u32 %v2255_v26, %v2251_v63 }
 0x162   : > { %v2496_v62 = vsel %vm4146_vm2, %v2494_v33, %v2495_v41  ;;  %v3780_v41 = vld [vmem:[%s4796_s20 + $0x10] sm:$0xff] }
 0x163   : > { %3583 = vmatmul.msk.bf16.gmra.mxu3 %vm647_vm5, %v2293_v30  ;;  %v1602_v47 = vpop.f32.mrf.mxu0  ;;  %v2528_v46 = vpack.c.b16 %v2519_v23, %v2518_v5  ;;  %v3601_v30 = vrot.slane %v3593_v29, 9  ;;  %v2257_v28 = vrot.slane %v2256_v52, 4 }
 0x165   : > { %v2493_v57 = vsel %vm4146_vm2, %v3601_v30, %v2492_v12  ;;  %v2262_v9 = vsel %vm4189_vm6, %v2257_v28, %v2261_v13 }
 0x166   : > { %v1238_v59 = vpop.f32.mrf.mxu3  ;;  %v2520_v19 = vunpack.c.l.b16 %v2493_v57  ;;  %v2287_v16 = vunpack.c.l.b16 %v2262_v9 }
 0x167   : > { %v1263_v24 = vadd.f32 %v1238_v59, %v4605_v27  ;;  %v846_v27 = vadd.f32 %v845_v51, %v4613_v22  ;;  %v2521_v51 = vunpack.c.l.b16 %v2496_v62  ;;  %v2252_v59 = vsel %vm4189_vm6, %v2247_v32, %v2251_v63  ;;  %v1811_v5 = vpop.f32.mrf.mxu1  ;;  %v1996_v3 = vpop.f32.mrf.mxu2 }
 0x168   : > { %v2286_v31 = vunpack.c.l.b16 %v2252_v59  ;;  %v1850_v30 = vadd.f32 %v1811_v5, %v4658_v18  ;;  %v3781_v5 = vld [vmem:[%s4796_s20 + $0x18] sm:$0xff] }
 0x169   : > { %v4778_v36 = vadd.f32 %v1600_v58, %v1263_v24  ;;  %v1082_v1 = vadd.f32 %v1058_v44, %v846_v27  ;;  %v2294_v58 = vpack.c.b16 %v2285_v40, %v2284_v38  ;;  %v3778_v24 = vld [vmem:[%s4796_s20] sm:$0xff]  ;;  %v2529_v35 = vpack.c.b16 %v2521_v51, %v2520_v19 }
 0x16a   : > { %3698 = vmatmul.msk.bf16.vlgmr.msra.gmra.mxu2 %vm2872_vm7, %v3778_v24  ;;  %v2295_v45 = vpack.c.b16 %v2287_v16, %v2286_v31  ;;  %v2032_v61 = vadd.f32 %v1993_v7, %v1850_v30 }
 0x16b   : > { %v1605_v8 = vpop.f32.mrf.mxu0 }
 0x16e   : > { %v1240_v22 = vpop.f32.mrf.mxu3  ;;  %3632 = vmatmul.msk.bf16.gmra.mxu0 %vm647_vm5, %v2528_v46 }
 0x16f   : > { %v1264_v21 = vadd.f32 %v1240_v22, %v1082_v1  ;;  %v1814_v27 = vpop.f32.mrf.mxu1  ;;  %v1998_v40 = vpop.f32.mrf.mxu2 }
 0x170   : > { %v1851_v62 = vadd.f32 %v1814_v27, %v4675_v49 }
 0x171   : > { %v4786_v10 = vadd.f32 %v1602_v47, %v1264_v21 }
 0x172   : > { %v2033_v51 = vadd.f32 %v1996_v3, %v1851_v62 }
 0x173   : > { %3584 = vmatmul.msk.bf16.gmra.mxu3 %vm647_vm5, %v2294_v58  ;;  %v1607_v44 = vpop.f32.mrf.mxu0 }
 0x176   : > { %v1243_v15 = vpop.f32.mrf.mxu3 }
 0x177   : > { %v1265_v47 = vadd.f32 %v1243_v15, %v4599_v56  ;;  %v1816_v63 = vpop.f32.mrf.mxu1  ;;  %v2001_v29 = vpop.f32.mrf.mxu2 }
 0x178   : > { %v1852_v59 = vadd.f32 %v1816_v63, %v4681_v0 }
 0x179   : > { %v4803_v23 = vadd.f32 %v1605_v8, %v1265_v47 }
 0x17a   : > { %3699 = vmatmul.msk.bf16.gmra.mxu2 %vm2872_vm7, %v3779_v50  ;;  %v2034_v49 = vadd.f32 %v1998_v40, %v1852_v59 }
 0x17b   : > { %v1610_v34 = vpop.f32.mrf.mxu0 }
 0x17e   : > { %v1245_v56 = vpop.f32.mrf.mxu3  ;;  %3633 = vmatmul.msk.bf16.gmra.mxu0 %vm647_vm5, %v2529_v35 }
 0x17f   : > { %v1266_v39 = vadd.f32 %v1245_v56, %v4609_v17  ;;  %v1819_v21 = vpop.f32.mrf.mxu1  ;;  %v2003_v2 = vpop.f32.mrf.mxu2 }
 0x181   : > { %v4809_v25 = vadd.f32 %v1607_v44, %v1266_v39  ;;  %v4828_v44 = vld [vmem:[%s5006_s3] ss:$0 sm:$0xff] }
 0x183   : > { %3585 = vmatmul.msk.bf16.gmra.mxu3 %vm647_vm5, %v2295_v45  ;;  %v1612_v38 = vpop.f32.mrf.mxu0  ;;  %v1853_v45 = vadd.f32 %v1819_v21, %v4697_v48 }
 0x186   : > { %v1248_v46 = vpop.f32.mrf.mxu3 }
 0x187   : > { %v1267_v8 = vadd.f32 %v1248_v46, %v4625_v42  ;;  %v2031_v42 = vadd.f32 %v4775_v20, %v1849_v37  ;;  %v1821_v20 = vpop.f32.mrf.mxu1  ;;  %v2006_v13 = vpop.f32.mrf.mxu2  ;;  %v3782_v37 = vld [vmem:[%s4796_s20 + $0x20] sm:$0xff] }
 0x189   : > { %v4813_v12 = vadd.f32 %v1610_v34, %v1267_v8 }
 0x18a   : > { %3700 = vmatmul.msk.bf16.gmra.mxu2 %vm2872_vm7, %v3780_v41 }
 0x18b   : > { %v2587_v43 = vpop.f32.mrf.mxu0 }
 0x18e   : > { %v1250_v17 = vpop.f32.mrf.mxu3 }
 0x18f   : > { %v1268_v26 = vadd.f32 %v1250_v17, %v4638_v11  ;;  %v1824_v24 = vpop.f32.mrf.mxu1  ;;  %v2008_v31 = vpop.f32.mrf.mxu2  ;;  %v1854_v17 = vadd.f32 %v1821_v20, %v4703_v14 }
 0x191   : > { %v4818_v1 = vadd.f32 %v1612_v38, %v1268_v26  ;;  %v2036_v48 = vadd.f32 %v2003_v2, %v1854_v17 }
 0x193   : > { %v2589_v22 = vpop.f32.mrf.mxu0 }
 0x196   : > { %v2353_v58 = vpop.f32.mrf.mxu3 }
 0x197   : > { %v2393_v33 = vadd.f32 %v2353_v58, %v2031_v42  ;;  %v1826_v38 = vpop.f32.mrf.mxu1  ;;  %v2011_v40 = vpop.f32.mrf.mxu2 }
 0x198   : > { %v1856_v2 = vadd.f32 %v1826_v38, %v4731_v60 }
 0x199   : > { %v2627_v11 = vadd.f32 %v2587_v43, %v2393_v33  ;;  %v2035_v43 = vadd.f32 %v2001_v29, %v1853_v45 }
 0x19a   : > { %3701 = vmatmul.msk.bf16.gmra.mxu2 %vm2872_vm7, %v3781_v5 }
 0x19b   : > { %v2592_v52 = vpop.f32.mrf.mxu0  ;;  %v2647_v57 = vadd.f32 %v4828_v44, %v2627_v11 }
 0x19d   : > { %v2663_v7 = vmax.f32 %v2647_v57, 0.0 }
 0x19e   : > { %v2355_v53 = vpop.f32.mrf.mxu3 }
 0x19f   : > { %v2394_v4 = vadd.f32 %v2355_v53, %v2032_v61  ;;  %v1829_v21 = vpop.f32.mrf.mxu1  ;;  %v2013_v41 = vpop.f32.mrf.mxu2 }
 0x1a0   : > { %v1857_v59 = vadd.f32 %v1829_v21, %v4747_v6 }
 0x1a1   : > { %v2628_v18 = vadd.f32 %v2589_v22, %v2394_v4 }
 0x1a3   : > { %v2648_v32 = vadd.f32 %v4828_v44, %v2628_v18  ;;  %v2594_v28 = vpop.f32.mrf.mxu0 }
 0x1a5   : > { %v2664_v15 = vmax.f32 %v2648_v32, 0.0  ;;  %v3783_v32 = vld [vmem:[%s4796_s20 + $0x28] sm:$0xff] }
 0x1a6   : > { %v2358_v19 = vpop.f32.mrf.mxu3 }
 0x1a7   : > { %v2679_v47 = vpack.c.bf16 %v2664_v15, %v2663_v7  ;;  %v2395_v9 = vadd.f32 %v2358_v19, %v2033_v51  ;;  %v1831_v18 = vpop.f32.mrf.mxu1  ;;  %v2016_v7 = vpop.f32.mrf.mxu2 }
 0x1a9   : > { %3650 = vmatmul.msk.bf16.vlgmr.msra.gmra.mxu1 %vm647_vm5, %v2679_v47  ;;  %v2629_v34 = vadd.f32 %v2592_v52, %v2395_v9  ;;  %v1855_v52 = vadd.f32 %v1824_v24, %v4725_v54  ;;  %v2038_v54 = vadd.f32 %v2008_v31, %v1856_v2  ;;  %v1858_v31 = vadd.f32 %v1831_v18, %v4753_v55 }
 0x1aa   : > { %3702 = vmatmul.msk.bf16.gmra.mxu2 %vm2872_vm7, %v3782_v37 }
 0x1ab   : > { %v2597_v35 = vpop.f32.mrf.mxu0  ;;  %v2649_v39 = vadd.f32 %v4828_v44, %v2629_v34  ;;  %v2037_v20 = vadd.f32 %v2006_v13, %v1855_v52  ;;  %v2040_v45 = vadd.f32 %v2013_v41, %v1858_v31 }
 0x1ad   : > { %v2665_v46 = vmax.f32 %v2649_v39, 0.0 }
 0x1ae   : > { %v2360_v16 = vpop.f32.mrf.mxu3 }
 0x1af   : > { %v2396_v56 = vadd.f32 %v2360_v16, %v2034_v49  ;;  %v1834_v60 = vpop.f32.mrf.mxu1  ;;  %v2018_v49 = vpop.f32.mrf.mxu2  ;;  %v2039_v16 = vadd.f32 %v2011_v40, %v1857_v59 }
 0x1b1   : > { %v2630_v3 = vadd.f32 %v2594_v28, %v2396_v56 }
 0x1b3   : > { %v2650_v0 = vadd.f32 %v4828_v44, %v2630_v3  ;;  %v2599_v27 = vpop.f32.mrf.mxu0  ;;  %v3784_v3 = vld [vmem:[%s4796_s20 + $0x30] sm:$0xff] }
 0x1b5   : > { %v2666_v8 = vmax.f32 %v2650_v0, 0.0 }
 0x1b6   : > { %v2363_v50 = vpop.f32.mrf.mxu3 }
 0x1b7   : > { %v2680_v63 = vpack.c.bf16 %v2666_v8, %v2665_v46  ;;  %v2397_v26 = vadd.f32 %v2363_v50, %v2035_v43  ;;  %v1836_v6 = vpop.f32.mrf.mxu1  ;;  %v2021_v8 = vpop.f32.mrf.mxu2 }
 0x1b9   : > { %3651 = vmatmul.msk.bf16.gmra.mxu1 %vm647_vm5, %v2680_v63  ;;  %v2631_v58 = vadd.f32 %v2597_v35, %v2397_v26  ;;  %v1859_v63 = vadd.f32 %v1834_v60, %v4778_v36 }
 0x1ba   : > { %3703 = vmatmul.msk.bf16.gmra.mxu2 %vm2872_vm7, %v3783_v32 }
 0x1bb   : > { %v2602_v22 = vpop.f32.mrf.mxu0  ;;  %v2651_v33 = vadd.f32 %v4828_v44, %v2631_v58  ;;  %v2041_v37 = vadd.f32 %v2016_v7, %v1859_v63 }
 0x1bd   : > { %v2667_v11 = vmax.f32 %v2651_v33, 0.0 }
 0x1be   : > { %v2365_v42 = vpop.f32.mrf.mxu3 }
 0x1bf   : > { %v2398_v30 = vadd.f32 %v2365_v42, %v2036_v48  ;;  %v1860_v42 = vadd.f32 %v1836_v6, %v4786_v10  ;;  %v2023_v33 = vpop.f32.mrf.mxu2 }
 0x1c1   : > { %v2632_v29 = vadd.f32 %v2599_v27, %v2398_v30  ;;  %v3785_v30 = vld [vmem:[%s4796_s20 + $0x38] sm:$0xff]  ;;  %s3710_s20 = sshll.u32 %s3007_s17, 3 }
 0x1c2   : > { %s3009_s30 = scalar_lea.hbm %s5011_s8, %s3710_s20 }
 0x1c3   : > { %v2652_v14 = vadd.f32 %v4828_v44, %v2632_v29  ;;  %v2604_v61 = vpop.f32.mrf.mxu0  ;;  %v2042_v29 = vadd.f32 %v2018_v49, %v1860_v42  ;;  %s3012_s16 = sshll.u32 %s3009_s30, 4  ;;  %s3013_s16 = int_to_ptr.hbm [resolvable:$true] %s3012_s16 }
 0x1c4   : > { %s3892_s13 = sshra.s32 %s3013_s16, 4  ;;  %s3893_s13 = int_to_ptr.hbm [resolvable:$true] %s3892_s13 }
 0x1c5   : > { %v2668_v53 = vmax.f32 %v2652_v14, 0.0  ;;  %s3894_s14 = scalar_lea.hbm %s3893_s13, 128  ;;  %p3899_p4 = scmp.lt.s32.totalorder %s3893_s13, %s5011_s8 }
 0x1c6   : > { %v2368_v4 = vpop.f32.mrf.mxu3  ;;  %p3895_p0 = scmp.ne.s32.totalorder %s3893_s13, %s3894_s14  ;;  %p3900_p5 = scmp.lt.s32.totalorder %s3898_s24, %s3894_s14 }
 0x1c7   : > { %v2681_v57 = vpack.c.bf16 %v2668_v53, %v2667_v11  ;;  %v2399_v62 = vadd.f32 %v2368_v4, %v2037_v20  ;;  %v2026_v20 = vpop.f32.mrf.mxu2 }
 0x1c8   : > { %p3896_p1 = pnand %p3895_p0, %p4072_p3  ;;  %p3901_p6 = por %p3900_p5, %p3899_p4 }
 0x1c9   : > { %3652 = vmatmul.msk.bf16.gmra.mxu1 %vm647_vm5, %v2681_v57  ;;  %v2633_v15 = vadd.f32 %v2602_v22, %v2399_v62  ;;  %v1839_v22 = vpop.f32.mrf.mxu1 }
 0x1ca   : > { %3704 = vmatmul.msk.bf16.gmra.mxu2 %vm2872_vm7, %v3784_v3  ;;  %v1861_v4 = vadd.f32 %v1839_v22, %v4803_v23  ;;  %p3897_p2 = pneg %p3896_p1 }
 0x1cb   : > { %v2607_v28 = vpop.f32.mrf.mxu0  ;;  %v2653_v47 = vadd.f32 %v4828_v44, %v2633_v15 }
 0x1cc   : > { %v2043_v62 = vadd.f32 %v2021_v8, %v1861_v4  ;;  %p3902_p7 = pnand %p3901_p6, %p3897_p2 }
 0x1cd   : > { %v2669_v24 = vmax.f32 %v2653_v47, 0.0 }
 0x1ce   : > { %v2370_v19 = vpop.f32.mrf.mxu3 }
 0x1cf   : > { %v2400_v51 = vadd.f32 %v2370_v19, %v2038_v54  ;;  %v2028_v47 = vpop.f32.mrf.mxu2 }
 0x1d1   : > { %v2634_v13 = vadd.f32 %v2604_v61, %v2400_v51  ;;  %v1841_v14 = vpop.f32.mrf.mxu1 }
 0x1d3   : > { %v2654_v9 = vadd.f32 %v4828_v44, %v2634_v13  ;;  %v2609_v5 = vpop.f32.mrf.mxu0 }
 0x1d5   : > { %v2670_v35 = vmax.f32 %v2654_v9, 0.0 }
 0x1d6   : > { %v2373_v34 = vpop.f32.mrf.mxu3 }
 0x1d7   : > { %v2682_v56 = vpack.c.bf16 %v2670_v35, %v2669_v24  ;;  %v2401_v39 = vadd.f32 %v2373_v34, %v2039_v16 }
 0x1d9   : > { %3653 = vmatmul.msk.bf16.gmra.mxu1 %vm647_vm5, %v2682_v56  ;;  %v2635_v0 = vadd.f32 %v2607_v28, %v2401_v39  ;;  %v1862_v28 = vadd.f32 %v1841_v14, %v4809_v25  ;;  %v1844_v54 = vpop.f32.mrf.mxu1 }
 0x1da   : > { %3705 = vmatmul.msk.bf16.gmra.mxu2 %vm2872_vm7, %v3785_v30  ;;  %v1863_v9 = vadd.f32 %v1844_v54, %v4813_v12 }
 0x1db   : > { %v2612_v27 = vpop.f32.mrf.mxu0  ;;  %v2655_v50 = vadd.f32 %v4828_v44, %v2635_v0  ;;  %v2044_v19 = vadd.f32 %v2023_v33, %v1862_v28 }
 0x1dc   : > { %v2045_v56 = vadd.f32 %v2026_v20, %v1863_v9 }
 0x1dd   : > { %v2671_v40 = vmax.f32 %v2655_v50, 0.0 }
 0x1de   : > { %v2375_v38 = vpop.f32.mrf.mxu3 }
 0x1df   : > { %v2402_v46 = vadd.f32 %v2375_v38, %v2040_v45 }
 0x1e1   : > { %v2636_v43 = vadd.f32 %v2609_v5, %v2402_v46  ;;  %v1846_v24 = vpop.f32.mrf.mxu1 }
 0x1e2   : > { %v1864_v39 = vadd.f32 %v1846_v24, %v4818_v1 }
 0x1e3   : > { %v2656_v55 = vadd.f32 %v4828_v44, %v2636_v43  ;;  %v2614_v58 = vpop.f32.mrf.mxu0 }
 0x1e4   : > { %v2046_v45 = vadd.f32 %v2028_v47, %v1864_v39 }
 0x1e5   : > { %v2672_v17 = vmax.f32 %v2656_v55, 0.0 }
 0x1e6   : > { %v2378_v26 = vpop.f32.mrf.mxu3 }
 0x1e7   : > { %v2683_v48 = vpack.c.bf16 %v2672_v17, %v2671_v40  ;;  %v2403_v21 = vadd.f32 %v2378_v26, %v2041_v37  ;;  %v4881_v40 = vld [vmem:[%s5010_s7] ss:$0 sm:$0xff] }
 0x1e8   : > { %v4886_v17 = vld [vmem:[%s5008_s5] ss:$0 sm:$0xff] }
 0x1e9   : > { %3654 = vmatmul.msk.bf16.gmra.mxu1 %vm647_vm5, %v2683_v48  ;;  %v2637_v36 = vadd.f32 %v2612_v27, %v2403_v21 }
 0x1eb   : > { %v2657_v61 = vadd.f32 %v4828_v44, %v2637_v36  ;;  %v2617_v53 = vpop.f32.mrf.mxu0 }
 0x1ed   : > { %v2673_v57 = vmax.f32 %v2657_v61, 0.0  ;;  %v2906_v16 = vpop.f32.mrf.mxu2 }
 0x1ee   : > { %v2380_v41 = vpop.f32.mrf.mxu3 }
 0x1ef   : > { %v2404_v52 = vadd.f32 %v2380_v41, %v2042_v29 }
 0x1f1   : > { %v2638_v11 = vadd.f32 %v2614_v58, %v2404_v52 }
 0x1f3   : > { %v2658_v10 = vadd.f32 %v4828_v44, %v2638_v11  ;;  %v2619_v15 = vpop.f32.mrf.mxu0 }
 0x1f5   : > { %v2674_v2 = vmax.f32 %v2658_v10, 0.0  ;;  %v2908_v38 = vpop.f32.mrf.mxu2 }
 0x1f6   : > { %v2383_v18 = vpop.f32.mrf.mxu3  ;;  %v2909_v30 = vadd.f32 %v4881_v40, %v2908_v38 }
 0x1f7   : > { %v2684_v32 = vpack.c.bf16 %v2674_v2, %v2673_v57  ;;  %v2405_v7 = vadd.f32 %v2383_v18, %v2043_v62 }
 0x1f9   : > { %3655 = vmatmul.msk.bf16.gmra.mxu1 %vm647_vm5, %v2684_v32  ;;  %v2639_v51 = vadd.f32 %v2617_v53, %v2405_v7 }
 0x1fb   : > { %v2659_v59 = vadd.f32 %v4828_v44, %v2639_v51  ;;  %v2622_v49 = vpop.f32.mrf.mxu0 }
 0x1fd   : > { %v2675_v35 = vmax.f32 %v2659_v59, 0.0  ;;  %v2911_v1 = vpop.f32.mrf.mxu2 }
 0x1fe   : > { %v2385_v13 = vpop.f32.mrf.mxu3  ;;  %v2912_v41 = vadd.f32 %v4881_v40, %v2911_v1 }
 0x1ff   : > { %v2406_v23 = vadd.f32 %v2385_v13, %v2044_v19 }
 0x201   : > { %v2640_v60 = vadd.f32 %v2619_v15, %v2406_v23 }
 0x203   : > { %v2660_v5 = vadd.f32 %v4828_v44, %v2640_v60  ;;  %v2624_v27 = vpop.f32.mrf.mxu0 }
 0x205   : > { %v2676_v25 = vmax.f32 %v2660_v5, 0.0  ;;  %v2913_v26 = vpop.f32.mrf.mxu2 }
 0x206   : > { %v2388_v34 = vpop.f32.mrf.mxu3  ;;  %v2914_v10 = vadd.f32 %v4881_v40, %v2913_v26 }
 0x207   : > { %v2685_v31 = vpack.c.bf16 %v2676_v25, %v2675_v35  ;;  %v2407_v3 = vadd.f32 %v2388_v34, %v2045_v56 }
 0x209   : > { %3656 = vmatmul.msk.bf16.gmra.mxu1 %vm647_vm5, %v2685_v31  ;;  %v2641_v6 = vadd.f32 %v2622_v49, %v2407_v3 }
 0x20b   : > { %v2661_v46 = vadd.f32 %v4828_v44, %v2641_v6 }
 0x20d   : > { %v2677_v43 = vmax.f32 %v2661_v46, 0.0  ;;  %v2916_v21 = vpop.f32.mrf.mxu2 }
 0x20e   : > { %v2390_v0 = vpop.f32.mrf.mxu3  ;;  %v2917_v62 = vadd.f32 %v4881_v40, %v2916_v21 }
 0x20f   : > { %v2408_v12 = vadd.f32 %v2390_v0, %v2046_v45 }
 0x211   : > { %v2642_v8 = vadd.f32 %v2624_v27, %v2408_v12 }
 0x213   : > { %v2662_v50 = vadd.f32 %v4828_v44, %v2642_v8  ;;  %v2907_v44 = vadd.f32 %v4881_v40, %v2906_v16 }
 0x215   : > { %v2678_v63 = vmax.f32 %v2662_v50, 0.0  ;;  %v2918_v61 = vpop.f32.mrf.mxu2 }
 0x216   : > { %v2919_v51 = vadd.f32 %v4881_v40, %v2918_v61 }
 0x217   : > { %v2686_v55 = vpack.c.bf16 %v2678_v63, %v2677_v43 }
 0x219   : > { %3657 = vmatmul.msk.bf16.gmra.mxu1 %vm647_vm5, %v2686_v55 }
 0x21d   : > { %v2921_v2 = vpop.f32.mrf.mxu2 }
 0x21e   : > { %v2922_v59 = vadd.f32 %v4881_v40, %v2921_v2 }
 0x225   : > { %v2923_v15 = vpop.f32.mrf.mxu2 }
 0x226   : > { %v2756_v37 = vpop.f32.mrf.mxu1  ;;  %v2924_v49 = vadd.f32 %v4881_v40, %v2923_v15 }
 0x227   : > { %v2757_v22 = vadd.f32 %v4886_v17, %v2756_v37 }
 0x229   : > { %v2946_v48 = vadd.f32 %v2907_v44, %v2757_v22 }
 0x22b   : > { %v2962_v58 = vmax.f32 %v2946_v48, 0.0 }
 0x22d   : > { %2978 = vst.msk [vmem:[%s4893_s26] sm:$0xff] %vm647_vm5, %v2962_v58  ;;  %v2926_v9 = vpop.f32.mrf.mxu2 }
 0x22e   : > { %v2758_v42 = vpop.f32.mrf.mxu1  ;;  %v2927_v39 = vadd.f32 %v4881_v40, %v2926_v9 }
 0x22f   : > { %v2759_v33 = vadd.f32 %v4886_v17, %v2758_v42 }
 0x231   : > { %v2947_v29 = vadd.f32 %v2909_v30, %v2759_v33 }
 0x233   : > { %v2963_v36 = vmax.f32 %v2947_v29, 0.0 }
 0x235   : > { %2979 = vst.msk [vmem:[%s4893_s26 + $0x8] sm:$0xff] %vm647_vm5, %v2963_v36  ;;  %v2928_v16 = vpop.f32.mrf.mxu2 }
 0x236   : > { %v2761_v52 = vpop.f32.mrf.mxu1  ;;  %v2929_v38 = vadd.f32 %v4881_v40, %v2928_v16 }
 0x237   : > { %v2762_v14 = vadd.f32 %v4886_v17, %v2761_v52 }
 0x239   : > { %v2948_v11 = vadd.f32 %v2912_v41, %v2762_v14 }
 0x23b   : > { %v2964_v53 = vmax.f32 %v2948_v11, 0.0 }
 0x23d   : > { %2980 = vst.msk [vmem:[%s4893_s26 + $0x10] sm:$0xff] %vm647_vm5, %v2964_v53  ;;  %v2931_v0 = vpop.f32.mrf.mxu2 }
 0x23e   : > { %v2763_v4 = vpop.f32.mrf.mxu1  ;;  %v2932_v63 = vadd.f32 %v4881_v40, %v2931_v0 }
 0x23f   : > { %v2764_v20 = vadd.f32 %v4886_v17, %v2763_v4 }
 0x241   : > { %v2949_v57 = vadd.f32 %v2914_v10, %v2764_v20 }
 0x243   : > { %v2965_v18 = vmax.f32 %v2949_v57, 0.0 }
 0x245   : > { %2981 = vst.msk [vmem:[%s4893_s26 + $0x18] sm:$0xff] %vm647_vm5, %v2965_v18  ;;  %v2933_v43 = vpop.f32.mrf.mxu2 }
 0x246   : > { %v2766_v32 = vpop.f32.mrf.mxu1  ;;  %v2934_v48 = vadd.f32 %v4881_v40, %v2933_v43 }
 0x247   : > { %v2767_v28 = vadd.f32 %v4886_v17, %v2766_v32 }
 0x249   : > { %v2950_v7 = vadd.f32 %v2917_v62, %v2767_v28 }
 0x24b   : > { %v2966_v54 = vmax.f32 %v2950_v7, 0.0 }
 0x24d   : > { %2982 = vst.msk [vmem:[%s4893_s26 + $0x20] sm:$0xff] %vm647_vm5, %v2966_v54  ;;  %v2936_v22 = vpop.f32.mrf.mxu2 }
 0x24e   : > { %v2768_v19 = vpop.f32.mrf.mxu1  ;;  %v2937_v30 = vadd.f32 %v4881_v40, %v2936_v22 }
 0x24f   : > { %v2769_v47 = vadd.f32 %v4886_v17, %v2768_v19 }
 0x251   : > { %v2951_v13 = vadd.f32 %v2919_v51, %v2769_v47 }
 0x253   : > { %v2967_v23 = vmax.f32 %v2951_v13, 0.0 }
 0x255   : > { %2983 = vst.msk [vmem:[%s4893_s26 + $0x28] sm:$0xff] %vm647_vm5, %v2967_v23  ;;  %v2938_v36 = vpop.f32.mrf.mxu2 }
 0x256   : > { %v2771_v60 = vpop.f32.mrf.mxu1  ;;  %v2939_v61 = vadd.f32 %v4881_v40, %v2938_v36 }
 0x257   : > { %v2772_v5 = vadd.f32 %v4886_v17, %v2771_v60 }
 0x259   : > { %v2952_v24 = vadd.f32 %v2922_v59, %v2772_v5 }
 0x25b   : > { %v2968_v35 = vmax.f32 %v2952_v24, 0.0 }
 0x25d   : > { %2984 = vst.msk [vmem:[%s4893_s26 + $0x30] sm:$0xff] %vm647_vm5, %v2968_v35  ;;  %v2941_v4 = vpop.f32.mrf.mxu2 }
 0x25e   : > { %v2773_v25 = vpop.f32.mrf.mxu1  ;;  %v2942_v20 = vadd.f32 %v4881_v40, %v2941_v4 }
 0x25f   : > { %v2774_v34 = vadd.f32 %v4886_v17, %v2773_v25 }
 0x261   : > { %v2953_v56 = vadd.f32 %v2924_v49, %v2774_v34 }
 0x263   : > { %v2969_v31 = vmax.f32 %v2953_v56, 0.0 }
 0x265   : > { %2985 = vst.msk [vmem:[%s4893_s26 + $0x38] sm:$0xff] %vm647_vm5, %v2969_v31  ;;  %v2943_v32 = vpop.f32.mrf.mxu2 }
 0x266   : > { %v2776_v3 = vpop.f32.mrf.mxu1  ;;  %v2944_v7 = vadd.f32 %v4881_v40, %v2943_v32 }
 0x267   : > { %v2777_v45 = vadd.f32 %v4886_v17, %v2776_v3 }
 0x269   : > { %v2954_v6 = vadd.f32 %v2927_v39, %v2777_v45 }
 0x26b   : > { %v2970_v12 = vmax.f32 %v2954_v6, 0.0 }
 0x26d   : > { %2986 = vst.msk [vmem:[%s4893_s26 + $0x40] sm:$0xff] %vm647_vm5, %v2970_v12 }
 0x26e   : > { %v2778_v27 = vpop.f32.mrf.mxu1 }
 0x26f   : > { %v2779_v46 = vadd.f32 %v4886_v17, %v2778_v27 }
 0x271   : > { %v2955_v8 = vadd.f32 %v2929_v38, %v2779_v46 }
 0x273   : > { %v2971_v50 = vmax.f32 %v2955_v8, 0.0 }
 0x275   : > { %2987 = vst.msk [vmem:[%s4893_s26 + $0x48] sm:$0xff] %vm647_vm5, %v2971_v50 }
 0x276   : > { %v2781_v55 = vpop.f32.mrf.mxu1 }
 0x277   : > { %v2782_v1 = vadd.f32 %v4886_v17, %v2781_v55 }
 0x279   : > { %v2956_v26 = vadd.f32 %v2932_v63, %v2782_v1 }
 0x27b   : > { %v2972_v44 = vmax.f32 %v2956_v26, 0.0 }
 0x27d   : > { %2988 = vst.msk [vmem:[%s4893_s26 + $0x50] sm:$0xff] %vm647_vm5, %v2972_v44 }
 0x27e   : > { %v2783_v37 = vpop.f32.mrf.mxu1 }
 0x27f   : > { %v2784_v58 = vadd.f32 %v4886_v17, %v2783_v37 }
 0x281   : > { %v2957_v42 = vadd.f32 %v2934_v48, %v2784_v58 }
 0x283   : > { %v2973_v21 = vmax.f32 %v2957_v42, 0.0 }
 0x285   : > { %2989 = vst.msk [vmem:[%s4893_s26 + $0x58] sm:$0xff] %vm647_vm5, %v2973_v21 }
 0x286   : > { %v2786_v33 = vpop.f32.mrf.mxu1 }
 0x287   : > { %v2787_v29 = vadd.f32 %v4886_v17, %v2786_v33 }
 0x289   : > { %v2958_v41 = vadd.f32 %v2937_v30, %v2787_v29 }
 0x28b   : > { %v2974_v52 = vmax.f32 %v2958_v41, 0.0 }
 0x28d   : > { %2990 = vst.msk [vmem:[%s4893_s26 + $0x60] sm:$0xff] %vm647_vm5, %v2974_v52 }
 0x28e   : > { %v2788_v14 = vpop.f32.mrf.mxu1 }
 0x28f   : > { %v2789_v11 = vadd.f32 %v4886_v17, %v2788_v14 }
 0x291   : > { %v2959_v53 = vadd.f32 %v2939_v61, %v2789_v11 }
 0x293   : > { %v2975_v10 = vmax.f32 %v2959_v53, 0.0 }
 0x295   : > { %2991 = vst.msk [vmem:[%s4893_s26 + $0x68] sm:$0xff] %vm647_vm5, %v2975_v10 }
 0x296   : > { %v2791_v57 = vpop.f32.mrf.mxu1 }
 0x297   : > { %v2792_v2 = vadd.f32 %v4886_v17, %v2791_v57 }
 0x299   : > { %v2960_v18 = vadd.f32 %v2942_v20, %v2792_v2 }
 0x29b   : > { %v2976_v62 = vmax.f32 %v2960_v18, 0.0 }
 0x29d   : > { %2992 = vst.msk [vmem:[%s4893_s26 + $0x70] sm:$0xff] %vm647_vm5, %v2976_v62 }
 0x29e   : > { %v2793_v28 = vpop.f32.mrf.mxu1 }
 0x29f   : > { %v2794_v54 = vadd.f32 %v4886_v17, %v2793_v28 }
 0x2a1   : > { %v2961_v15 = vadd.f32 %v2944_v7, %v2794_v54 }
 0x2a3   : > { %v2977_v19 = vmax.f32 %v2961_v15, 0.0 }
 0x2a5   : > { %2993 = vst.msk [vmem:[%s4893_s26 + $0x78] sm:$0xff] %vm647_vm5, %v2977_v19 }
 0x2a6   : > { %3905 = shalt.err (!%p3902_p7)
}
 0x2a7   : > { %s3974_s11 = smov 128   ;;  %s3975_s26 = smov 8  }
 0x2a8   : > { %3802 = dma.vmem_to_hbm [thread:$0]  (%p4072_p3), %s3011_s9, 2048, %s3013_s16, %s2995_s25, %s3974_s11, %s3974_s11, %s3975_s26  }
 0x2a9 PF: > { %p3808_p9 = scmp.ge.s32.totalorder %s3972_s12, 2  ;;  %s3027_s21 = sand.u32 1, %s3944_s27  }
 0x2aa   : > { %s3028_s22 = scalar_lea.sflag [#allocation3], %s3027_s21 }
 0x2ab   : > { %p3805_p10 = pnand %p3808_p9, %p4081_p8 }
 0x2ad   : > { %p3806_p11 = pneg %p3805_p10 }
 0x2af   : > { %3939 = dma.done.wait (%p3806_p11), %s3028_s22, 2048  }
 0x2b0   : > { %3941 = vsyncadd (%p3806_p11), %s3028_s22, 4294965248  ;;  %s21_s12 = sadd.s32 1, %s3972_s12   ;;  %s5027_s30 = sld [smem:[#allocation5_spill]] }
 0x2b1   : > { %p18_p12 = scmp.ge.s32.totalorder %s21_s12, 6   ;;  %s5028_s9 = sld [smem:[#allocation6_spill]] }
 0x2b2   : > { %s5029_s10 = sld [smem:[#allocation7_spill]]  ;;  %s5031_s27 = smov %s3948_s28 }
 0x2b3   : > { %s5030_s11 = sld [smem:[#allocation8_spill]]  ;;  %s5032_s28 = smov %s3952_s29 }
 0x2b4   : > { %s5033_s29 = smov %s4090_s23  ;;  %20 = sbr.rel (!%p18_p12) target bundleno = 5 (0x5), region = 101 }
 0x2b9   :  { %3034 = vsyncpa [#allocation3], 1 }
 0x2ba   :  { %3036 = vsyncpa [#allocation3 + $0x1], 1 }

</bundles_post_ra>
